<compile_context>
chip_gen: v7x
topology: tpu7x:2x2x1
jax: 0.10.0
libtpu: 0.0.40
codegen_flags: <defaults>
</compile_context>

<pallas_src>
import functools

import jax
import jax.numpy as jnp
from jax import lax
from jax.experimental import pallas as pl
from jax.experimental.pallas import tpu as pltpu

RMS_EPS = 1e-5  # LlamaRMSNorm eps used by the module


def _rmsnorm_f32(x, w, eps=RMS_EPS):
    # LlamaRMSNorm math in f32; caller casts to bf16 once, right before the MXU.
    xf = x.astype(jnp.float32)
    var = jnp.mean(xf * xf, axis=-1, keepdims=True)
    return (xf * lax.rsqrt(var + eps)) * w.astype(jnp.float32)


def _solve_cols(reg, yx, *, unroll):
    """Return W = yx @ inv(reg) for per-batch SPD `reg` via column-wise Gauss-Jordan
    on the stacked matrix [[reg], [yx]] (column ops == right-multiply by reg^{-1}).
    # TODO(synk): PyTorch reference uses Cholesky + two triangular solves; for the
    # SPD ridge-regularized system this pivot-free elimination is equivalent.
    """
    bblk, n, _ = reg.shape
    t = yx.shape[1]
    m = jnp.concatenate([reg, yx], axis=1)                                  # [B, n+t, n] f32
    rows = lax.broadcasted_iota(jnp.int32, (1, n + t, 1), 1)
    cols = lax.broadcasted_iota(jnp.int32, (1, 1, n), 2)

    def body(k, m):
        is_col_k = cols == k                                                # [1, 1, n]
        is_row_k = rows == k                                                # [1, n+t, 1]
        col_k = jnp.sum(jnp.where(is_col_k, m, 0.0), axis=2, keepdims=True)     # [B, n+t, 1]
        pivot = jnp.sum(jnp.where(is_row_k, col_k, 0.0), axis=1, keepdims=True)  # [B, 1, 1]
        col_k = col_k * (1.0 / pivot)                                       # exact divide
        row_k = jnp.sum(jnp.where(is_row_k, m, 0.0), axis=1, keepdims=True)      # [B, 1, n]
        factor = jnp.where(is_col_k, 0.0, row_k)
        m = m - col_k * factor
        m = jnp.where(is_col_k, col_k, m)
        return m

    m = lax.fori_loop(0, n, body, m, unroll=unroll)
    return m[:, n:, :]                                                      # [B, t, n]


def qpi_kernel(hid_ref, base_ref, src_ref, ln_in_ref, ln_base_ref, ln_src_ref,
               wenc_ref, benc_ref, dict_ref, xxt_ref,
               out_ref, pen_ref, *, lam, eps, unroll):
    f32, bf16 = jnp.float32, jnp.bfloat16
    N = dict_ref.shape[0]
    BT, D = base_ref.shape
    Bblk = hid_ref.shape[0]
    T = BT // Bblk

    # 1) edit_instruction_encodings: RMSNorm(hidden[:, -1]) -> Linear -> ReLU
    h = _rmsnorm_f32(hid_ref[...].reshape(Bblk, D), ln_in_ref[...]).astype(bf16)  # [Bblk, D]
    enc = lax.dot_general(h, wenc_ref[...], (((1,), (1,)), ((), ())),
                          preferred_element_type=f32)                       # [Bblk, N]
    tk = jnp.maximum(enc + benc_ref[...].astype(f32), 0.0)                  # [Bblk, N] f32

    # 2) single difference RHS: ydiff = RMSNorm(src) - RMSNorm(base), one bf16 cast
    nb = _rmsnorm_f32(base_ref[...], ln_base_ref[...])                      # [BT, D] f32
    ns = _rmsnorm_f32(src_ref[...], ln_src_ref[...])                        # [BT, D] f32
    ydiff = (ns - nb).astype(bf16)                                          # [BT, D]

    X = dict_ref[...]                                                       # [N, D] bf16
    yx = lax.dot_general(ydiff, X, (((1,), (1,)), ((), ())),
                         preferred_element_type=f32)                        # [BT, N] f32

    # 3) per-batch ridge system: reg_b = X X^T + diag((tk_b + eps)^-2)
    #    ridge diagonal generated in-kernel (no identity operand), exact reciprocal.
    tpe = tk + eps
    denom = 1.0 / (tpe * tpe)                                               # [Bblk, N] f32
    rN = lax.broadcasted_iota(jnp.int32, (1, N, N), 1)
    cN = lax.broadcasted_iota(jnp.int32, (1, N, N), 2)
    reg = xxt_ref[...] + jnp.where(rN == cN, denom[:, None, :], 0.0)        # [Bblk, N, N]

    w = _solve_cols(reg, yx.reshape(Bblk, T, N), unroll=unroll)             # [Bblk, T, N]

    # predictions: out = base + (pred_src - pred_base) = base + W @ X
    pred = lax.dot_general(w.reshape(BT, N).astype(bf16), X,
                           (((1,), (0,)), ((), ())),
                           preferred_element_type=f32)                      # [BT, D] f32
    out_ref[...] = (base_ref[...].astype(f32) + pred).astype(out_ref.dtype)

    # 4) penalty (inv_alpha): lam / (lam + tk^-2) == lam*tk^2 / (lam*tk^2 + 1)
    #    (algebraically equivalent, handles tk == 0); approx reciprocal is fine here.
    tk2 = tk * tk
    pen = (lam * tk2) * pl.reciprocal(lam * tk2 + 1.0, approx=True)         # [Bblk, N]
    pen_ref[...] = pen[:, None, :]                                          # [Bblk, 1, N]


def quasi_projective_intervention(base, source, hidden_states, params, *,
                                  lambda_parameter=0.1, epsilon=1e-6, batch_block=None):
    B, T, D = base.shape
    N = params["dict_weight"].shape[0]

    # Batch blocking: amortize per-grid-step overhead while keeping >= 2 grid steps
    # so v7x's two TensorCores both get work (v5e/v6e are insensitive to this).
    if batch_block is None:
        batch_block = 1
        for cand in (8, 4, 2):
            if B % cand == 0 and B // cand >= 2 and (cand * T) % 8 == 0:
                batch_block = cand
                break
    assert B % batch_block == 0
    num_blocks = B // batch_block
    BT = batch_block * T

    hid_last = hidden_states[:, -1:, :]                    # [B, 1, D]   (glue)
    base2 = base.reshape(B * T, D)                         # lane-dense slabs for the kernel
    src2 = source.reshape(B * T, D)

    w_enc = params["w_enc"]                                # [N, D] (contracted on D in-kernel)
    b_enc = params["b_enc"].reshape(1, N)
    ln_in = params["ln_in"].reshape(1, D)
    ln_base = params["ln_base"].reshape(1, D)
    ln_src = params["ln_src"].reshape(1, D)
    dict_w = params["dict_weight"]                         # [N, D]

    # Batch-invariant Gram matrix hoisted out of the grid (computed once per call).
    xxt = jnp.dot(dict_w, dict_w.T, preferred_element_type=jnp.float32)     # [N, N] f32

    unroll = True if N <= 32 else 8                        # partial unroll for large dicts
    kernel = functools.partial(qpi_kernel, lam=float(lambda_parameter),
                               eps=float(epsilon), unroll=unroll)
    const2 = lambda b: (0, 0)

    out2, pen = pl.pallas_call(
        kernel,
        out_shape=(jax.ShapeDtypeStruct((B * T, D), base.dtype),
                   jax.ShapeDtypeStruct((B, 1, N), jnp.float32)),
        grid_spec=pltpu.PrefetchScalarGridSpec(
            num_scalar_prefetch=0,
            grid=(num_blocks,),
            in_specs=(
                pl.BlockSpec((batch_block, 1, D), lambda b: (b, 0, 0)),  # hidden last token
                pl.BlockSpec((BT, D), lambda b: (b, 0)),                 # base  (flattened)
                pl.BlockSpec((BT, D), lambda b: (b, 0)),                 # source (flattened)
                pl.BlockSpec((1, D), const2),                            # input_layernorm w
                pl.BlockSpec((1, D), const2),                            # base_layernorm w
                pl.BlockSpec((1, D), const2),                            # source_layernorm w
                pl.BlockSpec((N, D), const2),                            # encoder weight
                pl.BlockSpec((1, N), const2),                            # encoder bias
                pl.BlockSpec((N, D), const2),                            # dictionary weight
                pl.BlockSpec((N, N), const2),                            # X X^T (f32, hoisted)
            ),
            out_specs=(
                pl.BlockSpec((BT, D), lambda b: (b, 0)),                 # intervened hidden
                pl.BlockSpec((batch_block, 1, N), lambda b: (b, 0, 0)),  # per-elem penalties
            ),
        ),
        compiler_params=pltpu.CompilerParams(
            dimension_semantics=("parallel",),       # independent batch blocks (v7x 2 TCs)
            vmem_limit_bytes=32 * 1024 * 1024),      # safe on all of v5e/v6e/v7x
    )(hid_last, base2, src2, ln_in, ln_base, ln_src, w_enc, b_enc, dict_w, xxt)

    out = out2.reshape(B, T, D)
    penalty = jnp.mean(pen)                          # == torch.mean over [B, dict_size]
    return out, penalty


if __name__ == "__main__":
    # Small shapes consistent with the module's forward; D is a multiple of 128 so the
    # output slab is lane-dense, and B=4 exercises batch blocking with a 2-step grid.
    B, T, S, D, N = 4, 8, 8, 128, 16
    key = jax.random.PRNGKey(0)
    k_base, k_src, k_hid, k_w, k_b, k_dict = jax.random.split(key, 6)

    base = jax.random.normal(k_base, (B, T, D), jnp.float32).astype(jnp.bfloat16)
    source = jax.random.normal(k_src, (B, T, D), jnp.float32).astype(jnp.bfloat16)
    hidden_states = jax.random.normal(k_hid, (B, S, D), jnp.float32).astype(jnp.bfloat16)

    params = {
        # nn.Linear(D -> N): weight [N, D], bias [N]  (deterministic synthetic init)
        "w_enc": (0.1 * jax.random.normal(k_w, (N, D), jnp.float32)).astype(jnp.bfloat16),
        "b_enc": (0.1 * jax.random.normal(k_b, (N,), jnp.float32)).astype(jnp.bfloat16),
        # nn.Embedding(N, D) weight
        "dict_weight": jax.random.normal(k_dict, (N, D), jnp.float32).astype(jnp.bfloat16),
        # LlamaRMSNorm weights initialize to ones
        "ln_in": jnp.ones((D,), jnp.bfloat16),
        "ln_base": jnp.ones((D,), jnp.bfloat16),
        "ln_src": jnp.ones((D,), jnp.bfloat16),
    }

    out, penalty = quasi_projective_intervention(
        base, source, hidden_states, params,
        lambda_parameter=0.1, epsilon=1e-6)
    jax.block_until_ready(out)
    jax.block_until_ready(penalty)
    print("KERNEL_OK")
</pallas_src>

<mosaic_0001>
module attributes {stable_mosaic.version = 11 : i64} {
  func.func @qpi_kernel(%arg0: i32, %arg1: memref<2x1x128xbf16, #tpu.memory_space<vmem>>, %arg2: memref<16x128xbf16, #tpu.memory_space<vmem>>, %arg3: memref<16x128xbf16, #tpu.memory_space<vmem>>, %arg4: memref<1x128xbf16, #tpu.memory_space<vmem>>, %arg5: memref<1x128xbf16, #tpu.memory_space<vmem>>, %arg6: memref<1x128xbf16, #tpu.memory_space<vmem>>, %arg7: memref<16x128xbf16, #tpu.memory_space<vmem>>, %arg8: memref<1x16xbf16, #tpu.memory_space<vmem>>, %arg9: memref<16x128xbf16, #tpu.memory_space<vmem>>, %arg10: memref<16x16xf32, #tpu.memory_space<vmem>>, %arg11: memref<16x128xbf16, #tpu.memory_space<vmem>>, %arg12: memref<2x1x16xf32, #tpu.memory_space<vmem>>) attributes {dimension_semantics = [#tpu.dimension_semantics<parallel>], iteration_bounds = array<i64: 2>, scalar_prefetch = 0 : i64, scratch_operands = 0 : i64, tpu.core_type = #tpu.core_type<tc>, window_params = [{transform_indices = @transform_0, window_bounds = array<i64: 2, 1, 128>}, {transform_indices = @transform_1, window_bounds = array<i64: 16, 128>}, {transform_indices = @transform_2, window_bounds = array<i64: 16, 128>}, {pipeline_mode = #tpu.pipeline_mode<synchronous>, transform_indices = @transform_3, window_bounds = array<i64: 1, 128>}, {pipeline_mode = #tpu.pipeline_mode<synchronous>, transform_indices = @transform_4, window_bounds = array<i64: 1, 128>}, {pipeline_mode = #tpu.pipeline_mode<synchronous>, transform_indices = @transform_5, window_bounds = array<i64: 1, 128>}, {pipeline_mode = #tpu.pipeline_mode<synchronous>, transform_indices = @transform_6, window_bounds = array<i64: 16, 128>}, {pipeline_mode = #tpu.pipeline_mode<synchronous>, transform_indices = @transform_7, window_bounds = array<i64: 1, 16>}, {pipeline_mode = #tpu.pipeline_mode<synchronous>, transform_indices = @transform_8, window_bounds = array<i64: 16, 128>}, {pipeline_mode = #tpu.pipeline_mode<synchronous>, transform_indices = @transform_9, window_bounds = array<i64: 16, 16>}, {transform_indices = @transform_10, window_bounds = array<i64: 16, 128>}, {transform_indices = @transform_11, window_bounds = array<i64: 2, 1, 16>}]} {
    %c0 = arith.constant 0 : index
    %c0_0 = arith.constant 0 : index
    %c0_1 = arith.constant 0 : index
    %0 = vector.load %arg1[%c0, %c0_0, %c0_1] : memref<2x1x128xbf16, #tpu.memory_space<vmem>>, vector<2x1x128xbf16>
    %1 = vector.shape_cast %0 : vector<2x1x128xbf16> to vector<2x128xbf16>
    %c0_2 = arith.constant 0 : index
    %c0_3 = arith.constant 0 : index
    %2 = vector.load %arg4[%c0_2, %c0_3] : memref<1x128xbf16, #tpu.memory_space<vmem>>, vector<1x128xbf16>
    %3 = arith.extf %1 : vector<2x128xbf16> to vector<2x128xf32>
    %4 = arith.mulf %3, %3 : vector<2x128xf32>
    %cst = arith.constant dense<0.000000e+00> : vector<2xf32>
    %5 = vector.multi_reduction <add>, %4, %cst [1] : vector<2x128xf32> to vector<2xf32>
    %6 = vector.shape_cast %5 : vector<2xf32> to vector<2x1xf32>
    %cst_4 = arith.constant 1.280000e+02 : f32
    %7 = vector.broadcast %cst_4 : f32 to vector<2x1xf32>
    %8 = arith.divf %6, %7 : vector<2x1xf32>
    %cst_5 = arith.constant 9.99999974E-6 : f32
    %9 = vector.broadcast %cst_5 : f32 to vector<2x1xf32>
    %10 = arith.addf %8, %9 : vector<2x1xf32>
    %11 = math.rsqrt %10 : vector<2x1xf32>
    %12 = vector.broadcast %11 : vector<2x1xf32> to vector<2x128xf32>
    %13 = arith.mulf %3, %12 : vector<2x128xf32>
    %14 = arith.extf %2 : vector<1x128xbf16> to vector<1x128xf32>
    %15 = vector.broadcast %14 : vector<1x128xf32> to vector<2x128xf32>
    %16 = arith.mulf %13, %15 : vector<2x128xf32>
    %17 = arith.truncf %16 : vector<2x128xf32> to vector<2x128xbf16>
    %c0_6 = arith.constant 0 : index
    %c0_7 = arith.constant 0 : index
    %18 = vector.load %arg7[%c0_6, %c0_7] : memref<16x128xbf16, #tpu.memory_space<vmem>>, vector<16x128xbf16>
    %cst_8 = arith.constant dense<0.000000e+00> : vector<2x16xf32>
    %19 = tpu.matmul %17, %18, %cst_8 {dimension_numbers = #tpu.dot_dimension_numbers<[1], [1], [0], [0], [0, 0, 1, 0], [], []>} : vector<2x128xbf16>, vector<16x128xbf16>, vector<2x16xf32> -> vector<2x16xf32>
    %c0_9 = arith.constant 0 : index
    %c0_10 = arith.constant 0 : index
    %20 = vector.load %arg8[%c0_9, %c0_10] : memref<1x16xbf16, #tpu.memory_space<vmem>>, vector<1x16xbf16>
    %21 = arith.extf %20 : vector<1x16xbf16> to vector<1x16xf32>
    %22 = vector.broadcast %21 : vector<1x16xf32> to vector<2x16xf32>
    %23 = arith.addf %19, %22 : vector<2x16xf32>
    %cst_11 = arith.constant 0.000000e+00 : f32
    %24 = vector.broadcast %cst_11 : f32 to vector<2x16xf32>
    %25 = arith.maximumf %23, %24 : vector<2x16xf32>
    %c0_12 = arith.constant 0 : index
    %c0_13 = arith.constant 0 : index
    %26 = vector.load %arg2[%c0_12, %c0_13] : memref<16x128xbf16, #tpu.memory_space<vmem>>, vector<16x128xbf16>
    %c0_14 = arith.constant 0 : index
    %c0_15 = arith.constant 0 : index
    %27 = vector.load %arg5[%c0_14, %c0_15] : memref<1x128xbf16, #tpu.memory_space<vmem>>, vector<1x128xbf16>
    %28 = arith.extf %26 : vector<16x128xbf16> to vector<16x128xf32>
    %29 = arith.mulf %28, %28 : vector<16x128xf32>
    %cst_16 = arith.constant dense<0.000000e+00> : vector<16xf32>
    %30 = vector.multi_reduction <add>, %29, %cst_16 [1] : vector<16x128xf32> to vector<16xf32>
    %31 = vector.shape_cast %30 : vector<16xf32> to vector<16x1xf32>
    %cst_17 = arith.constant 1.280000e+02 : f32
    %32 = vector.broadcast %cst_17 : f32 to vector<16x1xf32>
    %33 = arith.divf %31, %32 : vector<16x1xf32>
    %cst_18 = arith.constant 9.99999974E-6 : f32
    %34 = vector.broadcast %cst_18 : f32 to vector<16x1xf32>
    %35 = arith.addf %33, %34 : vector<16x1xf32>
    %36 = math.rsqrt %35 : vector<16x1xf32>
    %37 = vector.broadcast %36 : vector<16x1xf32> to vector<16x128xf32>
    %38 = arith.mulf %28, %37 : vector<16x128xf32>
    %39 = arith.extf %27 : vector<1x128xbf16> to vector<1x128xf32>
    %40 = vector.broadcast %39 : vector<1x128xf32> to vector<16x128xf32>
    %41 = arith.mulf %38, %40 : vector<16x128xf32>
    %c0_19 = arith.constant 0 : index
    %c0_20 = arith.constant 0 : index
    %42 = vector.load %arg3[%c0_19, %c0_20] : memref<16x128xbf16, #tpu.memory_space<vmem>>, vector<16x128xbf16>
    %c0_21 = arith.constant 0 : index
    %c0_22 = arith.constant 0 : index
    %43 = vector.load %arg6[%c0_21, %c0_22] : memref<1x128xbf16, #tpu.memory_space<vmem>>, vector<1x128xbf16>
    %44 = arith.extf %42 : vector<16x128xbf16> to vector<16x128xf32>
    %45 = arith.mulf %44, %44 : vector<16x128xf32>
    %cst_23 = arith.constant dense<0.000000e+00> : vector<16xf32>
    %46 = vector.multi_reduction <add>, %45, %cst_23 [1] : vector<16x128xf32> to vector<16xf32>
    %47 = vector.shape_cast %46 : vector<16xf32> to vector<16x1xf32>
    %cst_24 = arith.constant 1.280000e+02 : f32
    %48 = vector.broadcast %cst_24 : f32 to vector<16x1xf32>
    %49 = arith.divf %47, %48 : vector<16x1xf32>
    %cst_25 = arith.constant 9.99999974E-6 : f32
    %50 = vector.broadcast %cst_25 : f32 to vector<16x1xf32>
    %51 = arith.addf %49, %50 : vector<16x1xf32>
    %52 = math.rsqrt %51 : vector<16x1xf32>
    %53 = vector.broadcast %52 : vector<16x1xf32> to vector<16x128xf32>
    %54 = arith.mulf %44, %53 : vector<16x128xf32>
    %55 = arith.extf %43 : vector<1x128xbf16> to vector<1x128xf32>
    %56 = vector.broadcast %55 : vector<1x128xf32> to vector<16x128xf32>
    %57 = arith.mulf %54, %56 : vector<16x128xf32>
    %58 = arith.subf %57, %41 : vector<16x128xf32>
    %59 = arith.truncf %58 : vector<16x128xf32> to vector<16x128xbf16>
    %c0_26 = arith.constant 0 : index
    %c0_27 = arith.constant 0 : index
    %60 = vector.load %arg9[%c0_26, %c0_27] : memref<16x128xbf16, #tpu.memory_space<vmem>>, vector<16x128xbf16>
    %cst_28 = arith.constant dense<0.000000e+00> : vector<16x16xf32>
    %61 = tpu.matmul %59, %60, %cst_28 {dimension_numbers = #tpu.dot_dimension_numbers<[1], [1], [0], [0], [0, 0, 1, 0], [], []>} : vector<16x128xbf16>, vector<16x128xbf16>, vector<16x16xf32> -> vector<16x16xf32>
    %cst_29 = arith.constant 9.99999997E-7 : f32
    %62 = vector.broadcast %cst_29 : f32 to vector<2x16xf32>
    %63 = arith.addf %25, %62 : vector<2x16xf32>
    %64 = arith.mulf %63, %63 : vector<2x16xf32>
    %cst_30 = arith.constant 1.000000e+00 : f32
    %65 = vector.broadcast %cst_30 : f32 to vector<2x16xf32>
    %66 = arith.divf %65, %64 : vector<2x16xf32>
    %67 = tpu.iota {dimensions = array<i32: 1>} : vector<1x16x16xi32>
    %68 = tpu.iota {dimensions = array<i32: 2>} : vector<1x16x16xi32>
    %c0_31 = arith.constant 0 : index
    %c0_32 = arith.constant 0 : index
    %69 = vector.load %arg10[%c0_31, %c0_32] : memref<16x16xf32, #tpu.memory_space<vmem>>, vector<16x16xf32>
    %70 = arith.cmpi eq, %67, %68 : vector<1x16x16xi32>
    %71 = vector.shape_cast %66 : vector<2x16xf32> to vector<2x1x16xf32>
    %cst_33 = arith.constant 0.000000e+00 : f32
    %72 = vector.shape_cast %70 : vector<1x16x16xi1> to vector<1x16x16xi1>
    %73 = vector.broadcast %72 : vector<1x16x16xi1> to vector<2x16x16xi1>
    %74 = vector.shape_cast %71 : vector<2x1x16xf32> to vector<2x1x16xf32>
    %75 = vector.broadcast %74 : vector<2x1x16xf32> to vector<2x16x16xf32>
    %76 = vector.broadcast %cst_33 : f32 to vector<2x16x16xf32>
    %77 = arith.select %73, %75, %76 : vector<2x16x16xi1>, vector<2x16x16xf32>
    %78 = vector.shape_cast %69 : vector<16x16xf32> to vector<1x16x16xf32>
    %79 = vector.broadcast %78 : vector<1x16x16xf32> to vector<2x16x16xf32>
    %80 = arith.addf %79, %77 : vector<2x16x16xf32>
    %81 = vector.shape_cast %61 : vector<16x16xf32> to vector<2x8x16xf32>
    %82 = tpu.concatenate %80, %81 in 1 : vector<2x16x16xf32>, vector<2x8x16xf32> -> vector<2x24x16xf32>
    %83 = tpu.iota {dimensions = array<i32: 1>} : vector<1x24x1xi32>
    %84 = tpu.iota {dimensions = array<i32: 2>} : vector<1x1x16xi32>
    %c0_i32 = arith.constant 0 : i32
    %85 = vector.broadcast %c0_i32 : i32 to vector<1x1x16xi32>
    %86 = arith.cmpi eq, %84, %85 : vector<1x1x16xi32>
    %87 = vector.broadcast %c0_i32 : i32 to vector<1x24x1xi32>
    %88 = arith.cmpi eq, %83, %87 : vector<1x24x1xi32>
    %cst_34 = arith.constant 0.000000e+00 : f32
    %89 = vector.shape_cast %86 : vector<1x1x16xi1> to vector<1x1x16xi1>
    %90 = vector.broadcast %89 : vector<1x1x16xi1> to vector<2x24x16xi1>
    %91 = vector.broadcast %cst_34 : f32 to vector<2x24x16xf32>
    %92 = arith.select %90, %82, %91 : vector<2x24x16xi1>, vector<2x24x16xf32>
    %cst_35 = arith.constant dense<0.000000e+00> : vector<2x24xf32>
    %93 = vector.multi_reduction <add>, %92, %cst_35 [2] : vector<2x24x16xf32> to vector<2x24xf32>
    %94 = vector.shape_cast %93 : vector<2x24xf32> to vector<2x24x1xf32>
    %cst_36 = arith.constant 0.000000e+00 : f32
    %95 = vector.shape_cast %88 : vector<1x24x1xi1> to vector<1x24x1xi1>
    %96 = vector.broadcast %95 : vector<1x24x1xi1> to vector<2x24x1xi1>
    %97 = vector.broadcast %cst_36 : f32 to vector<2x24x1xf32>
    %98 = arith.select %96, %94, %97 : vector<2x24x1xi1>, vector<2x24x1xf32>
    %cst_37 = arith.constant dense<0.000000e+00> : vector<2x1xf32>
    %99 = vector.multi_reduction <add>, %98, %cst_37 [1] : vector<2x24x1xf32> to vector<2x1xf32>
    %100 = vector.shape_cast %99 : vector<2x1xf32> to vector<2x1x1xf32>
    %cst_38 = arith.constant 1.000000e+00 : f32
    %101 = vector.broadcast %cst_38 : f32 to vector<2x1x1xf32>
    %102 = arith.divf %101, %100 : vector<2x1x1xf32>
    %103 = vector.broadcast %102 : vector<2x1x1xf32> to vector<2x24x1xf32>
    %104 = arith.mulf %94, %103 : vector<2x24x1xf32>
    %cst_39 = arith.constant 0.000000e+00 : f32
    %105 = vector.shape_cast %88 : vector<1x24x1xi1> to vector<1x24x1xi1>
    %106 = vector.broadcast %105 : vector<1x24x1xi1> to vector<2x24x16xi1>
    %107 = vector.broadcast %cst_39 : f32 to vector<2x24x16xf32>
    %108 = arith.select %106, %82, %107 : vector<2x24x16xi1>, vector<2x24x16xf32>
    %cst_40 = arith.constant dense<0.000000e+00> : vector<2x16xf32>
    %109 = vector.multi_reduction <add>, %108, %cst_40 [1] : vector<2x24x16xf32> to vector<2x16xf32>
    %110 = vector.shape_cast %109 : vector<2x16xf32> to vector<2x1x16xf32>
    %cst_41 = arith.constant 0.000000e+00 : f32
    %111 = vector.shape_cast %86 : vector<1x1x16xi1> to vector<1x1x16xi1>
    %112 = vector.broadcast %111 : vector<1x1x16xi1> to vector<2x1x16xi1>
    %113 = vector.broadcast %cst_41 : f32 to vector<2x1x16xf32>
    %114 = arith.select %112, %113, %110 : vector<2x1x16xi1>, vector<2x1x16xf32>
    %115 = vector.broadcast %104 : vector<2x24x1xf32> to vector<2x24x16xf32>
    %116 = vector.broadcast %114 : vector<2x1x16xf32> to vector<2x24x16xf32>
    %117 = arith.mulf %115, %116 : vector<2x24x16xf32>
    %118 = arith.subf %82, %117 : vector<2x24x16xf32>
    %119 = vector.shape_cast %86 : vector<1x1x16xi1> to vector<1x1x16xi1>
    %120 = vector.broadcast %119 : vector<1x1x16xi1> to vector<2x24x16xi1>
    %121 = vector.shape_cast %104 : vector<2x24x1xf32> to vector<2x24x1xf32>
    %122 = vector.broadcast %121 : vector<2x24x1xf32> to vector<2x24x16xf32>
    %123 = arith.select %120, %122, %118 : vector<2x24x16xi1>, vector<2x24x16xf32>
    %c1_i32 = arith.constant 1 : i32
    %124 = vector.broadcast %c1_i32 : i32 to vector<1x1x16xi32>
    %125 = arith.cmpi eq, %84, %124 : vector<1x1x16xi32>
    %126 = vector.broadcast %c1_i32 : i32 to vector<1x24x1xi32>
    %127 = arith.cmpi eq, %83, %126 : vector<1x24x1xi32>
    %cst_42 = arith.constant 0.000000e+00 : f32
    %128 = vector.shape_cast %125 : vector<1x1x16xi1> to vector<1x1x16xi1>
    %129 = vector.broadcast %128 : vector<1x1x16xi1> to vector<2x24x16xi1>
    %130 = vector.broadcast %cst_42 : f32 to vector<2x24x16xf32>
    %131 = arith.select %129, %123, %130 : vector<2x24x16xi1>, vector<2x24x16xf32>
    %cst_43 = arith.constant dense<0.000000e+00> : vector<2x24xf32>
    %132 = vector.multi_reduction <add>, %131, %cst_43 [2] : vector<2x24x16xf32> to vector<2x24xf32>
    %133 = vector.shape_cast %132 : vector<2x24xf32> to vector<2x24x1xf32>
    %cst_44 = arith.constant 0.000000e+00 : f32
    %134 = vector.shape_cast %127 : vector<1x24x1xi1> to vector<1x24x1xi1>
    %135 = vector.broadcast %134 : vector<1x24x1xi1> to vector<2x24x1xi1>
    %136 = vector.broadcast %cst_44 : f32 to vector<2x24x1xf32>
    %137 = arith.select %135, %133, %136 : vector<2x24x1xi1>, vector<2x24x1xf32>
    %cst_45 = arith.constant dense<0.000000e+00> : vector<2x1xf32>
    %138 = vector.multi_reduction <add>, %137, %cst_45 [1] : vector<2x24x1xf32> to vector<2x1xf32>
    %139 = vector.shape_cast %138 : vector<2x1xf32> to vector<2x1x1xf32>
    %cst_46 = arith.constant 1.000000e+00 : f32
    %140 = vector.broadcast %cst_46 : f32 to vector<2x1x1xf32>
    %141 = arith.divf %140, %139 : vector<2x1x1xf32>
    %142 = vector.broadcast %141 : vector<2x1x1xf32> to vector<2x24x1xf32>
    %143 = arith.mulf %133, %142 : vector<2x24x1xf32>
    %cst_47 = arith.constant 0.000000e+00 : f32
    %144 = vector.shape_cast %127 : vector<1x24x1xi1> to vector<1x24x1xi1>
    %145 = vector.broadcast %144 : vector<1x24x1xi1> to vector<2x24x16xi1>
    %146 = vector.broadcast %cst_47 : f32 to vector<2x24x16xf32>
    %147 = arith.select %145, %123, %146 : vector<2x24x16xi1>, vector<2x24x16xf32>
    %cst_48 = arith.constant dense<0.000000e+00> : vector<2x16xf32>
    %148 = vector.multi_reduction <add>, %147, %cst_48 [1] : vector<2x24x16xf32> to vector<2x16xf32>
    %149 = vector.shape_cast %148 : vector<2x16xf32> to vector<2x1x16xf32>
    %cst_49 = arith.constant 0.000000e+00 : f32
    %150 = vector.shape_cast %125 : vector<1x1x16xi1> to vector<1x1x16xi1>
    %151 = vector.broadcast %150 : vector<1x1x16xi1> to vector<2x1x16xi1>
    %152 = vector.broadcast %cst_49 : f32 to vector<2x1x16xf32>
    %153 = arith.select %151, %152, %149 : vector<2x1x16xi1>, vector<2x1x16xf32>
    %154 = vector.broadcast %143 : vector<2x24x1xf32> to vector<2x24x16xf32>
    %155 = vector.broadcast %153 : vector<2x1x16xf32> to vector<2x24x16xf32>
    %156 = arith.mulf %154, %155 : vector<2x24x16xf32>
    %157 = arith.subf %123, %156 : vector<2x24x16xf32>
    %158 = vector.shape_cast %125 : vector<1x1x16xi1> to vector<1x1x16xi1>
    %159 = vector.broadcast %158 : vector<1x1x16xi1> to vector<2x24x16xi1>
    %160 = vector.shape_cast %143 : vector<2x24x1xf32> to vector<2x24x1xf32>
    %161 = vector.broadcast %160 : vector<2x24x1xf32> to vector<2x24x16xf32>
    %162 = arith.select %159, %161, %157 : vector<2x24x16xi1>, vector<2x24x16xf32>
    %c2_i32 = arith.constant 2 : i32
    %163 = vector.broadcast %c2_i32 : i32 to vector<1x1x16xi32>
    %164 = arith.cmpi eq, %84, %163 : vector<1x1x16xi32>
    %165 = vector.broadcast %c2_i32 : i32 to vector<1x24x1xi32>
    %166 = arith.cmpi eq, %83, %165 : vector<1x24x1xi32>
    %cst_50 = arith.constant 0.000000e+00 : f32
    %167 = vector.shape_cast %164 : vector<1x1x16xi1> to vector<1x1x16xi1>
    %168 = vector.broadcast %167 : vector<1x1x16xi1> to vector<2x24x16xi1>
    %169 = vector.broadcast %cst_50 : f32 to vector<2x24x16xf32>
    %170 = arith.select %168, %162, %169 : vector<2x24x16xi1>, vector<2x24x16xf32>
    %cst_51 = arith.constant dense<0.000000e+00> : vector<2x24xf32>
    %171 = vector.multi_reduction <add>, %170, %cst_51 [2] : vector<2x24x16xf32> to vector<2x24xf32>
    %172 = vector.shape_cast %171 : vector<2x24xf32> to vector<2x24x1xf32>
    %cst_52 = arith.constant 0.000000e+00 : f32
    %173 = vector.shape_cast %166 : vector<1x24x1xi1> to vector<1x24x1xi1>
    %174 = vector.broadcast %173 : vector<1x24x1xi1> to vector<2x24x1xi1>
    %175 = vector.broadcast %cst_52 : f32 to vector<2x24x1xf32>
    %176 = arith.select %174, %172, %175 : vector<2x24x1xi1>, vector<2x24x1xf32>
    %cst_53 = arith.constant dense<0.000000e+00> : vector<2x1xf32>
    %177 = vector.multi_reduction <add>, %176, %cst_53 [1] : vector<2x24x1xf32> to vector<2x1xf32>
    %178 = vector.shape_cast %177 : vector<2x1xf32> to vector<2x1x1xf32>
    %cst_54 = arith.constant 1.000000e+00 : f32
    %179 = vector.broadcast %cst_54 : f32 to vector<2x1x1xf32>
    %180 = arith.divf %179, %178 : vector<2x1x1xf32>
    %181 = vector.broadcast %180 : vector<2x1x1xf32> to vector<2x24x1xf32>
    %182 = arith.mulf %172, %181 : vector<2x24x1xf32>
    %cst_55 = arith.constant 0.000000e+00 : f32
    %183 = vector.shape_cast %166 : vector<1x24x1xi1> to vector<1x24x1xi1>
    %184 = vector.broadcast %183 : vector<1x24x1xi1> to vector<2x24x16xi1>
    %185 = vector.broadcast %cst_55 : f32 to vector<2x24x16xf32>
    %186 = arith.select %184, %162, %185 : vector<2x24x16xi1>, vector<2x24x16xf32>
    %cst_56 = arith.constant dense<0.000000e+00> : vector<2x16xf32>
    %187 = vector.multi_reduction <add>, %186, %cst_56 [1] : vector<2x24x16xf32> to vector<2x16xf32>
    %188 = vector.shape_cast %187 : vector<2x16xf32> to vector<2x1x16xf32>
    %cst_57 = arith.constant 0.000000e+00 : f32
    %189 = vector.shape_cast %164 : vector<1x1x16xi1> to vector<1x1x16xi1>
    %190 = vector.broadcast %189 : vector<1x1x16xi1> to vector<2x1x16xi1>
    %191 = vector.broadcast %cst_57 : f32 to vector<2x1x16xf32>
    %192 = arith.select %190, %191, %188 : vector<2x1x16xi1>, vector<2x1x16xf32>
    %193 = vector.broadcast %182 : vector<2x24x1xf32> to vector<2x24x16xf32>
    %194 = vector.broadcast %192 : vector<2x1x16xf32> to vector<2x24x16xf32>
    %195 = arith.mulf %193, %194 : vector<2x24x16xf32>
    %196 = arith.subf %162, %195 : vector<2x24x16xf32>
    %197 = vector.shape_cast %164 : vector<1x1x16xi1> to vector<1x1x16xi1>
    %198 = vector.broadcast %197 : vector<1x1x16xi1> to vector<2x24x16xi1>
    %199 = vector.shape_cast %182 : vector<2x24x1xf32> to vector<2x24x1xf32>
    %200 = vector.broadcast %199 : vector<2x24x1xf32> to vector<2x24x16xf32>
    %201 = arith.select %198, %200, %196 : vector<2x24x16xi1>, vector<2x24x16xf32>
    %c3_i32 = arith.constant 3 : i32
    %202 = vector.broadcast %c3_i32 : i32 to vector<1x1x16xi32>
    %203 = arith.cmpi eq, %84, %202 : vector<1x1x16xi32>
    %204 = vector.broadcast %c3_i32 : i32 to vector<1x24x1xi32>
    %205 = arith.cmpi eq, %83, %204 : vector<1x24x1xi32>
    %cst_58 = arith.constant 0.000000e+00 : f32
    %206 = vector.shape_cast %203 : vector<1x1x16xi1> to vector<1x1x16xi1>
    %207 = vector.broadcast %206 : vector<1x1x16xi1> to vector<2x24x16xi1>
    %208 = vector.broadcast %cst_58 : f32 to vector<2x24x16xf32>
    %209 = arith.select %207, %201, %208 : vector<2x24x16xi1>, vector<2x24x16xf32>
    %cst_59 = arith.constant dense<0.000000e+00> : vector<2x24xf32>
    %210 = vector.multi_reduction <add>, %209, %cst_59 [2] : vector<2x24x16xf32> to vector<2x24xf32>
    %211 = vector.shape_cast %210 : vector<2x24xf32> to vector<2x24x1xf32>
    %cst_60 = arith.constant 0.000000e+00 : f32
    %212 = vector.shape_cast %205 : vector<1x24x1xi1> to vector<1x24x1xi1>
    %213 = vector.broadcast %212 : vector<1x24x1xi1> to vector<2x24x1xi1>
    %214 = vector.broadcast %cst_60 : f32 to vector<2x24x1xf32>
    %215 = arith.select %213, %211, %214 : vector<2x24x1xi1>, vector<2x24x1xf32>
    %cst_61 = arith.constant dense<0.000000e+00> : vector<2x1xf32>
    %216 = vector.multi_reduction <add>, %215, %cst_61 [1] : vector<2x24x1xf32> to vector<2x1xf32>
    %217 = vector.shape_cast %216 : vector<2x1xf32> to vector<2x1x1xf32>
    %cst_62 = arith.constant 1.000000e+00 : f32
    %218 = vector.broadcast %cst_62 : f32 to vector<2x1x1xf32>
    %219 = arith.divf %218, %217 : vector<2x1x1xf32>
    %220 = vector.broadcast %219 : vector<2x1x1xf32> to vector<2x24x1xf32>
    %221 = arith.mulf %211, %220 : vector<2x24x1xf32>
    %cst_63 = arith.constant 0.000000e+00 : f32
    %222 = vector.shape_cast %205 : vector<1x24x1xi1> to vector<1x24x1xi1>
    %223 = vector.broadcast %222 : vector<1x24x1xi1> to vector<2x24x16xi1>
    %224 = vector.broadcast %cst_63 : f32 to vector<2x24x16xf32>
    %225 = arith.select %223, %201, %224 : vector<2x24x16xi1>, vector<2x24x16xf32>
    %cst_64 = arith.constant dense<0.000000e+00> : vector<2x16xf32>
    %226 = vector.multi_reduction <add>, %225, %cst_64 [1] : vector<2x24x16xf32> to vector<2x16xf32>
    %227 = vector.shape_cast %226 : vector<2x16xf32> to vector<2x1x16xf32>
    %cst_65 = arith.constant 0.000000e+00 : f32
    %228 = vector.shape_cast %203 : vector<1x1x16xi1> to vector<1x1x16xi1>
    %229 = vector.broadcast %228 : vector<1x1x16xi1> to vector<2x1x16xi1>
    %230 = vector.broadcast %cst_65 : f32 to vector<2x1x16xf32>
    %231 = arith.select %229, %230, %227 : vector<2x1x16xi1>, vector<2x1x16xf32>
    %232 = vector.broadcast %221 : vector<2x24x1xf32> to vector<2x24x16xf32>
    %233 = vector.broadcast %231 : vector<2x1x16xf32> to vector<2x24x16xf32>
    %234 = arith.mulf %232, %233 : vector<2x24x16xf32>
    %235 = arith.subf %201, %234 : vector<2x24x16xf32>
    %236 = vector.shape_cast %203 : vector<1x1x16xi1> to vector<1x1x16xi1>
    %237 = vector.broadcast %236 : vector<1x1x16xi1> to vector<2x24x16xi1>
    %238 = vector.shape_cast %221 : vector<2x24x1xf32> to vector<2x24x1xf32>
    %239 = vector.broadcast %238 : vector<2x24x1xf32> to vector<2x24x16xf32>
    %240 = arith.select %237, %239, %235 : vector<2x24x16xi1>, vector<2x24x16xf32>
    %c4_i32 = arith.constant 4 : i32
    %241 = vector.broadcast %c4_i32 : i32 to vector<1x1x16xi32>
    %242 = arith.cmpi eq, %84, %241 : vector<1x1x16xi32>
    %243 = vector.broadcast %c4_i32 : i32 to vector<1x24x1xi32>
    %244 = arith.cmpi eq, %83, %243 : vector<1x24x1xi32>
    %cst_66 = arith.constant 0.000000e+00 : f32
    %245 = vector.shape_cast %242 : vector<1x1x16xi1> to vector<1x1x16xi1>
    %246 = vector.broadcast %245 : vector<1x1x16xi1> to vector<2x24x16xi1>
    %247 = vector.broadcast %cst_66 : f32 to vector<2x24x16xf32>
    %248 = arith.select %246, %240, %247 : vector<2x24x16xi1>, vector<2x24x16xf32>
    %cst_67 = arith.constant dense<0.000000e+00> : vector<2x24xf32>
    %249 = vector.multi_reduction <add>, %248, %cst_67 [2] : vector<2x24x16xf32> to vector<2x24xf32>
    %250 = vector.shape_cast %249 : vector<2x24xf32> to vector<2x24x1xf32>
    %cst_68 = arith.constant 0.000000e+00 : f32
    %251 = vector.shape_cast %244 : vector<1x24x1xi1> to vector<1x24x1xi1>
    %252 = vector.broadcast %251 : vector<1x24x1xi1> to vector<2x24x1xi1>
    %253 = vector.broadcast %cst_68 : f32 to vector<2x24x1xf32>
    %254 = arith.select %252, %250, %253 : vector<2x24x1xi1>, vector<2x24x1xf32>
    %cst_69 = arith.constant dense<0.000000e+00> : vector<2x1xf32>
    %255 = vector.multi_reduction <add>, %254, %cst_69 [1] : vector<2x24x1xf32> to vector<2x1xf32>
    %256 = vector.shape_cast %255 : vector<2x1xf32> to vector<2x1x1xf32>
    %cst_70 = arith.constant 1.000000e+00 : f32
    %257 = vector.broadcast %cst_70 : f32 to vector<2x1x1xf32>
    %258 = arith.divf %257, %256 : vector<2x1x1xf32>
    %259 = vector.broadcast %258 : vector<2x1x1xf32> to vector<2x24x1xf32>
    %260 = arith.mulf %250, %259 : vector<2x24x1xf32>
    %cst_71 = arith.constant 0.000000e+00 : f32
    %261 = vector.shape_cast %244 : vector<1x24x1xi1> to vector<1x24x1xi1>
    %262 = vector.broadcast %261 : vector<1x24x1xi1> to vector<2x24x16xi1>
    %263 = vector.broadcast %cst_71 : f32 to vector<2x24x16xf32>
    %264 = arith.select %262, %240, %263 : vector<2x24x16xi1>, vector<2x24x16xf32>
    %cst_72 = arith.constant dense<0.000000e+00> : vector<2x16xf32>
    %265 = vector.multi_reduction <add>, %264, %cst_72 [1] : vector<2x24x16xf32> to vector<2x16xf32>
    %266 = vector.shape_cast %265 : vector<2x16xf32> to vector<2x1x16xf32>
    %cst_73 = arith.constant 0.000000e+00 : f32
    %267 = vector.shape_cast %242 : vector<1x1x16xi1> to vector<1x1x16xi1>
    %268 = vector.broadcast %267 : vector<1x1x16xi1> to vector<2x1x16xi1>
    %269 = vector.broadcast %cst_73 : f32 to vector<2x1x16xf32>
    %270 = arith.select %268, %269, %266 : vector<2x1x16xi1>, vector<2x1x16xf32>
    %271 = vector.broadcast %260 : vector<2x24x1xf32> to vector<2x24x16xf32>
    %272 = vector.broadcast %270 : vector<2x1x16xf32> to vector<2x24x16xf32>
    %273 = arith.mulf %271, %272 : vector<2x24x16xf32>
    %274 = arith.subf %240, %273 : vector<2x24x16xf32>
    %275 = vector.shape_cast %242 : vector<1x1x16xi1> to vector<1x1x16xi1>
    %276 = vector.broadcast %275 : vector<1x1x16xi1> to vector<2x24x16xi1>
    %277 = vector.shape_cast %260 : vector<2x24x1xf32> to vector<2x24x1xf32>
    %278 = vector.broadcast %277 : vector<2x24x1xf32> to vector<2x24x16xf32>
    %279 = arith.select %276, %278, %274 : vector<2x24x16xi1>, vector<2x24x16xf32>
    %c5_i32 = arith.constant 5 : i32
    %280 = vector.broadcast %c5_i32 : i32 to vector<1x1x16xi32>
    %281 = arith.cmpi eq, %84, %280 : vector<1x1x16xi32>
    %282 = vector.broadcast %c5_i32 : i32 to vector<1x24x1xi32>
    %283 = arith.cmpi eq, %83, %282 : vector<1x24x1xi32>
    %cst_74 = arith.constant 0.000000e+00 : f32
    %284 = vector.shape_cast %281 : vector<1x1x16xi1> to vector<1x1x16xi1>
    %285 = vector.broadcast %284 : vector<1x1x16xi1> to vector<2x24x16xi1>
    %286 = vector.broadcast %cst_74 : f32 to vector<2x24x16xf32>
    %287 = arith.select %285, %279, %286 : vector<2x24x16xi1>, vector<2x24x16xf32>
    %cst_75 = arith.constant dense<0.000000e+00> : vector<2x24xf32>
    %288 = vector.multi_reduction <add>, %287, %cst_75 [2] : vector<2x24x16xf32> to vector<2x24xf32>
    %289 = vector.shape_cast %288 : vector<2x24xf32> to vector<2x24x1xf32>
    %cst_76 = arith.constant 0.000000e+00 : f32
    %290 = vector.shape_cast %283 : vector<1x24x1xi1> to vector<1x24x1xi1>
    %291 = vector.broadcast %290 : vector<1x24x1xi1> to vector<2x24x1xi1>
    %292 = vector.broadcast %cst_76 : f32 to vector<2x24x1xf32>
    %293 = arith.select %291, %289, %292 : vector<2x24x1xi1>, vector<2x24x1xf32>
    %cst_77 = arith.constant dense<0.000000e+00> : vector<2x1xf32>
    %294 = vector.multi_reduction <add>, %293, %cst_77 [1] : vector<2x24x1xf32> to vector<2x1xf32>
    %295 = vector.shape_cast %294 : vector<2x1xf32> to vector<2x1x1xf32>
    %cst_78 = arith.constant 1.000000e+00 : f32
    %296 = vector.broadcast %cst_78 : f32 to vector<2x1x1xf32>
    %297 = arith.divf %296, %295 : vector<2x1x1xf32>
    %298 = vector.broadcast %297 : vector<2x1x1xf32> to vector<2x24x1xf32>
    %299 = arith.mulf %289, %298 : vector<2x24x1xf32>
    %cst_79 = arith.constant 0.000000e+00 : f32
    %300 = vector.shape_cast %283 : vector<1x24x1xi1> to vector<1x24x1xi1>
    %301 = vector.broadcast %300 : vector<1x24x1xi1> to vector<2x24x16xi1>
    %302 = vector.broadcast %cst_79 : f32 to vector<2x24x16xf32>
    %303 = arith.select %301, %279, %302 : vector<2x24x16xi1>, vector<2x24x16xf32>
    %cst_80 = arith.constant dense<0.000000e+00> : vector<2x16xf32>
    %304 = vector.multi_reduction <add>, %303, %cst_80 [1] : vector<2x24x16xf32> to vector<2x16xf32>
    %305 = vector.shape_cast %304 : vector<2x16xf32> to vector<2x1x16xf32>
    %cst_81 = arith.constant 0.000000e+00 : f32
    %306 = vector.shape_cast %281 : vector<1x1x16xi1> to vector<1x1x16xi1>
    %307 = vector.broadcast %306 : vector<1x1x16xi1> to vector<2x1x16xi1>
    %308 = vector.broadcast %cst_81 : f32 to vector<2x1x16xf32>
    %309 = arith.select %307, %308, %305 : vector<2x1x16xi1>, vector<2x1x16xf32>
    %310 = vector.broadcast %299 : vector<2x24x1xf32> to vector<2x24x16xf32>
    %311 = vector.broadcast %309 : vector<2x1x16xf32> to vector<2x24x16xf32>
    %312 = arith.mulf %310, %311 : vector<2x24x16xf32>
    %313 = arith.subf %279, %312 : vector<2x24x16xf32>
    %314 = vector.shape_cast %281 : vector<1x1x16xi1> to vector<1x1x16xi1>
    %315 = vector.broadcast %314 : vector<1x1x16xi1> to vector<2x24x16xi1>
    %316 = vector.shape_cast %299 : vector<2x24x1xf32> to vector<2x24x1xf32>
    %317 = vector.broadcast %316 : vector<2x24x1xf32> to vector<2x24x16xf32>
    %318 = arith.select %315, %317, %313 : vector<2x24x16xi1>, vector<2x24x16xf32>
    %c6_i32 = arith.constant 6 : i32
    %319 = vector.broadcast %c6_i32 : i32 to vector<1x1x16xi32>
    %320 = arith.cmpi eq, %84, %319 : vector<1x1x16xi32>
    %321 = vector.broadcast %c6_i32 : i32 to vector<1x24x1xi32>
    %322 = arith.cmpi eq, %83, %321 : vector<1x24x1xi32>
    %cst_82 = arith.constant 0.000000e+00 : f32
    %323 = vector.shape_cast %320 : vector<1x1x16xi1> to vector<1x1x16xi1>
    %324 = vector.broadcast %323 : vector<1x1x16xi1> to vector<2x24x16xi1>
    %325 = vector.broadcast %cst_82 : f32 to vector<2x24x16xf32>
    %326 = arith.select %324, %318, %325 : vector<2x24x16xi1>, vector<2x24x16xf32>
    %cst_83 = arith.constant dense<0.000000e+00> : vector<2x24xf32>
    %327 = vector.multi_reduction <add>, %326, %cst_83 [2] : vector<2x24x16xf32> to vector<2x24xf32>
    %328 = vector.shape_cast %327 : vector<2x24xf32> to vector<2x24x1xf32>
    %cst_84 = arith.constant 0.000000e+00 : f32
    %329 = vector.shape_cast %322 : vector<1x24x1xi1> to vector<1x24x1xi1>
    %330 = vector.broadcast %329 : vector<1x24x1xi1> to vector<2x24x1xi1>
    %331 = vector.broadcast %cst_84 : f32 to vector<2x24x1xf32>
    %332 = arith.select %330, %328, %331 : vector<2x24x1xi1>, vector<2x24x1xf32>
    %cst_85 = arith.constant dense<0.000000e+00> : vector<2x1xf32>
    %333 = vector.multi_reduction <add>, %332, %cst_85 [1] : vector<2x24x1xf32> to vector<2x1xf32>
    %334 = vector.shape_cast %333 : vector<2x1xf32> to vector<2x1x1xf32>
    %cst_86 = arith.constant 1.000000e+00 : f32
    %335 = vector.broadcast %cst_86 : f32 to vector<2x1x1xf32>
    %336 = arith.divf %335, %334 : vector<2x1x1xf32>
    %337 = vector.broadcast %336 : vector<2x1x1xf32> to vector<2x24x1xf32>
    %338 = arith.mulf %328, %337 : vector<2x24x1xf32>
    %cst_87 = arith.constant 0.000000e+00 : f32
    %339 = vector.shape_cast %322 : vector<1x24x1xi1> to vector<1x24x1xi1>
    %340 = vector.broadcast %339 : vector<1x24x1xi1> to vector<2x24x16xi1>
    %341 = vector.broadcast %cst_87 : f32 to vector<2x24x16xf32>
    %342 = arith.select %340, %318, %341 : vector<2x24x16xi1>, vector<2x24x16xf32>
    %cst_88 = arith.constant dense<0.000000e+00> : vector<2x16xf32>
    %343 = vector.multi_reduction <add>, %342, %cst_88 [1] : vector<2x24x16xf32> to vector<2x16xf32>
    %344 = vector.shape_cast %343 : vector<2x16xf32> to vector<2x1x16xf32>
    %cst_89 = arith.constant 0.000000e+00 : f32
    %345 = vector.shape_cast %320 : vector<1x1x16xi1> to vector<1x1x16xi1>
    %346 = vector.broadcast %345 : vector<1x1x16xi1> to vector<2x1x16xi1>
    %347 = vector.broadcast %cst_89 : f32 to vector<2x1x16xf32>
    %348 = arith.select %346, %347, %344 : vector<2x1x16xi1>, vector<2x1x16xf32>
    %349 = vector.broadcast %338 : vector<2x24x1xf32> to vector<2x24x16xf32>
    %350 = vector.broadcast %348 : vector<2x1x16xf32> to vector<2x24x16xf32>
    %351 = arith.mulf %349, %350 : vector<2x24x16xf32>
    %352 = arith.subf %318, %351 : vector<2x24x16xf32>
    %353 = vector.shape_cast %320 : vector<1x1x16xi1> to vector<1x1x16xi1>
    %354 = vector.broadcast %353 : vector<1x1x16xi1> to vector<2x24x16xi1>
    %355 = vector.shape_cast %338 : vector<2x24x1xf32> to vector<2x24x1xf32>
    %356 = vector.broadcast %355 : vector<2x24x1xf32> to vector<2x24x16xf32>
    %357 = arith.select %354, %356, %352 : vector<2x24x16xi1>, vector<2x24x16xf32>
    %c7_i32 = arith.constant 7 : i32
    %358 = vector.broadcast %c7_i32 : i32 to vector<1x1x16xi32>
    %359 = arith.cmpi eq, %84, %358 : vector<1x1x16xi32>
    %360 = vector.broadcast %c7_i32 : i32 to vector<1x24x1xi32>
    %361 = arith.cmpi eq, %83, %360 : vector<1x24x1xi32>
    %cst_90 = arith.constant 0.000000e+00 : f32
    %362 = vector.shape_cast %359 : vector<1x1x16xi1> to vector<1x1x16xi1>
    %363 = vector.broadcast %362 : vector<1x1x16xi1> to vector<2x24x16xi1>
    %364 = vector.broadcast %cst_90 : f32 to vector<2x24x16xf32>
    %365 = arith.select %363, %357, %364 : vector<2x24x16xi1>, vector<2x24x16xf32>
    %cst_91 = arith.constant dense<0.000000e+00> : vector<2x24xf32>
    %366 = vector.multi_reduction <add>, %365, %cst_91 [2] : vector<2x24x16xf32> to vector<2x24xf32>
    %367 = vector.shape_cast %366 : vector<2x24xf32> to vector<2x24x1xf32>
    %cst_92 = arith.constant 0.000000e+00 : f32
    %368 = vector.shape_cast %361 : vector<1x24x1xi1> to vector<1x24x1xi1>
    %369 = vector.broadcast %368 : vector<1x24x1xi1> to vector<2x24x1xi1>
    %370 = vector.broadcast %cst_92 : f32 to vector<2x24x1xf32>
    %371 = arith.select %369, %367, %370 : vector<2x24x1xi1>, vector<2x24x1xf32>
    %cst_93 = arith.constant dense<0.000000e+00> : vector<2x1xf32>
    %372 = vector.multi_reduction <add>, %371, %cst_93 [1] : vector<2x24x1xf32> to vector<2x1xf32>
    %373 = vector.shape_cast %372 : vector<2x1xf32> to vector<2x1x1xf32>
    %cst_94 = arith.constant 1.000000e+00 : f32
    %374 = vector.broadcast %cst_94 : f32 to vector<2x1x1xf32>
    %375 = arith.divf %374, %373 : vector<2x1x1xf32>
    %376 = vector.broadcast %375 : vector<2x1x1xf32> to vector<2x24x1xf32>
    %377 = arith.mulf %367, %376 : vector<2x24x1xf32>
    %cst_95 = arith.constant 0.000000e+00 : f32
    %378 = vector.shape_cast %361 : vector<1x24x1xi1> to vector<1x24x1xi1>
    %379 = vector.broadcast %378 : vector<1x24x1xi1> to vector<2x24x16xi1>
    %380 = vector.broadcast %cst_95 : f32 to vector<2x24x16xf32>
    %381 = arith.select %379, %357, %380 : vector<2x24x16xi1>, vector<2x24x16xf32>
    %cst_96 = arith.constant dense<0.000000e+00> : vector<2x16xf32>
    %382 = vector.multi_reduction <add>, %381, %cst_96 [1] : vector<2x24x16xf32> to vector<2x16xf32>
    %383 = vector.shape_cast %382 : vector<2x16xf32> to vector<2x1x16xf32>
    %cst_97 = arith.constant 0.000000e+00 : f32
    %384 = vector.shape_cast %359 : vector<1x1x16xi1> to vector<1x1x16xi1>
    %385 = vector.broadcast %384 : vector<1x1x16xi1> to vector<2x1x16xi1>
    %386 = vector.broadcast %cst_97 : f32 to vector<2x1x16xf32>
    %387 = arith.select %385, %386, %383 : vector<2x1x16xi1>, vector<2x1x16xf32>
    %388 = vector.broadcast %377 : vector<2x24x1xf32> to vector<2x24x16xf32>
    %389 = vector.broadcast %387 : vector<2x1x16xf32> to vector<2x24x16xf32>
    %390 = arith.mulf %388, %389 : vector<2x24x16xf32>
    %391 = arith.subf %357, %390 : vector<2x24x16xf32>
    %392 = vector.shape_cast %359 : vector<1x1x16xi1> to vector<1x1x16xi1>
    %393 = vector.broadcast %392 : vector<1x1x16xi1> to vector<2x24x16xi1>
    %394 = vector.shape_cast %377 : vector<2x24x1xf32> to vector<2x24x1xf32>
    %395 = vector.broadcast %394 : vector<2x24x1xf32> to vector<2x24x16xf32>
    %396 = arith.select %393, %395, %391 : vector<2x24x16xi1>, vector<2x24x16xf32>
    %c8_i32 = arith.constant 8 : i32
    %397 = vector.broadcast %c8_i32 : i32 to vector<1x1x16xi32>
    %398 = arith.cmpi eq, %84, %397 : vector<1x1x16xi32>
    %399 = vector.broadcast %c8_i32 : i32 to vector<1x24x1xi32>
    %400 = arith.cmpi eq, %83, %399 : vector<1x24x1xi32>
    %cst_98 = arith.constant 0.000000e+00 : f32
    %401 = vector.shape_cast %398 : vector<1x1x16xi1> to vector<1x1x16xi1>
    %402 = vector.broadcast %401 : vector<1x1x16xi1> to vector<2x24x16xi1>
    %403 = vector.broadcast %cst_98 : f32 to vector<2x24x16xf32>
    %404 = arith.select %402, %396, %403 : vector<2x24x16xi1>, vector<2x24x16xf32>
    %cst_99 = arith.constant dense<0.000000e+00> : vector<2x24xf32>
    %405 = vector.multi_reduction <add>, %404, %cst_99 [2] : vector<2x24x16xf32> to vector<2x24xf32>
    %406 = vector.shape_cast %405 : vector<2x24xf32> to vector<2x24x1xf32>
    %cst_100 = arith.constant 0.000000e+00 : f32
    %407 = vector.shape_cast %400 : vector<1x24x1xi1> to vector<1x24x1xi1>
    %408 = vector.broadcast %407 : vector<1x24x1xi1> to vector<2x24x1xi1>
    %409 = vector.broadcast %cst_100 : f32 to vector<2x24x1xf32>
    %410 = arith.select %408, %406, %409 : vector<2x24x1xi1>, vector<2x24x1xf32>
    %cst_101 = arith.constant dense<0.000000e+00> : vector<2x1xf32>
    %411 = vector.multi_reduction <add>, %410, %cst_101 [1] : vector<2x24x1xf32> to vector<2x1xf32>
    %412 = vector.shape_cast %411 : vector<2x1xf32> to vector<2x1x1xf32>
    %cst_102 = arith.constant 1.000000e+00 : f32
    %413 = vector.broadcast %cst_102 : f32 to vector<2x1x1xf32>
    %414 = arith.divf %413, %412 : vector<2x1x1xf32>
    %415 = vector.broadcast %414 : vector<2x1x1xf32> to vector<2x24x1xf32>
    %416 = arith.mulf %406, %415 : vector<2x24x1xf32>
    %cst_103 = arith.constant 0.000000e+00 : f32
    %417 = vector.shape_cast %400 : vector<1x24x1xi1> to vector<1x24x1xi1>
    %418 = vector.broadcast %417 : vector<1x24x1xi1> to vector<2x24x16xi1>
    %419 = vector.broadcast %cst_103 : f32 to vector<2x24x16xf32>
    %420 = arith.select %418, %396, %419 : vector<2x24x16xi1>, vector<2x24x16xf32>
    %cst_104 = arith.constant dense<0.000000e+00> : vector<2x16xf32>
    %421 = vector.multi_reduction <add>, %420, %cst_104 [1] : vector<2x24x16xf32> to vector<2x16xf32>
    %422 = vector.shape_cast %421 : vector<2x16xf32> to vector<2x1x16xf32>
    %cst_105 = arith.constant 0.000000e+00 : f32
    %423 = vector.shape_cast %398 : vector<1x1x16xi1> to vector<1x1x16xi1>
    %424 = vector.broadcast %423 : vector<1x1x16xi1> to vector<2x1x16xi1>
    %425 = vector.broadcast %cst_105 : f32 to vector<2x1x16xf32>
    %426 = arith.select %424, %425, %422 : vector<2x1x16xi1>, vector<2x1x16xf32>
    %427 = vector.broadcast %416 : vector<2x24x1xf32> to vector<2x24x16xf32>
    %428 = vector.broadcast %426 : vector<2x1x16xf32> to vector<2x24x16xf32>
    %429 = arith.mulf %427, %428 : vector<2x24x16xf32>
    %430 = arith.subf %396, %429 : vector<2x24x16xf32>
    %431 = vector.shape_cast %398 : vector<1x1x16xi1> to vector<1x1x16xi1>
    %432 = vector.broadcast %431 : vector<1x1x16xi1> to vector<2x24x16xi1>
    %433 = vector.shape_cast %416 : vector<2x24x1xf32> to vector<2x24x1xf32>
    %434 = vector.broadcast %433 : vector<2x24x1xf32> to vector<2x24x16xf32>
    %435 = arith.select %432, %434, %430 : vector<2x24x16xi1>, vector<2x24x16xf32>
    %c9_i32 = arith.constant 9 : i32
    %436 = vector.broadcast %c9_i32 : i32 to vector<1x1x16xi32>
    %437 = arith.cmpi eq, %84, %436 : vector<1x1x16xi32>
    %438 = vector.broadcast %c9_i32 : i32 to vector<1x24x1xi32>
    %439 = arith.cmpi eq, %83, %438 : vector<1x24x1xi32>
    %cst_106 = arith.constant 0.000000e+00 : f32
    %440 = vector.shape_cast %437 : vector<1x1x16xi1> to vector<1x1x16xi1>
    %441 = vector.broadcast %440 : vector<1x1x16xi1> to vector<2x24x16xi1>
    %442 = vector.broadcast %cst_106 : f32 to vector<2x24x16xf32>
    %443 = arith.select %441, %435, %442 : vector<2x24x16xi1>, vector<2x24x16xf32>
    %cst_107 = arith.constant dense<0.000000e+00> : vector<2x24xf32>
    %444 = vector.multi_reduction <add>, %443, %cst_107 [2] : vector<2x24x16xf32> to vector<2x24xf32>
    %445 = vector.shape_cast %444 : vector<2x24xf32> to vector<2x24x1xf32>
    %cst_108 = arith.constant 0.000000e+00 : f32
    %446 = vector.shape_cast %439 : vector<1x24x1xi1> to vector<1x24x1xi1>
    %447 = vector.broadcast %446 : vector<1x24x1xi1> to vector<2x24x1xi1>
    %448 = vector.broadcast %cst_108 : f32 to vector<2x24x1xf32>
    %449 = arith.select %447, %445, %448 : vector<2x24x1xi1>, vector<2x24x1xf32>
    %cst_109 = arith.constant dense<0.000000e+00> : vector<2x1xf32>
    %450 = vector.multi_reduction <add>, %449, %cst_109 [1] : vector<2x24x1xf32> to vector<2x1xf32>
    %451 = vector.shape_cast %450 : vector<2x1xf32> to vector<2x1x1xf32>
    %cst_110 = arith.constant 1.000000e+00 : f32
    %452 = vector.broadcast %cst_110 : f32 to vector<2x1x1xf32>
    %453 = arith.divf %452, %451 : vector<2x1x1xf32>
    %454 = vector.broadcast %453 : vector<2x1x1xf32> to vector<2x24x1xf32>
    %455 = arith.mulf %445, %454 : vector<2x24x1xf32>
    %cst_111 = arith.constant 0.000000e+00 : f32
    %456 = vector.shape_cast %439 : vector<1x24x1xi1> to vector<1x24x1xi1>
    %457 = vector.broadcast %456 : vector<1x24x1xi1> to vector<2x24x16xi1>
    %458 = vector.broadcast %cst_111 : f32 to vector<2x24x16xf32>
    %459 = arith.select %457, %435, %458 : vector<2x24x16xi1>, vector<2x24x16xf32>
    %cst_112 = arith.constant dense<0.000000e+00> : vector<2x16xf32>
    %460 = vector.multi_reduction <add>, %459, %cst_112 [1] : vector<2x24x16xf32> to vector<2x16xf32>
    %461 = vector.shape_cast %460 : vector<2x16xf32> to vector<2x1x16xf32>
    %cst_113 = arith.constant 0.000000e+00 : f32
    %462 = vector.shape_cast %437 : vector<1x1x16xi1> to vector<1x1x16xi1>
    %463 = vector.broadcast %462 : vector<1x1x16xi1> to vector<2x1x16xi1>
    %464 = vector.broadcast %cst_113 : f32 to vector<2x1x16xf32>
    %465 = arith.select %463, %464, %461 : vector<2x1x16xi1>, vector<2x1x16xf32>
    %466 = vector.broadcast %455 : vector<2x24x1xf32> to vector<2x24x16xf32>
    %467 = vector.broadcast %465 : vector<2x1x16xf32> to vector<2x24x16xf32>
    %468 = arith.mulf %466, %467 : vector<2x24x16xf32>
    %469 = arith.subf %435, %468 : vector<2x24x16xf32>
    %470 = vector.shape_cast %437 : vector<1x1x16xi1> to vector<1x1x16xi1>
    %471 = vector.broadcast %470 : vector<1x1x16xi1> to vector<2x24x16xi1>
    %472 = vector.shape_cast %455 : vector<2x24x1xf32> to vector<2x24x1xf32>
    %473 = vector.broadcast %472 : vector<2x24x1xf32> to vector<2x24x16xf32>
    %474 = arith.select %471, %473, %469 : vector<2x24x16xi1>, vector<2x24x16xf32>
    %c10_i32 = arith.constant 10 : i32
    %475 = vector.broadcast %c10_i32 : i32 to vector<1x1x16xi32>
    %476 = arith.cmpi eq, %84, %475 : vector<1x1x16xi32>
    %477 = vector.broadcast %c10_i32 : i32 to vector<1x24x1xi32>
    %478 = arith.cmpi eq, %83, %477 : vector<1x24x1xi32>
    %cst_114 = arith.constant 0.000000e+00 : f32
    %479 = vector.shape_cast %476 : vector<1x1x16xi1> to vector<1x1x16xi1>
    %480 = vector.broadcast %479 : vector<1x1x16xi1> to vector<2x24x16xi1>
    %481 = vector.broadcast %cst_114 : f32 to vector<2x24x16xf32>
    %482 = arith.select %480, %474, %481 : vector<2x24x16xi1>, vector<2x24x16xf32>
    %cst_115 = arith.constant dense<0.000000e+00> : vector<2x24xf32>
    %483 = vector.multi_reduction <add>, %482, %cst_115 [2] : vector<2x24x16xf32> to vector<2x24xf32>
    %484 = vector.shape_cast %483 : vector<2x24xf32> to vector<2x24x1xf32>
    %cst_116 = arith.constant 0.000000e+00 : f32
    %485 = vector.shape_cast %478 : vector<1x24x1xi1> to vector<1x24x1xi1>
    %486 = vector.broadcast %485 : vector<1x24x1xi1> to vector<2x24x1xi1>
    %487 = vector.broadcast %cst_116 : f32 to vector<2x24x1xf32>
    %488 = arith.select %486, %484, %487 : vector<2x24x1xi1>, vector<2x24x1xf32>
    %cst_117 = arith.constant dense<0.000000e+00> : vector<2x1xf32>
    %489 = vector.multi_reduction <add>, %488, %cst_117 [1] : vector<2x24x1xf32> to vector<2x1xf32>
    %490 = vector.shape_cast %489 : vector<2x1xf32> to vector<2x1x1xf32>
    %cst_118 = arith.constant 1.000000e+00 : f32
    %491 = vector.broadcast %cst_118 : f32 to vector<2x1x1xf32>
    %492 = arith.divf %491, %490 : vector<2x1x1xf32>
    %493 = vector.broadcast %492 : vector<2x1x1xf32> to vector<2x24x1xf32>
    %494 = arith.mulf %484, %493 : vector<2x24x1xf32>
    %cst_119 = arith.constant 0.000000e+00 : f32
    %495 = vector.shape_cast %478 : vector<1x24x1xi1> to vector<1x24x1xi1>
    %496 = vector.broadcast %495 : vector<1x24x1xi1> to vector<2x24x16xi1>
    %497 = vector.broadcast %cst_119 : f32 to vector<2x24x16xf32>
    %498 = arith.select %496, %474, %497 : vector<2x24x16xi1>, vector<2x24x16xf32>
    %cst_120 = arith.constant dense<0.000000e+00> : vector<2x16xf32>
    %499 = vector.multi_reduction <add>, %498, %cst_120 [1] : vector<2x24x16xf32> to vector<2x16xf32>
    %500 = vector.shape_cast %499 : vector<2x16xf32> to vector<2x1x16xf32>
    %cst_121 = arith.constant 0.000000e+00 : f32
    %501 = vector.shape_cast %476 : vector<1x1x16xi1> to vector<1x1x16xi1>
    %502 = vector.broadcast %501 : vector<1x1x16xi1> to vector<2x1x16xi1>
    %503 = vector.broadcast %cst_121 : f32 to vector<2x1x16xf32>
    %504 = arith.select %502, %503, %500 : vector<2x1x16xi1>, vector<2x1x16xf32>
    %505 = vector.broadcast %494 : vector<2x24x1xf32> to vector<2x24x16xf32>
    %506 = vector.broadcast %504 : vector<2x1x16xf32> to vector<2x24x16xf32>
    %507 = arith.mulf %505, %506 : vector<2x24x16xf32>
    %508 = arith.subf %474, %507 : vector<2x24x16xf32>
    %509 = vector.shape_cast %476 : vector<1x1x16xi1> to vector<1x1x16xi1>
    %510 = vector.broadcast %509 : vector<1x1x16xi1> to vector<2x24x16xi1>
    %511 = vector.shape_cast %494 : vector<2x24x1xf32> to vector<2x24x1xf32>
    %512 = vector.broadcast %511 : vector<2x24x1xf32> to vector<2x24x16xf32>
    %513 = arith.select %510, %512, %508 : vector<2x24x16xi1>, vector<2x24x16xf32>
    %c11_i32 = arith.constant 11 : i32
    %514 = vector.broadcast %c11_i32 : i32 to vector<1x1x16xi32>
    %515 = arith.cmpi eq, %84, %514 : vector<1x1x16xi32>
    %516 = vector.broadcast %c11_i32 : i32 to vector<1x24x1xi32>
    %517 = arith.cmpi eq, %83, %516 : vector<1x24x1xi32>
    %cst_122 = arith.constant 0.000000e+00 : f32
    %518 = vector.shape_cast %515 : vector<1x1x16xi1> to vector<1x1x16xi1>
    %519 = vector.broadcast %518 : vector<1x1x16xi1> to vector<2x24x16xi1>
    %520 = vector.broadcast %cst_122 : f32 to vector<2x24x16xf32>
    %521 = arith.select %519, %513, %520 : vector<2x24x16xi1>, vector<2x24x16xf32>
    %cst_123 = arith.constant dense<0.000000e+00> : vector<2x24xf32>
    %522 = vector.multi_reduction <add>, %521, %cst_123 [2] : vector<2x24x16xf32> to vector<2x24xf32>
    %523 = vector.shape_cast %522 : vector<2x24xf32> to vector<2x24x1xf32>
    %cst_124 = arith.constant 0.000000e+00 : f32
    %524 = vector.shape_cast %517 : vector<1x24x1xi1> to vector<1x24x1xi1>
    %525 = vector.broadcast %524 : vector<1x24x1xi1> to vector<2x24x1xi1>
    %526 = vector.broadcast %cst_124 : f32 to vector<2x24x1xf32>
    %527 = arith.select %525, %523, %526 : vector<2x24x1xi1>, vector<2x24x1xf32>
    %cst_125 = arith.constant dense<0.000000e+00> : vector<2x1xf32>
    %528 = vector.multi_reduction <add>, %527, %cst_125 [1] : vector<2x24x1xf32> to vector<2x1xf32>
    %529 = vector.shape_cast %528 : vector<2x1xf32> to vector<2x1x1xf32>
    %cst_126 = arith.constant 1.000000e+00 : f32
    %530 = vector.broadcast %cst_126 : f32 to vector<2x1x1xf32>
    %531 = arith.divf %530, %529 : vector<2x1x1xf32>
    %532 = vector.broadcast %531 : vector<2x1x1xf32> to vector<2x24x1xf32>
    %533 = arith.mulf %523, %532 : vector<2x24x1xf32>
    %cst_127 = arith.constant 0.000000e+00 : f32
    %534 = vector.shape_cast %517 : vector<1x24x1xi1> to vector<1x24x1xi1>
    %535 = vector.broadcast %534 : vector<1x24x1xi1> to vector<2x24x16xi1>
    %536 = vector.broadcast %cst_127 : f32 to vector<2x24x16xf32>
    %537 = arith.select %535, %513, %536 : vector<2x24x16xi1>, vector<2x24x16xf32>
    %cst_128 = arith.constant dense<0.000000e+00> : vector<2x16xf32>
    %538 = vector.multi_reduction <add>, %537, %cst_128 [1] : vector<2x24x16xf32> to vector<2x16xf32>
    %539 = vector.shape_cast %538 : vector<2x16xf32> to vector<2x1x16xf32>
    %cst_129 = arith.constant 0.000000e+00 : f32
    %540 = vector.shape_cast %515 : vector<1x1x16xi1> to vector<1x1x16xi1>
    %541 = vector.broadcast %540 : vector<1x1x16xi1> to vector<2x1x16xi1>
    %542 = vector.broadcast %cst_129 : f32 to vector<2x1x16xf32>
    %543 = arith.select %541, %542, %539 : vector<2x1x16xi1>, vector<2x1x16xf32>
    %544 = vector.broadcast %533 : vector<2x24x1xf32> to vector<2x24x16xf32>
    %545 = vector.broadcast %543 : vector<2x1x16xf32> to vector<2x24x16xf32>
    %546 = arith.mulf %544, %545 : vector<2x24x16xf32>
    %547 = arith.subf %513, %546 : vector<2x24x16xf32>
    %548 = vector.shape_cast %515 : vector<1x1x16xi1> to vector<1x1x16xi1>
    %549 = vector.broadcast %548 : vector<1x1x16xi1> to vector<2x24x16xi1>
    %550 = vector.shape_cast %533 : vector<2x24x1xf32> to vector<2x24x1xf32>
    %551 = vector.broadcast %550 : vector<2x24x1xf32> to vector<2x24x16xf32>
    %552 = arith.select %549, %551, %547 : vector<2x24x16xi1>, vector<2x24x16xf32>
    %c12_i32 = arith.constant 12 : i32
    %553 = vector.broadcast %c12_i32 : i32 to vector<1x1x16xi32>
    %554 = arith.cmpi eq, %84, %553 : vector<1x1x16xi32>
    %555 = vector.broadcast %c12_i32 : i32 to vector<1x24x1xi32>
    %556 = arith.cmpi eq, %83, %555 : vector<1x24x1xi32>
    %cst_130 = arith.constant 0.000000e+00 : f32
    %557 = vector.shape_cast %554 : vector<1x1x16xi1> to vector<1x1x16xi1>
    %558 = vector.broadcast %557 : vector<1x1x16xi1> to vector<2x24x16xi1>
    %559 = vector.broadcast %cst_130 : f32 to vector<2x24x16xf32>
    %560 = arith.select %558, %552, %559 : vector<2x24x16xi1>, vector<2x24x16xf32>
    %cst_131 = arith.constant dense<0.000000e+00> : vector<2x24xf32>
    %561 = vector.multi_reduction <add>, %560, %cst_131 [2] : vector<2x24x16xf32> to vector<2x24xf32>
    %562 = vector.shape_cast %561 : vector<2x24xf32> to vector<2x24x1xf32>
    %cst_132 = arith.constant 0.000000e+00 : f32
    %563 = vector.shape_cast %556 : vector<1x24x1xi1> to vector<1x24x1xi1>
    %564 = vector.broadcast %563 : vector<1x24x1xi1> to vector<2x24x1xi1>
    %565 = vector.broadcast %cst_132 : f32 to vector<2x24x1xf32>
    %566 = arith.select %564, %562, %565 : vector<2x24x1xi1>, vector<2x24x1xf32>
    %cst_133 = arith.constant dense<0.000000e+00> : vector<2x1xf32>
    %567 = vector.multi_reduction <add>, %566, %cst_133 [1] : vector<2x24x1xf32> to vector<2x1xf32>
    %568 = vector.shape_cast %567 : vector<2x1xf32> to vector<2x1x1xf32>
    %cst_134 = arith.constant 1.000000e+00 : f32
    %569 = vector.broadcast %cst_134 : f32 to vector<2x1x1xf32>
    %570 = arith.divf %569, %568 : vector<2x1x1xf32>
    %571 = vector.broadcast %570 : vector<2x1x1xf32> to vector<2x24x1xf32>
    %572 = arith.mulf %562, %571 : vector<2x24x1xf32>
    %cst_135 = arith.constant 0.000000e+00 : f32
    %573 = vector.shape_cast %556 : vector<1x24x1xi1> to vector<1x24x1xi1>
    %574 = vector.broadcast %573 : vector<1x24x1xi1> to vector<2x24x16xi1>
    %575 = vector.broadcast %cst_135 : f32 to vector<2x24x16xf32>
    %576 = arith.select %574, %552, %575 : vector<2x24x16xi1>, vector<2x24x16xf32>
    %cst_136 = arith.constant dense<0.000000e+00> : vector<2x16xf32>
    %577 = vector.multi_reduction <add>, %576, %cst_136 [1] : vector<2x24x16xf32> to vector<2x16xf32>
    %578 = vector.shape_cast %577 : vector<2x16xf32> to vector<2x1x16xf32>
    %cst_137 = arith.constant 0.000000e+00 : f32
    %579 = vector.shape_cast %554 : vector<1x1x16xi1> to vector<1x1x16xi1>
    %580 = vector.broadcast %579 : vector<1x1x16xi1> to vector<2x1x16xi1>
    %581 = vector.broadcast %cst_137 : f32 to vector<2x1x16xf32>
    %582 = arith.select %580, %581, %578 : vector<2x1x16xi1>, vector<2x1x16xf32>
    %583 = vector.broadcast %572 : vector<2x24x1xf32> to vector<2x24x16xf32>
    %584 = vector.broadcast %582 : vector<2x1x16xf32> to vector<2x24x16xf32>
    %585 = arith.mulf %583, %584 : vector<2x24x16xf32>
    %586 = arith.subf %552, %585 : vector<2x24x16xf32>
    %587 = vector.shape_cast %554 : vector<1x1x16xi1> to vector<1x1x16xi1>
    %588 = vector.broadcast %587 : vector<1x1x16xi1> to vector<2x24x16xi1>
    %589 = vector.shape_cast %572 : vector<2x24x1xf32> to vector<2x24x1xf32>
    %590 = vector.broadcast %589 : vector<2x24x1xf32> to vector<2x24x16xf32>
    %591 = arith.select %588, %590, %586 : vector<2x24x16xi1>, vector<2x24x16xf32>
    %c13_i32 = arith.constant 13 : i32
    %592 = vector.broadcast %c13_i32 : i32 to vector<1x1x16xi32>
    %593 = arith.cmpi eq, %84, %592 : vector<1x1x16xi32>
    %594 = vector.broadcast %c13_i32 : i32 to vector<1x24x1xi32>
    %595 = arith.cmpi eq, %83, %594 : vector<1x24x1xi32>
    %cst_138 = arith.constant 0.000000e+00 : f32
    %596 = vector.shape_cast %593 : vector<1x1x16xi1> to vector<1x1x16xi1>
    %597 = vector.broadcast %596 : vector<1x1x16xi1> to vector<2x24x16xi1>
    %598 = vector.broadcast %cst_138 : f32 to vector<2x24x16xf32>
    %599 = arith.select %597, %591, %598 : vector<2x24x16xi1>, vector<2x24x16xf32>
    %cst_139 = arith.constant dense<0.000000e+00> : vector<2x24xf32>
    %600 = vector.multi_reduction <add>, %599, %cst_139 [2] : vector<2x24x16xf32> to vector<2x24xf32>
    %601 = vector.shape_cast %600 : vector<2x24xf32> to vector<2x24x1xf32>
    %cst_140 = arith.constant 0.000000e+00 : f32
    %602 = vector.shape_cast %595 : vector<1x24x1xi1> to vector<1x24x1xi1>
    %603 = vector.broadcast %602 : vector<1x24x1xi1> to vector<2x24x1xi1>
    %604 = vector.broadcast %cst_140 : f32 to vector<2x24x1xf32>
    %605 = arith.select %603, %601, %604 : vector<2x24x1xi1>, vector<2x24x1xf32>
    %cst_141 = arith.constant dense<0.000000e+00> : vector<2x1xf32>
    %606 = vector.multi_reduction <add>, %605, %cst_141 [1] : vector<2x24x1xf32> to vector<2x1xf32>
    %607 = vector.shape_cast %606 : vector<2x1xf32> to vector<2x1x1xf32>
    %cst_142 = arith.constant 1.000000e+00 : f32
    %608 = vector.broadcast %cst_142 : f32 to vector<2x1x1xf32>
    %609 = arith.divf %608, %607 : vector<2x1x1xf32>
    %610 = vector.broadcast %609 : vector<2x1x1xf32> to vector<2x24x1xf32>
    %611 = arith.mulf %601, %610 : vector<2x24x1xf32>
    %cst_143 = arith.constant 0.000000e+00 : f32
    %612 = vector.shape_cast %595 : vector<1x24x1xi1> to vector<1x24x1xi1>
    %613 = vector.broadcast %612 : vector<1x24x1xi1> to vector<2x24x16xi1>
    %614 = vector.broadcast %cst_143 : f32 to vector<2x24x16xf32>
    %615 = arith.select %613, %591, %614 : vector<2x24x16xi1>, vector<2x24x16xf32>
    %cst_144 = arith.constant dense<0.000000e+00> : vector<2x16xf32>
    %616 = vector.multi_reduction <add>, %615, %cst_144 [1] : vector<2x24x16xf32> to vector<2x16xf32>
    %617 = vector.shape_cast %616 : vector<2x16xf32> to vector<2x1x16xf32>
    %cst_145 = arith.constant 0.000000e+00 : f32
    %618 = vector.shape_cast %593 : vector<1x1x16xi1> to vector<1x1x16xi1>
    %619 = vector.broadcast %618 : vector<1x1x16xi1> to vector<2x1x16xi1>
    %620 = vector.broadcast %cst_145 : f32 to vector<2x1x16xf32>
    %621 = arith.select %619, %620, %617 : vector<2x1x16xi1>, vector<2x1x16xf32>
    %622 = vector.broadcast %611 : vector<2x24x1xf32> to vector<2x24x16xf32>
    %623 = vector.broadcast %621 : vector<2x1x16xf32> to vector<2x24x16xf32>
    %624 = arith.mulf %622, %623 : vector<2x24x16xf32>
    %625 = arith.subf %591, %624 : vector<2x24x16xf32>
    %626 = vector.shape_cast %593 : vector<1x1x16xi1> to vector<1x1x16xi1>
    %627 = vector.broadcast %626 : vector<1x1x16xi1> to vector<2x24x16xi1>
    %628 = vector.shape_cast %611 : vector<2x24x1xf32> to vector<2x24x1xf32>
    %629 = vector.broadcast %628 : vector<2x24x1xf32> to vector<2x24x16xf32>
    %630 = arith.select %627, %629, %625 : vector<2x24x16xi1>, vector<2x24x16xf32>
    %c14_i32 = arith.constant 14 : i32
    %631 = vector.broadcast %c14_i32 : i32 to vector<1x1x16xi32>
    %632 = arith.cmpi eq, %84, %631 : vector<1x1x16xi32>
    %633 = vector.broadcast %c14_i32 : i32 to vector<1x24x1xi32>
    %634 = arith.cmpi eq, %83, %633 : vector<1x24x1xi32>
    %cst_146 = arith.constant 0.000000e+00 : f32
    %635 = vector.shape_cast %632 : vector<1x1x16xi1> to vector<1x1x16xi1>
    %636 = vector.broadcast %635 : vector<1x1x16xi1> to vector<2x24x16xi1>
    %637 = vector.broadcast %cst_146 : f32 to vector<2x24x16xf32>
    %638 = arith.select %636, %630, %637 : vector<2x24x16xi1>, vector<2x24x16xf32>
    %cst_147 = arith.constant dense<0.000000e+00> : vector<2x24xf32>
    %639 = vector.multi_reduction <add>, %638, %cst_147 [2] : vector<2x24x16xf32> to vector<2x24xf32>
    %640 = vector.shape_cast %639 : vector<2x24xf32> to vector<2x24x1xf32>
    %cst_148 = arith.constant 0.000000e+00 : f32
    %641 = vector.shape_cast %634 : vector<1x24x1xi1> to vector<1x24x1xi1>
    %642 = vector.broadcast %641 : vector<1x24x1xi1> to vector<2x24x1xi1>
    %643 = vector.broadcast %cst_148 : f32 to vector<2x24x1xf32>
    %644 = arith.select %642, %640, %643 : vector<2x24x1xi1>, vector<2x24x1xf32>
    %cst_149 = arith.constant dense<0.000000e+00> : vector<2x1xf32>
    %645 = vector.multi_reduction <add>, %644, %cst_149 [1] : vector<2x24x1xf32> to vector<2x1xf32>
    %646 = vector.shape_cast %645 : vector<2x1xf32> to vector<2x1x1xf32>
    %cst_150 = arith.constant 1.000000e+00 : f32
    %647 = vector.broadcast %cst_150 : f32 to vector<2x1x1xf32>
    %648 = arith.divf %647, %646 : vector<2x1x1xf32>
    %649 = vector.broadcast %648 : vector<2x1x1xf32> to vector<2x24x1xf32>
    %650 = arith.mulf %640, %649 : vector<2x24x1xf32>
    %cst_151 = arith.constant 0.000000e+00 : f32
    %651 = vector.shape_cast %634 : vector<1x24x1xi1> to vector<1x24x1xi1>
    %652 = vector.broadcast %651 : vector<1x24x1xi1> to vector<2x24x16xi1>
    %653 = vector.broadcast %cst_151 : f32 to vector<2x24x16xf32>
    %654 = arith.select %652, %630, %653 : vector<2x24x16xi1>, vector<2x24x16xf32>
    %cst_152 = arith.constant dense<0.000000e+00> : vector<2x16xf32>
    %655 = vector.multi_reduction <add>, %654, %cst_152 [1] : vector<2x24x16xf32> to vector<2x16xf32>
    %656 = vector.shape_cast %655 : vector<2x16xf32> to vector<2x1x16xf32>
    %cst_153 = arith.constant 0.000000e+00 : f32
    %657 = vector.shape_cast %632 : vector<1x1x16xi1> to vector<1x1x16xi1>
    %658 = vector.broadcast %657 : vector<1x1x16xi1> to vector<2x1x16xi1>
    %659 = vector.broadcast %cst_153 : f32 to vector<2x1x16xf32>
    %660 = arith.select %658, %659, %656 : vector<2x1x16xi1>, vector<2x1x16xf32>
    %661 = vector.broadcast %650 : vector<2x24x1xf32> to vector<2x24x16xf32>
    %662 = vector.broadcast %660 : vector<2x1x16xf32> to vector<2x24x16xf32>
    %663 = arith.mulf %661, %662 : vector<2x24x16xf32>
    %664 = arith.subf %630, %663 : vector<2x24x16xf32>
    %665 = vector.shape_cast %632 : vector<1x1x16xi1> to vector<1x1x16xi1>
    %666 = vector.broadcast %665 : vector<1x1x16xi1> to vector<2x24x16xi1>
    %667 = vector.shape_cast %650 : vector<2x24x1xf32> to vector<2x24x1xf32>
    %668 = vector.broadcast %667 : vector<2x24x1xf32> to vector<2x24x16xf32>
    %669 = arith.select %666, %668, %664 : vector<2x24x16xi1>, vector<2x24x16xf32>
    %c15_i32 = arith.constant 15 : i32
    %670 = vector.broadcast %c15_i32 : i32 to vector<1x1x16xi32>
    %671 = arith.cmpi eq, %84, %670 : vector<1x1x16xi32>
    %672 = vector.broadcast %c15_i32 : i32 to vector<1x24x1xi32>
    %673 = arith.cmpi eq, %83, %672 : vector<1x24x1xi32>
    %cst_154 = arith.constant 0.000000e+00 : f32
    %674 = vector.shape_cast %671 : vector<1x1x16xi1> to vector<1x1x16xi1>
    %675 = vector.broadcast %674 : vector<1x1x16xi1> to vector<2x24x16xi1>
    %676 = vector.broadcast %cst_154 : f32 to vector<2x24x16xf32>
    %677 = arith.select %675, %669, %676 : vector<2x24x16xi1>, vector<2x24x16xf32>
    %cst_155 = arith.constant dense<0.000000e+00> : vector<2x24xf32>
    %678 = vector.multi_reduction <add>, %677, %cst_155 [2] : vector<2x24x16xf32> to vector<2x24xf32>
    %679 = vector.shape_cast %678 : vector<2x24xf32> to vector<2x24x1xf32>
    %cst_156 = arith.constant 0.000000e+00 : f32
    %680 = vector.shape_cast %673 : vector<1x24x1xi1> to vector<1x24x1xi1>
    %681 = vector.broadcast %680 : vector<1x24x1xi1> to vector<2x24x1xi1>
    %682 = vector.broadcast %cst_156 : f32 to vector<2x24x1xf32>
    %683 = arith.select %681, %679, %682 : vector<2x24x1xi1>, vector<2x24x1xf32>
    %cst_157 = arith.constant dense<0.000000e+00> : vector<2x1xf32>
    %684 = vector.multi_reduction <add>, %683, %cst_157 [1] : vector<2x24x1xf32> to vector<2x1xf32>
    %685 = vector.shape_cast %684 : vector<2x1xf32> to vector<2x1x1xf32>
    %cst_158 = arith.constant 1.000000e+00 : f32
    %686 = vector.broadcast %cst_158 : f32 to vector<2x1x1xf32>
    %687 = arith.divf %686, %685 : vector<2x1x1xf32>
    %688 = vector.broadcast %687 : vector<2x1x1xf32> to vector<2x24x1xf32>
    %689 = arith.mulf %679, %688 : vector<2x24x1xf32>
    %cst_159 = arith.constant 0.000000e+00 : f32
    %690 = vector.shape_cast %673 : vector<1x24x1xi1> to vector<1x24x1xi1>
    %691 = vector.broadcast %690 : vector<1x24x1xi1> to vector<2x24x16xi1>
    %692 = vector.broadcast %cst_159 : f32 to vector<2x24x16xf32>
    %693 = arith.select %691, %669, %692 : vector<2x24x16xi1>, vector<2x24x16xf32>
    %cst_160 = arith.constant dense<0.000000e+00> : vector<2x16xf32>
    %694 = vector.multi_reduction <add>, %693, %cst_160 [1] : vector<2x24x16xf32> to vector<2x16xf32>
    %695 = vector.shape_cast %694 : vector<2x16xf32> to vector<2x1x16xf32>
    %cst_161 = arith.constant 0.000000e+00 : f32
    %696 = vector.shape_cast %671 : vector<1x1x16xi1> to vector<1x1x16xi1>
    %697 = vector.broadcast %696 : vector<1x1x16xi1> to vector<2x1x16xi1>
    %698 = vector.broadcast %cst_161 : f32 to vector<2x1x16xf32>
    %699 = arith.select %697, %698, %695 : vector<2x1x16xi1>, vector<2x1x16xf32>
    %700 = vector.broadcast %689 : vector<2x24x1xf32> to vector<2x24x16xf32>
    %701 = vector.broadcast %699 : vector<2x1x16xf32> to vector<2x24x16xf32>
    %702 = arith.mulf %700, %701 : vector<2x24x16xf32>
    %703 = arith.subf %669, %702 : vector<2x24x16xf32>
    %704 = vector.shape_cast %671 : vector<1x1x16xi1> to vector<1x1x16xi1>
    %705 = vector.broadcast %704 : vector<1x1x16xi1> to vector<2x24x16xi1>
    %706 = vector.shape_cast %689 : vector<2x24x1xf32> to vector<2x24x1xf32>
    %707 = vector.broadcast %706 : vector<2x24x1xf32> to vector<2x24x16xf32>
    %708 = arith.select %705, %707, %703 : vector<2x24x16xi1>, vector<2x24x16xf32>
    %c16_i32 = arith.constant 16 : i32
    %709 = vector.extract_strided_slice %708 {offsets = [0, 16, 0], sizes = [2, 8, 16], strides = [1, 1, 1]} : vector<2x24x16xf32> to vector<2x8x16xf32>
    %710 = vector.shape_cast %709 : vector<2x8x16xf32> to vector<16x16xf32>
    %711 = arith.truncf %710 : vector<16x16xf32> to vector<16x16xbf16>
    %cst_162 = arith.constant dense<0.000000e+00> : vector<16x128xf32>
    %712 = tpu.matmul %711, %60, %cst_162 {dimension_numbers = #tpu.dot_dimension_numbers<[1], [0], [0], [1], [0, 0, 1, 1], [], []>} : vector<16x16xbf16>, vector<16x128xbf16>, vector<16x128xf32> -> vector<16x128xf32>
    %c0_163 = arith.constant 0 : index
    %c0_164 = arith.constant 0 : index
    %713 = vector.load %arg2[%c0_163, %c0_164] : memref<16x128xbf16, #tpu.memory_space<vmem>>, vector<16x128xbf16>
    %714 = arith.extf %713 : vector<16x128xbf16> to vector<16x128xf32>
    %715 = arith.addf %714, %712 : vector<16x128xf32>
    %716 = arith.truncf %715 : vector<16x128xf32> to vector<16x128xbf16>
    %c0_165 = arith.constant 0 : index
    %c0_166 = arith.constant 0 : index
    %717 = vector.load %arg11[%c0_165, %c0_166] : memref<16x128xbf16, #tpu.memory_space<vmem>>, vector<16x128xbf16>
    tpu.vector_store %arg11[%c0_165, %c0_166], %716 {strides = array<i32>} : memref<16x128xbf16, #tpu.memory_space<vmem>>, vector<16x128xbf16>,
    %718 = arith.mulf %25, %25 : vector<2x16xf32>
    %cst_167 = arith.constant 1.000000e-01 : f32
    %719 = vector.broadcast %cst_167 : f32 to vector<2x16xf32>
    %720 = arith.mulf %719, %718 : vector<2x16xf32>
    %cst_168 = arith.constant 1.000000e-01 : f32
    %721 = vector.broadcast %cst_168 : f32 to vector<2x16xf32>
    %722 = arith.mulf %721, %718 : vector<2x16xf32>
    %cst_169 = arith.constant 1.000000e+00 : f32
    %723 = vector.broadcast %cst_169 : f32 to vector<2x16xf32>
    %724 = arith.addf %722, %723 : vector<2x16xf32>
    %725 = tpu.reciprocal %724 {approx = true} : vector<2x16xf32> -> vector<2x16xf32>
    %726 = arith.mulf %720, %725 : vector<2x16xf32>
    %727 = vector.shape_cast %726 : vector<2x16xf32> to vector<2x1x16xf32>
    %c0_170 = arith.constant 0 : index
    %c0_171 = arith.constant 0 : index
    %c0_172 = arith.constant 0 : index
    %728 = vector.load %arg12[%c0_170, %c0_171, %c0_172] : memref<2x1x16xf32, #tpu.memory_space<vmem>>, vector<2x1x16xf32>
    tpu.vector_store %arg12[%c0_170, %c0_171, %c0_172], %727 {strides = array<i32>} : memref<2x1x16xf32, #tpu.memory_space<vmem>>, vector<2x1x16xf32>,
    return
  }
  func.func @transform_0(%arg0: i32) -> (i32, i32, i32) {
    %c0_i32 = arith.constant 0 : i32
    %c0_i32_0 = arith.constant 0 : i32
    %c0_i32_1 = arith.constant 0 : i32
    return %arg0, %c0_i32, %c0_i32_0 : i32, i32, i32
  }
  func.func @transform_1(%arg0: i32) -> (i32, i32) {
    %c0_i32 = arith.constant 0 : i32
    %c0_i32_0 = arith.constant 0 : i32
    return %arg0, %c0_i32 : i32, i32
  }
  func.func @transform_2(%arg0: i32) -> (i32, i32) {
    %c0_i32 = arith.constant 0 : i32
    %c0_i32_0 = arith.constant 0 : i32
    return %arg0, %c0_i32 : i32, i32
  }
  func.func @transform_3(%arg0: i32) -> (i32, i32) {
    %c0_i32 = arith.constant 0 : i32
    %c0_i32_0 = arith.constant 0 : i32
    %c0_i32_1 = arith.constant 0 : i32
    return %c0_i32, %c0_i32_0 : i32, i32
  }
  func.func @transform_4(%arg0: i32) -> (i32, i32) {
    %c0_i32 = arith.constant 0 : i32
    %c0_i32_0 = arith.constant 0 : i32
    %c0_i32_1 = arith.constant 0 : i32
    return %c0_i32, %c0_i32_0 : i32, i32
  }
  func.func @transform_5(%arg0: i32) -> (i32, i32) {
    %c0_i32 = arith.constant 0 : i32
    %c0_i32_0 = arith.constant 0 : i32
    %c0_i32_1 = arith.constant 0 : i32
    return %c0_i32, %c0_i32_0 : i32, i32
  }
  func.func @transform_6(%arg0: i32) -> (i32, i32) {
    %c0_i32 = arith.constant 0 : i32
    %c0_i32_0 = arith.constant 0 : i32
    %c0_i32_1 = arith.constant 0 : i32
    return %c0_i32, %c0_i32_0 : i32, i32
  }
  func.func @transform_7(%arg0: i32) -> (i32, i32) {
    %c0_i32 = arith.constant 0 : i32
    %c0_i32_0 = arith.constant 0 : i32
    %c0_i32_1 = arith.constant 0 : i32
    return %c0_i32, %c0_i32_0 : i32, i32
  }
  func.func @transform_8(%arg0: i32) -> (i32, i32) {
    %c0_i32 = arith.constant 0 : i32
    %c0_i32_0 = arith.constant 0 : i32
    %c0_i32_1 = arith.constant 0 : i32
    return %c0_i32, %c0_i32_0 : i32, i32
  }
  func.func @transform_9(%arg0: i32) -> (i32, i32) {
    %c0_i32 = arith.constant 0 : i32
    %c0_i32_0 = arith.constant 0 : i32
    %c0_i32_1 = arith.constant 0 : i32
    return %c0_i32, %c0_i32_0 : i32, i32
  }
  func.func @transform_10(%arg0: i32) -> (i32, i32) {
    %c0_i32 = arith.constant 0 : i32
    %c0_i32_0 = arith.constant 0 : i32
    return %arg0, %c0_i32 : i32, i32
  }
  func.func @transform_11(%arg0: i32) -> (i32, i32, i32) {
    %c0_i32 = arith.constant 0 : i32
    %c0_i32_0 = arith.constant 0 : i32
    %c0_i32_1 = arith.constant 0 : i32
    return %arg0, %c0_i32, %c0_i32_0 : i32, i32, i32
  }
}

</mosaic_0001>

<bundles_post_ra>
// kernel: tpu_custom_call.1
= control target key start
LH: loop header
LB: loop body
LE: loop exit
PB: predicated region body
PF: predicated region fallthrough
CT: control target
= control target key end

     0   :  { %s5075_s0 = inlined_call_operand.vmem [shape: bf16[4,1,128], index: 0, kind: input, shape index: {}]   ;;  %s5076_s1 = inlined_call_operand.hbm [shape: bf16[32,128], index: 1, kind: input, shape index: {}]   ;;  %s5077_s2 = inlined_call_operand.hbm [shape: bf16[32,128], index: 2, kind: input, shape index: {}]   ;;  %s5078_s3 = inlined_call_operand.hbm [shape: bf16[1,128], index: 3, kind: input, shape index: {}]   ;;  %s5079_s4 = inlined_call_operand.hbm [shape: bf16[1,128], index: 4, kind: input, shape index: {}]   ;;  %s5080_s5 = inlined_call_operand.hbm [shape: bf16[1,128], index: 5, kind: input, shape index: {}]   ;;  %s5081_s6 = inlined_call_operand.vmem [shape: bf16[16,128], index: 6, kind: input, shape index: {}]   ;;  %s5082_s7 = inlined_call_operand.hbm [shape: bf16[1,16], index: 7, kind: input, shape index: {}]   ;;  %s5083_s8 = inlined_call_operand.vmem [shape: bf16[16,128], index: 8, kind: input, shape index: {}]   ;;  %s5084_s9 = inlined_call_operand.vmem [shape: f32[16,16], index: 9, kind: input, shape index: {}]   ;;  %s5085_s10 = inlined_call_operand.hbm [shape: bf16[32,128], index: 10, kind: output, shape index: {0}]   ;;  %s5086_s11 = inlined_call_operand.hbm [shape: f32[4,1,16], index: 11, kind: output, shape index: {1}]  }
   0x1   :  { %5094 = sst [smem:[#allocation25_spill]] %s5076_s1 }
   0x2   :  { %5095 = sst [smem:[#allocation26_spill]] %s5078_s3 }
   0x3   :  { %5096 = sst [smem:[#allocation27_spill]] %s5079_s4 }
   0x4   :  { %5097 = sst [smem:[#allocation28_spill]] %s5080_s5 }
   0x5   :  { %5098 = sst [smem:[#allocation29_spill]] %s5082_s7 }
   0x6   :  { %5099 = sst [smem:[#allocation30_spill]] %s5085_s10 }
   0x7   :  { %17 = vsyncpa [#allocation3], 0 }
   0x8   :  { %19 = vsyncpa [#allocation3 + $0x1], 0 }
   0x9   :  { %20 = vsyncpa [#allocation6], 0 }
   0xa   :  { %22 = vsyncpa [#allocation6 + $0x1], 0 }
   0xb   :  { %23 = vsyncpa [#allocation9], 0 }
   0xc   :  { %24 = vsyncpa [#allocation12], 0 }
   0xd   :  { %25 = vsyncpa [#allocation4], 0 }
   0xe   :  { %27 = vsyncpa [#allocation4 + $0x1], 0 }
   0xf   :  { %28 = vsyncpa [#allocation15], 0 }
  0x10   :  { %30 = vsyncpa [#allocation15 + $0x1], 0  ;;  %s3592_s17 = smov 0   ;;  %s3594_s18 = smov 0  }
  0x11   :  { %s3596_s19 = smov 0   ;;  %s3598_s20 = smov 0  }
  0x12 LB: > { %5100 = sst [smem:[#allocation23_spill]] %s3499_s17  ;;  %s3613_s21 = sadd.s32 4294967295, %s3511_s20   ;;  %s3511_s20 = sphi %s3598_s20, %s5132_s20   ;;  %s3507_s19 = sphi %s3596_s19, %s5131_s19   ;;  %s3503_s18 = sphi %s3594_s18, %s5130_s18   ;;  %s3499_s17 = sphi %s3592_s17, %s5129_s17  }
  0x13   : > { %s2958_s22 = sadd.s32 4294967294, %s3511_s20   ;;  %p82_p0 = scmp.ne.s32.totalorder %s3503_s18, %s3499_s17 }
  0x14   : > { %p5088_p1 = scmp.eq.s32.totalorder %s3613_s21, 0  ;;  %p285_p3 = scmp.eq.s32.totalorder %s2958_s22, 1 }
  0x15   : > { %p2959_p5 = scmp.ge.s32.totalorder %s3511_s20, 1  ;;  %p318_p7 = scmp.lt.s32.totalorder %s3511_s20, 3 }
  0x16   : > { %p3622_p4 = por %p5088_p1, %p82_p0  ;;  %p3627_p6 = por %p285_p3, %p82_p0 }
  0x17   : > { %p3632_p8 = pnand %p2959_p5, %p318_p7  ;;  %s3513_s26 = smov [#allocation7]  }
  0x18   : > { %s5101_s23 = scalar_select %p3622_p4, 1, 0 }
  0x19   : > { %s5102_s24 = scalar_select %p3627_p6, 1, 0 }
  0x1a   : > { %s5104_s25 = scalar_select %p3632_p8, 1, 0 }
  0x1b   : > { %5103 = sst [smem:[#allocation24_spill]] %s5102_s24  ;;  %s331_s27 = sshll.u32 %s3513_s26, 4  ;;  %s332_s27 = int_to_ptr.vmem [resolvable:$true] %s331_s27 }
  0x1c   : > { %p3061_p10 = pneg %p3632_p8  ;;  %s3514_s28 = smov [#allocation8]  }
  0x1d   : > { %s342_s29 = sshll.u32 %s3514_s28, 4  ;;  %s3515_s12 = smov [#allocation10]   ;;  %s3645_s29 = int_to_ptr.vmem [resolvable:$true] %s342_s29 }
  0x1e   : > { %p3641_p11 = pnand %p3061_p10, %p5088_p1  ;;  %s353_s13 = sshll.u32 %s3515_s12, 4  ;;  %s3647_s13 = int_to_ptr.vmem [resolvable:$true] %s353_s13 }
  0x1f   : > { %s5106_s3 = sld [smem:[#allocation26_spill]] }
  0x20   : > { %p3657_p13 = pneg %p3641_p11 }
  0x25   : > { %s3225_s16 = scalar_lea.hbm %s5106_s3, 16 }
  0x26   : > { %p3226_p12 = scmp.ne.s32.totalorder %s5106_s3, %s3225_s16  ;;  %p3232_p5 = scmp.lt.u32.totalorder %s3225_s16, %s5106_s3 }
  0x28   : > { %p3228_p0 = pnand %p3657_p13, %p3226_p12 }
  0x2a   : > { %p3229_p3 = pneg %p3228_p0 }
  0x2c   : > { %p3234_p7 = pnand %p3232_p5, %p3229_p3 }
  0x2e   : > { %3237 = shalt.err (!%p3234_p7)
}
  0x2f   : > { %s3238_s14 = scalar_lea.vmem %s332_s27, 16  ;;  %s3245_s15 = scalar_lea.vmem %s332_s27, 32 }
  0x30   : > { %p3239_p10 = scmp.ne.s32.totalorder %s332_s27, %s3238_s14  ;;  %p3246_p2 = scmp.lt.s32.totalorder %s332_s27, %s332_s27 }
  0x31   : > { %p3247_p6 = scmp.lt.s32.totalorder %s3245_s15, %s3238_s14 }
  0x32   : > { %p3241_p9 = pnand %p3239_p10, %p3657_p13 }
  0x33   : > { %p3248_p4 = por %p3247_p6, %p3246_p2 }
  0x34   : > { %p3242_p1 = pneg %p3241_p9 }
  0x36   : > { %p3249_p8 = pnand %p3248_p4, %p3242_p1 }
  0x38   : > { %3252 = shalt.err (!%p3249_p8)
}
  0x39   : > { %3064 = dma.hbm_to_vmem [thread:$0]  (!%p3641_p11), %s5106_s3, 16, %s332_s27, [#allocation6]  }
  0x3a   : > { %s5108_s4 = sld [smem:[#allocation27_spill]] }
  0x40   : > { %s3253_s12 = scalar_lea.hbm %s5108_s4, 16 }
  0x41   : > { %p3254_p9 = scmp.ne.s32.totalorder %s5108_s4, %s3253_s12  ;;  %p3260_p1 = scmp.lt.u32.totalorder %s3253_s12, %s5108_s4 }
  0x43   : > { %p3256_p12 = pnand %p3254_p9, %p3657_p13 }
  0x45   : > { %p3257_p2 = pneg %p3256_p12 }
  0x47   : > { %p3262_p4 = pnand %p3260_p1, %p3257_p2 }
  0x49   : > { %3265 = shalt.err (!%p3262_p4)
}
  0x4a   : > { %s3266_s27 = scalar_lea.vmem %s3645_s29, 16  ;;  %s3273_s10 = scalar_lea.vmem %s3645_s29, 32 }
  0x4b   : > { %p3267_p6 = scmp.ne.s32.totalorder %s3645_s29, %s3266_s27  ;;  %p3274_p3 = scmp.lt.s32.totalorder %s3645_s29, %s3645_s29 }
  0x4c   : > { %p3275_p5 = scmp.lt.s32.totalorder %s3273_s10, %s3266_s27 }
  0x4d   : > { %p3269_p8 = pnand %p3267_p6, %p3657_p13 }
  0x4e   : > { %p3276_p7 = por %p3275_p5, %p3274_p3 }
  0x4f   : > { %p3270_p0 = pneg %p3269_p8 }
  0x51   : > { %p3277_p10 = pnand %p3276_p7, %p3270_p0 }
  0x53   : > { %3280 = shalt.err (!%p3277_p10)
}
  0x54   : > { %3067 = dma.hbm_to_vmem [thread:$0]  (!%p3641_p11), %s5108_s4, 16, %s3645_s29, [#allocation9]  }
  0x55   : > { %s5109_s5 = sld [smem:[#allocation28_spill]] }
  0x5b   : > { %s3281_s16 = scalar_lea.hbm %s5109_s5, 16 }
  0x5c   : > { %p3282_p9 = scmp.ne.s32.totalorder %s5109_s5, %s3281_s16  ;;  %p3288_p1 = scmp.lt.u32.totalorder %s3281_s16, %s5109_s5 }
  0x5e   : > { %p3284_p12 = pnand %p3282_p9, %p3657_p13 }
  0x60   : > { %p3285_p2 = pneg %p3284_p12 }
  0x62   : > { %p3290_p4 = pnand %p3288_p1, %p3285_p2 }
  0x64   : > { %3293 = shalt.err (!%p3290_p4)
}
  0x65   : > { %s3294_s29 = scalar_lea.vmem %s3647_s13, 16  ;;  %s3301_s10 = scalar_lea.vmem %s3647_s13, 32 }
  0x66   : > { %p3295_p6 = scmp.ne.s32.totalorder %s3647_s13, %s3294_s29  ;;  %p3302_p3 = scmp.lt.s32.totalorder %s3647_s13, %s3647_s13 }
  0x67   : > { %p3303_p5 = scmp.lt.s32.totalorder %s3301_s10, %s3294_s29 }
  0x68   : > { %p3297_p8 = pnand %p3295_p6, %p3657_p13 }
  0x69   : > { %p3304_p7 = por %p3303_p5, %p3302_p3 }
  0x6a   : > { %p3298_p0 = pneg %p3297_p8 }
  0x6c   : > { %p3305_p10 = pnand %p3304_p7, %p3298_p0 }
  0x6e   : > { %3308 = shalt.err (!%p3305_p10)
}
  0x6f   : > { %3070 = dma.hbm_to_vmem [thread:$0]  (!%p3641_p11), %s5109_s5, 16, %s3647_s13, [#allocation9]  }
  0x70   : > { %s3516_s26 = smov [#allocation11]   ;;  %s5110_s7 = sld [smem:[#allocation29_spill]] }
  0x71   : > { %s367_s24 = sshll.u32 %s3516_s26, 4  ;;  %s368_s24 = int_to_ptr.vmem [resolvable:$true] %s367_s24 }
  0x76   : > { %s3309_s14 = scalar_lea.hbm %s5110_s7, 16 }
  0x77   : > { %p3310_p9 = scmp.ne.s32.totalorder %s5110_s7, %s3309_s14  ;;  %p3316_p1 = scmp.lt.u32.totalorder %s3309_s14, %s5110_s7 }
  0x79   : > { %p3312_p12 = pnand %p3310_p9, %p3657_p13 }
  0x7b   : > { %p3313_p2 = pneg %p3312_p12 }
  0x7d   : > { %p3318_p4 = pnand %p3316_p1, %p3313_p2 }
  0x7f   : > { %3321 = shalt.err (!%p3318_p4)
}
  0x80   : > { %s3322_s13 = scalar_lea.vmem %s368_s24, 16  ;;  %s3329_s17 = scalar_lea.vmem %s368_s24, 32 }
  0x81   : > { %p3323_p6 = scmp.ne.s32.totalorder %s368_s24, %s3322_s13  ;;  %p3330_p3 = scmp.lt.s32.totalorder %s368_s24, %s368_s24 }
  0x82   : > { %p3331_p5 = scmp.lt.s32.totalorder %s3329_s17, %s3322_s13 }
  0x83   : > { %p3325_p8 = pnand %p3323_p6, %p3657_p13 }
  0x84   : > { %p3332_p7 = por %p3331_p5, %p3330_p3 }
  0x85   : > { %p3326_p0 = pneg %p3325_p8 }
  0x87   : > { %p3333_p10 = pnand %p3332_p7, %p3326_p0 }
  0x89   : > { %3336 = shalt.err (!%p3333_p10)
}
  0x8a   : > { %3073 = dma.hbm_to_vmem [thread:$0]  (!%p3641_p11), %s5110_s7, 16, %s368_s24, [#allocation12]  }
  0x8b   : > { %s3740_s28 = sadd.s32 1, %s3511_s20   ;;  %s69_s30 = sadd.s32 1, %s3507_s19 }
  0x8c   : > { %s66_s16 = ssub.s32 %s3511_s20, %s3740_s28  ;;  %p76_p13 = scmp.ne.s32.totalorder %s3507_s19, %s3503_s18 }
  0x8d   : > { %p67_p9 = scmp.eq.s32.totalorder %s66_s16, 0  ;;  %p77_p12 = scmp.eq.s32.totalorder %s3511_s20, 0 }
  0x8e   : > { %p5111_p2 = scmp.eq.s32.totalorder %s3613_s21, 1  ;;  %p3092_p4 = scmp.lt.s32.totalorder %s3511_s20, 2 }
  0x8f   : > { %s3756_s14 = scalar_select %p67_p9, %s3507_s19, %s69_s30  }
  0x90   : > { %p3750_p1 = por %p5111_p2, %p76_p13  ;;  %p78_p6 = por %p77_p12, %p76_p13 }
  0x91   : > { %s392_s15 = sand.u32 1, %s3507_s19   ;;  %s5093_s24 = sshll.u32 %s3511_s20, 7 }
  0x92   : > { %s3759_s27 = sshll.u32 %s392_s15, 3  ;;  %s5113_s1 = sld [smem:[#allocation25_spill]] }
  0x93   : > { %s396_s17 = scalar_lea.vmem [#allocation2], %s3759_s27  ;;  %p3772_p11 = pnand %p3092_p4, %p78_p6 }
  0x94   : > { %s403_s22 = sshll.u32 %s396_s17, 4  ;;  %s3776_s30 = scalar_lea.sflag [#allocation3], %s392_s15  ;;  %s3770_s22 = int_to_ptr.vmem [resolvable:$true] %s403_s22 }
  0x95   : > { %p3339_p0 = pneg %p3772_p11 }
  0x98   : > { %s3767_s13 = scalar_lea.hbm %s5113_s1, %s5093_s24  ;;  %s3342_s17 = scalar_lea.hbm %s5113_s1, 256 }
  0x99   : > { %s3337_s16 = scalar_lea.hbm %s3767_s13, 128  ;;  %p3343_p7 = scmp.lt.u32.totalorder %s3767_s13, %s5113_s1 }
  0x9a   : > { %p3338_p8 = scmp.ne.s32.totalorder %s3767_s13, %s3337_s16  ;;  %p3344_p10 = scmp.lt.u32.totalorder %s3342_s17, %s3337_s16 }
  0x9b   : > { %p3346_p9 = scmp.lt.u32.totalorder %s3337_s16, %s3767_s13 }
  0x9c   : > { %p3340_p3 = pnand %p3339_p0, %p3338_p8  ;;  %p3345_p13 = por %p3344_p10, %p3343_p7 }
  0x9e   : > { %p3341_p5 = pneg %p3340_p3  ;;  %p3347_p12 = por %p3346_p9, %p3345_p13 }
  0xa0   : > { %p3348_p2 = pnand %p3347_p12, %p3341_p5 }
  0xa2   : > { %3351 = shalt.err (!%p3348_p2)
}
  0xa3   : > { %s3352_s15 = scalar_lea.vmem %s3770_s22, 128  ;;  %s3517_s29 = smov [#allocation2]  }
  0xa4   : > { %p3353_p4 = scmp.ne.s32.totalorder %s3770_s22, %s3352_s15  ;;  %s3357_s10 = sshll.u32 %s3517_s29, 4  ;;  %s3358_s10 = int_to_ptr.vmem [resolvable:$false] %s3357_s10 }
  0xa5   : > { %s3359_s3 = scalar_lea.vmem %s3358_s10, 256  ;;  %p3360_p3 = scmp.lt.s32.totalorder %s3770_s22, %s3358_s10 }
  0xa6   : > { %p3355_p6 = pnand %p3353_p4, %p3339_p0  ;;  %p3361_p7 = scmp.lt.s32.totalorder %s3359_s3, %s3352_s15 }
  0xa8   : > { %p3356_p8 = pneg %p3355_p6  ;;  %p3362_p10 = por %p3361_p7, %p3360_p3 }
  0xaa   : > { %p3363_p13 = pnand %p3362_p10, %p3356_p8 }
  0xac   : > { %3366 = shalt.err (!%p3363_p13)
}
  0xad   : > { %s3518_s24 = smov 64   ;;  %s3519_s16 = smov 4  }
  0xae   : > { %3077 = dma.hbm_to_vmem [thread:$0]  (!%p3772_p11), %s3767_s13, 128, %s3770_s22, %s3776_s30, %s3518_s24, %s3518_s24, %s3519_s16  }
  0xaf   : > { %s5115_s17 = sshll.u32 %s3511_s20, 7  ;;  %s417_s3 = scalar_lea.vmem [#allocation5], %s3759_s27 }
  0xb0   : > { %s3812_s10 = scalar_lea.hbm %s5077_s2, %s5115_s17  ;;  %s424_s1 = sshll.u32 %s417_s3, 4  ;;  %s3815_s1 = int_to_ptr.vmem [resolvable:$true] %s424_s1 }
  0xb1   : > { %s413_s4 = sand.u32 1, %s3511_s20   ;;  %s3367_s7 = scalar_lea.hbm %s3812_s10, 128 }
  0xb2   : > { %s3818_s5 = scalar_lea.sflag [#allocation6], %s413_s4  ;;  %p3368_p5 = scmp.ne.s32.totalorder %s3812_s10, %s3367_s7 }
  0xb3   : > { %s3372_s30 = scalar_lea.hbm %s5077_s2, 256  ;;  %p3373_p2 = scmp.lt.u32.totalorder %s3812_s10, %s5077_s2 }
  0xb4   : > { %p3370_p9 = pnand %p3368_p5, %p3339_p0  ;;  %p3374_p4 = scmp.lt.u32.totalorder %s3372_s30, %s3367_s7 }
  0xb5   : > { %p3376_p8 = scmp.lt.u32.totalorder %s3367_s7, %s3812_s10 }
  0xb6   : > { %p3371_p12 = pneg %p3370_p9  ;;  %p3375_p6 = por %p3374_p4, %p3373_p2 }
  0xb8   : > { %p3377_p3 = por %p3376_p8, %p3375_p6 }
  0xba   : > { %p3378_p7 = pnand %p3377_p3, %p3371_p12 }
  0xbc   : > { %3381 = shalt.err (!%p3378_p7)
}
  0xbd   : > { %s3382_s4 = scalar_lea.vmem %s3815_s1, 128  ;;  %s3520_s27 = smov [#allocation5]  }
  0xbe   : > { %p3383_p10 = scmp.ne.s32.totalorder %s3815_s1, %s3382_s4  ;;  %s3387_s29 = sshll.u32 %s3520_s27, 4  ;;  %s3388_s29 = int_to_ptr.vmem [resolvable:$false] %s3387_s29 }
  0xbf   : > { %s3389_s3 = scalar_lea.vmem %s3388_s29, 256  ;;  %p3390_p9 = scmp.lt.s32.totalorder %s3815_s1, %s3388_s29 }
  0xc0   : > { %p3385_p13 = pnand %p3383_p10, %p3339_p0  ;;  %p3391_p2 = scmp.lt.s32.totalorder %s3389_s3, %s3382_s4 }
  0xc2   : > { %p3386_p5 = pneg %p3385_p13  ;;  %p3392_p4 = por %p3391_p2, %p3390_p9 }
  0xc4   : > { %p3393_p6 = pnand %p3392_p4, %p3386_p5 }
  0xc6   : > { %3396 = shalt.err (!%p3393_p6)
}
  0xc7   : > { %3080 = dma.hbm_to_vmem [thread:$0]  (!%p3772_p11), %s3812_s10, 128, %s3815_s1, %s3818_s5, %s3518_s24, %s3518_s24, %s3519_s16  }
  0xc8   : > { %p5116_p0 = scmp.ne.s32.totalorder %s5104_s25, 0 }
  0xc9   : > { %s3850_s7 = sand.u32 (!%p5116_p0), 1, %s3503_s18   ;;  %p5117_p12 = scmp.ne.s32.totalorder (!%p5116_p0), %s5101_s23, 0 }
  0xca   : > { %436 = sbr.rel (%p5116_p0) target bundleno = 3885 (0xf2d), region = 60  ;;  %s3853_s13 = sshll.u32 (!%p5116_p0), %s3850_s7, 3 }
  0xcb   : > { %s439_s26 = scalar_lea.sflag (!%p5116_p0), [#allocation3], %s3850_s7  ;;  %s442_s22 = scalar_lea.vmem (!%p5116_p0), [#allocation2], %s3853_s13 }
  0xd1   : > { %3470 = dma.done.wait (%p5117_p12), %s439_s26, 128  }
  0xd2   : > { %3472 = vsyncadd (%p5117_p12), %s439_s26, 4294967168  ;;  %s447_s1 = sand.u32 1, %s3613_s21   ;;  %s451_s25 = scalar_lea.vmem [#allocation5], %s3853_s13 }
  0xd3   : > { %s448_s5 = scalar_lea.sflag [#allocation6], %s447_s1 }
  0xd4   : > { %3474 = dma.done.wait (%p5117_p12), %s448_s5, 128  }
  0xd5   : > { %3476 = vsyncadd (%p5117_p12), %s448_s5, 4294967168  ;;  %p5118_p11 = scmp.eq.s32.totalorder %s3613_s21, 0 }
  0xd7   : > { %3478 = dma.done.wait (%p5118_p11), [#allocation6], 16   ;;  %p5119_p8 = pmov %p5118_p11 }
  0xd9   : > { %3480 = vsyncadd (%p5119_p8), [#allocation6], 4294967280  ;;  %p5120_p3 = pmov %p5119_p8 }
  0xdb   : > { %3482 = dma.done.wait (%p5120_p3), [#allocation9], 32   ;;  %p5121_p7 = pmov %p5120_p3 }
  0xdc   : > { %p5122_p10 = pmov %p5120_p3 }
  0xdd   : > { %3484 = vsyncadd (%p5121_p7), [#allocation9], 4294967264 }
  0xde   : > { %3486 = dma.done.wait (%p5122_p10), [#allocation12], 16   ;;  %p5123_p13 = pmov %p5120_p3 }
  0xdf   : > { %s2980_s23 = sshll.u32 %s3613_s21, 1  ;;  %v539_v0 = vlaneseq  ;;  %vm547_vm0 = vcmask 1041409   ;;  %vm550_vm1 = vcmask 1041408   ;;  %v3145_v13 = vld [vmem:[%s5081_s6] sm:$0xff]   ;;  %v3521_v14 = vmov 0.0   ;;  %s2979_s15 = sshll.u32 %s3850_s7, 1 }
  0xe0   : > { %3488 = vsyncadd (%p5123_p13), [#allocation12], 4294967280  ;;  %p521_p5 = scmp.lt.s32.totalorder %s2980_s23, 3  ;;  %3019 = vmatprep.subr.bf16.mxu0 %v3521_v14  ;;  %vm3522_vm2 = vmmov 0   ;;  %3025 = vmatprep.subr.bf16.mxu1 %v3521_v14  ;;  %v3523_v17 = vmov 1983009808  }
  0xe1   : > { %v3881_v1 = vshrl.u32 %v539_v0, 7  ;;  %3021 = vmatprep.mubr.msk.bf16.mxu0 %vm3522_vm2, %v3521_v14  ;;  %3020 = vmatpush3.bf16.xpose.msra.mxu0 %v3145_v13  ;;  %v578_v18 = vunpack.c.l.s4 %v3523_v17  ;;  %v532_v20 = vld [vmem:[#allocation7] sm:$0x1]  ;;  %v3524_v21 = vmov 269488144   ;;  %vm2745_vm5 = vcmask 122880  }
  0xe2   : > { %s5134_s23 = smov (!%p521_p5, %s2980_s23), 3  ;;  %3027 = vmatprep.mubr.msk.bf16.mxu1 %vm3522_vm2, %v3521_v14  ;;  %3031 = vmatprep.subr.bf16.mxu0 %v3521_v14  ;;  %v560_v22 = vunpack.c.l.s4 %v3524_v21  ;;  %v571_v23 = vunpack.c.l.bf16 %v532_v20  ;;  %v593_v45 = vld [vmem:[#allocation11] sm:$0x1]  ;;  %v3525_v58 = vmov 1966171168   ;;  %vm829_vm6 = vcmask 130048  }
  0xe3   : > { %s523_s10 = scalar_lea.vmem %s5075_s0, %s5134_s23  ;;  %v3887_v2 = vsub.s32 0, %v3881_v1  ;;  %v579_v24 = vunpack.c.0.s8 %v578_v18  ;;  %v594_v46 = vunpack.c.l.bf16 %v593_v45  ;;  %v773_v59 = vunpack.c.l.s4 %v3525_v58  ;;  %s3924_s29 = scalar_lea.vmem [#allocation14], %s2979_s15 }
  0xe4   : > { %v530_v3 = vld [vmem:[%s523_s10] sm:$0x1]  ;;  %v531_v4 = vld [vmem:[%s523_s10 + $0x1] sm:$0x1]  ;;  %v561_v25 = vunpack.c.0.s8 %v560_v22  ;;  %vm818_vm7 = vcmp.eq.s32.totalorder %v3881_v1, 0  ;;  %vm935_vm10 = vcmp.eq.s32.totalorder %v3881_v1, 1 }
  0xe5   : > { %v533_v5 = vunpack.c.l.bf16 %v530_v3  ;;  %v534_v6 = vunpack.c.l.bf16 %v531_v4  ;;  %v575_v26 = vrot.slane %v571_v23, %v3887_v2  ;;  %v582_v27 = vsub.s32 %v579_v24, %v3881_v1  ;;  %v3001_v24 = vld [vmem:[%s442_s22] sm:$0xff]   ;;  %s2999_s5 = sshll.u32 %s3613_s21, 5  ;;  %s2754_s10 = scalar_lea.sflag [#allocation15], %s3850_s7 }
  0xe6   : > { %v564_v28 = vsub.s32 %v561_v25, %v3881_v1  ;;  %v598_v47 = vrot.slane %v594_v46, %v3887_v2  ;;  %v774_v61 = vunpack.c.0.s8 %v773_v59  ;;  %v3905_v3 = vand.u32 127, %v539_v0  ;;  %s4994_s16 = scalar_lea.hbm %s5086_s11, %s2999_s5  ;;  %s3526_s17 = smov [#allocation14]  }
  0xe7   : > { %v535_v7 = vmul.f32 %v533_v5, %v533_v5  ;;  %v536_v8 = vmul.f32 %v534_v6, %v534_v6  ;;  %v583_v29 = vrot.slane %v575_v26, %v582_v27  ;;  %v3940_v25 = vunpack.c.h.bf16 %v3001_v24  ;;  %s3401_s15 = sshll.u32 %s3526_s17, 4  ;;  %s3402_s15 = int_to_ptr.vmem [resolvable:$false] %s3401_s15 }
  0xe8   : > { %v777_v62 = vsub.s32 %v774_v61, %v3881_v1  ;;  %vm769_vm3 = vcmp.eq.s32.totalorder %v3881_v1, %v3905_v3  ;;  %vm817_vm4 = vcmp.eq.s32.totalorder %v3905_v3, 0  ;;  %v3942_v26 = vunpack.c.l.bf16 %v3001_v24  ;;  %s3403_s4 = scalar_lea.vmem %s3402_s15, 64 }
  0xe9   : > { %v542_v9 = vrot.slane %v535_v7, %v3887_v2  ;;  %v546_v10 = vrot.slane %v536_v8, %v3887_v2  ;;  %v584_v34 = vrot.slane %v583_v29, 1  ;;  %v660_v27 = vmul.f32 %v3940_v25, %v3940_v25 }
  0xea   : > { %vm934_vm9 = vcmp.eq.s32.totalorder %v3905_v3, 1  ;;  %vm1050_vm11 = vcmp.eq.s32.totalorder %v3905_v3, 2  ;;  %vm1051_vm12 = vcmp.eq.s32.totalorder %v3881_v1, 2  ;;  %vm1166_vm13 = vcmp.eq.s32.totalorder %v3905_v3, 3 }
  0xeb   : > { %v548_v11 = vsel %vm547_vm0, %v546_v10, %v542_v9  ;;  %v767_v10 = vld [vmem:[%s5084_s9] sm:$0xff]  ;;  %vm1167_vm14 = vcmp.eq.s32.totalorder %v3881_v1, 3  ;;  %vm1282_vm15 = vcmp.eq.s32.totalorder %v3905_v3, 4 }
  0xec   : > { %v551_v12 = vsel %vm550_vm1, %v548_v11, 0.0  ;;  %vm1398_vm1 = vcmp.eq.s32.totalorder %v3905_v3, 5 }
  0xed   : > { %552 = vadd.xlane.f32.xlu0 %v551_v12 }
 0x17a   : > { %v553_v15 = vpop.xlane.xlu0 %552 }
 0x17b   : > { %v555_v16 = vmul.f32 0.0078125, %v553_v15 }
 0x17d   : > { %v556_v19 = vadd.f32 1e-05, %v555_v16 }
 0x17f   : > { %3147 = vrsqrt.f32 %v556_v19 }
 0x189   : > { %v3148_v30 = vpop.eup %3147 }
 0x18a   : > { %v565_v31 = vrot.slane %v3148_v30, %v564_v28  ;;  %v659_v28 = vmul.f32 %v3942_v26, %v3942_v26 }
 0x18c   : > { %v566_v32 = vrot.slane %v565_v31, 1  ;;  %v569_v33 = vmul.f32 %v565_v31, %v533_v5 }
 0x18e   : > { %v570_v35 = vmul.f32 %v566_v32, %v534_v6  ;;  %v587_v36 = vmul.f32 %v583_v29, %v569_v33  ;;  %v3005_v29 = vld [vmem:[%s451_s25] sm:$0xff]   ;;  %s2783_s25 = sshll.u32 %s3924_s29, 4  ;;  %s4996_s25 = int_to_ptr.vmem [resolvable:$true] %s2783_s25 }
 0x18f   : > { %v3950_v30 = vunpack.c.h.bf16 %v3005_v29  ;;  %v3952_v31 = vunpack.c.l.bf16 %v3005_v29  ;;  %s3397_s30 = scalar_lea.vmem %s4996_s25, 32  ;;  %p3404_p6 = scmp.lt.s32.totalorder %s4996_s25, %s3402_s15 }
 0x190   : > { %v588_v37 = vmul.f32 %v584_v34, %v570_v35  ;;  %v589_v38 = vpack.c.bf16 %v587_v36, %v587_v36  ;;  %v3146_v34 = vld [vmem:[%s5083_s8] sm:$0xff]   ;;  %p3398_p9 = scmp.ne.s32.totalorder %s4996_s25, %s3397_s30  ;;  %p3405_p0 = scmp.lt.s32.totalorder %s3403_s4, %s3397_s30 }
 0x191   : > { %v686_v32 = vmul.f32 %v3950_v30, %v3950_v30  ;;  %v685_v33 = vmul.f32 %v3952_v31, %v3952_v31  ;;  %3026 = vmatpush3.bf16.xpose.msra.mxu1 %v3146_v34 }
 0x192   : > { %v590_v39 = vpack.c.bf16 %v588_v37, %v588_v37  ;;  %v601_v41 = vunpack.c.l.b16 %v589_v38  ;;  %p3399_p2 = pnand %p3398_p9, %p3750_p1  ;;  %p3406_p12 = por %p3405_p0, %p3404_p6 }
 0x194   : > { %v602_v40 = vunpack.c.l.b16 %v590_v39  ;;  %p3400_p4 = pneg %p3399_p2 }
 0x196   : > { %v603_v42 = vrot.slane %v602_v40, 7  ;;  %p3407_p11 = pnand %p3406_p12, %p3400_p4 }
 0x198   : > { %v604_v43 = vsel %vm547_vm0, %v603_v42, %v601_v41  ;;  %vm1283_vm0 = vcmp.eq.s32.totalorder %v3881_v1, 4 }
 0x199   : > { %v605_v44 = vpack.c.b16 %v604_v43, %v604_v43 }
 0x19b   : > { %3022 = vmatmul.mubr.bf16.vlgmr.msra.gmra.mrb[0].mxu0 %v605_v44 }
 0x19c   : > { %3033 = vmatprep.mubr.msk.bf16.mxu0 %vm3522_vm2, %v3521_v14  ;;  %3032 = vmatpush3.bf16.msra.mxu0 %v3146_v34  ;;  %vm1399_vm2 = vcmp.eq.s32.totalorder %v3881_v1, 5 }
 0x26e   : > { %v647_v48 = vpop.f32.mrb[0].mxu0 }
 0x26f   : > { %v648_v49 = vadd.f32 %v647_v48, %v598_v47  ;;  %v3023_v50 = vpop.f32.mrb[1].mxu0 }
 0x270   : > { %v650_v51 = vpop.f32.mrb[2].mxu0 }
 0x271   : > { %v653_v52 = vmax.f32 %v648_v49, 0.0  ;;  %v3024_v53 = vpop.f32.mrb[3].mxu0 }
 0x273   : > { %v758_v54 = vadd.f32 1e-06, %v653_v52  ;;  %v2715_v55 = vmul.f32 %v653_v52, %v653_v52 }
 0x275   : > { %v759_v56 = vmul.f32 %v758_v54, %v758_v54  ;;  %v2716_v57 = vmul.f32 0.1, %v2715_v55 }
 0x277   : > { %3149 = vrcp.f32 %v759_v56  ;;  %v2717_v60 = vadd.f32 1.0, %v2716_v57 }
 0x279   : > { %3151 = vrcp.f32 %v2717_v60 }
 0x281   : > { %v3150_v63 = vpop.eup %3149 }
 0x282   : > { %v778_v4 = vrot.slane %v3150_v63, %v777_v62 }
 0x283   : > { %v3152_v5 = vpop.eup %3151 }
 0x284   : > { %v2719_v6 = vmul.f32 %v3152_v5, %v2716_v57  ;;  %v786_v7 = vrot.slane %v778_v4, %v777_v62  ;;  %v779_v8 = vcombine.high %v778_v4, %v778_v4  ;;  %v3967_v5 = vadd.s32 8, %v3881_v1 }
 0x286   : > { %v2727_v9 = vrot.slane %v2719_v6, %v777_v62  ;;  %v3914_v11 = vrot.slane %v786_v7, %v3887_v2  ;;  %v793_v12 = vrot.slane %v779_v8, %v777_v62  ;;  %vm770_vm8 = vcmp.eq.s32.totalorder %v3967_v5, %v3905_v3 }
 0x288   : > { %v2728_v0 = vcombine.high %v2727_v9, %v2727_v9  ;;  %v2735_v13 = vrot.slane %v2727_v9, %v777_v62  ;;  %v808_v14 = vsel %vm769_vm3, %v3914_v11, 0.0  ;;  %v3919_v15 = vrot.slane %v793_v12, %v3887_v2 }
 0x289   : > { %v3921_v16 = vadd.f32 %v808_v14, %v767_v10 }
 0x28a   : > { %v2742_v17 = vrot.slane %v2728_v0, %v777_v62  ;;  %v810_v18 = vsel %vm769_vm3, %v3919_v15, 0.0  ;;  %2746 = vst.msk [vmem:[%s3924_s29] sm:$0x1] %vm2745_vm5, %v2735_v13  ;;  %vm1514_vm3 = vcmp.eq.s32.totalorder %v3905_v3, 6 }
 0x28b   : > { %v823_v19 = vsel %vm817_vm4, %v3921_v16, 0.0  ;;  %v3930_v20 = vadd.f32 %v810_v18, %v767_v10  ;;  %v886_v35 = vsel %vm818_vm7, %v3921_v16, 0.0 }
 0x28c   : > { %v830_v21 = vsel %vm829_vm6, %v823_v19, 0.0  ;;  %2747 = vst.msk [vmem:[%s3924_s29 + $0x1] sm:$0x1] %vm2745_vm5, %v2742_v17  ;;  %v892_v37 = vsel %vm829_vm6, %v886_v35, 0.0  ;;  %vm1630_vm5 = vcmp.eq.s32.totalorder %v3905_v3, 7 }
 0x28d   : > { %831 = vadd.xlane.f32.xlu0 %v830_v21  ;;  %v826_v22 = vsel %vm817_vm4, %v3930_v20, 0.0  ;;  %v889_v36 = vsel %vm818_vm7, %v3930_v20, 0.0  ;;  %v897_v41 = vrot.slane %v892_v37, 4 }
 0x28e   : > { %v839_v23 = vsel %vm829_vm6, %v826_v22, 0.0  ;;  %v903_v40 = vsel %vm829_vm6, %v889_v36, 0.0 }
 0x28f   : > { %840 = vadd.xlane.f32.xlu1 %v839_v23  ;;  %v908_v46 = vrot.slane %v903_v40, 4  ;;  %v898_v48 = vadd.f32 %v897_v41, %v892_v37 }
 0x291   : > { %663 = vadd.xlane.f32.xlu0 %v660_v27  ;;  %v909_v52 = vadd.f32 %v908_v46, %v903_v40  ;;  %v899_v54 = vrot.slane %v898_v48, 2  ;;  %v768_v27 = vld [vmem:[%s5084_s9 + $0x8] sm:$0xff] }
 0x293   : > { %661 = vadd.xlane.f32.xlu1 %v659_v28  ;;  %v910_v58 = vrot.slane %v909_v52, 2  ;;  %v900_v60 = vadd.f32 %v899_v54, %v898_v48  ;;  %v809_v28 = vsel %vm770_vm8, %v3914_v11, 0.0 }
 0x295   : > { %689 = vadd.xlane.f32.xlu0 %v686_v32  ;;  %v911_v62 = vadd.f32 %v910_v58, %v909_v52  ;;  %v901_v63 = vrot.slane %v900_v60, 1 }
 0x297   : > { %687 = vadd.xlane.f32.xlu1 %v685_v33  ;;  %v912_v4 = vrot.slane %v911_v62, 1  ;;  %v902_v6 = vadd.f32 %v901_v63, %v900_v60  ;;  %v811_v33 = vsel %vm770_vm8, %v3919_v15, 0.0  ;;  %vm1746_vm8 = vcmp.eq.s32.totalorder %v3905_v3, 8 }
 0x299   : > { %v913_v0 = vadd.f32 %v912_v4, %v911_v62  ;;  %v3978_v18 = vsel %vm817_vm4, 0.0, %v902_v6 }
 0x29b   : > { %v3988_v32 = vsel %vm817_vm4, 0.0, %v913_v0 }
 0x31a   : > { %v832_v38 = vpop.xlane.xlu0 %831 }
 0x31b   : > { %v854_v39 = vsel %vm818_vm7, %v832_v38, 0.0 }
 0x31c   : > { %v862_v42 = vrot.slane %v854_v39, 4  ;;  %v841_v43 = vpop.xlane.xlu1 %840 }
 0x31d   : > { %v857_v44 = vsel %vm818_vm7, %v841_v43, 0.0  ;;  %vm1631_vm7 = vcmp.eq.s32.totalorder %v3881_v1, 7 }
 0x31e   : > { %v863_v45 = vadd.f32 %v862_v42, %v854_v39  ;;  %v870_v47 = vrot.slane %v857_v44, 4  ;;  %v664_v7 = vpop.xlane.xlu0 %663 }
 0x31f   : > { %v666_v9 = vmul.f32 0.0078125, %v664_v7 }
 0x320   : > { %v864_v49 = vrot.slane %v863_v45, 2  ;;  %v871_v50 = vadd.f32 %v870_v47, %v857_v44  ;;  %v662_v8 = vpop.xlane.xlu1 %661 }
 0x321   : > { %v665_v10 = vmul.f32 0.0078125, %v662_v8  ;;  %v668_v14 = vadd.f32 1e-05, %v666_v9 }
 0x322   : > { %v865_v51 = vadd.f32 %v864_v49, %v863_v45  ;;  %v872_v53 = vrot.slane %v871_v50, 2  ;;  %v690_v21 = vpop.xlane.xlu0 %689 }
 0x323   : > { %v667_v19 = vadd.f32 1e-05, %v665_v10  ;;  %v692_v29 = vmul.f32 0.0078125, %v690_v21 }
 0x324   : > { %v866_v55 = vrot.slane %v865_v51, 1  ;;  %v873_v56 = vadd.f32 %v872_v53, %v871_v50  ;;  %v688_v22 = vpop.xlane.xlu1 %687  ;;  %v656_v50 = vld [vmem:[#allocation8] sm:$0x1] }
 0x325   : > { %v691_v34 = vmul.f32 0.0078125, %v688_v22  ;;  %v694_v37 = vadd.f32 1e-05, %v692_v29  ;;  %v673_v53 = vunpack.c.l.bf16 %v656_v50 }
 0x326   : > { %v867_v57 = vadd.f32 %v866_v55, %v865_v51  ;;  %v874_v59 = vrot.slane %v873_v56, 1  ;;  %v682_v51 = vld [vmem:[#allocation10] sm:$0x1] }
 0x327   : > { %v693_v11 = vadd.f32 1e-05, %v691_v34  ;;  %v699_v54 = vunpack.c.l.bf16 %v682_v51  ;;  %v677_v58 = vrot.slane %v673_v53, %v3887_v2 }
 0x328   : > { %3153 = vrcp.f32 %v867_v57  ;;  %v875_v61 = vadd.f32 %v874_v59, %v873_v56 }
 0x32a   : > { %3155 = vrcp.f32 %v875_v61  ;;  %v703_v61 = vrot.slane %v699_v54, %v3887_v2 }
 0x32b   : > { %3157 = vrsqrt.f32 %v668_v14 }
 0x32c   : > { %3159 = vrsqrt.f32 %v667_v19 }
 0x32d   : > { %3161 = vrsqrt.f32 %v694_v37 }
 0x32e   : > { %3163 = vrsqrt.f32 %v693_v11 }
 0x332   : > { %v3969_v12 = vpop.eup %3153 }
 0x333   : > { %v880_v13 = vmul.f32 %v3969_v12, %v832_v38  ;;  %v3994_v38 = vadd.f32 %v809_v28, %v768_v27 }
 0x334   : > { %v3974_v17 = vpop.eup %3155 }
 0x335   : > { %v916_v23 = vmul.f32 %v3978_v18, %v880_v13  ;;  %v883_v24 = vmul.f32 %v3974_v17, %v841_v43  ;;  %v824_v43 = vsel %vm817_vm4, %v3994_v38, 0.0  ;;  %v3158_v47 = vpop.eup %3157 }
 0x336   : > { %v833_v46 = vsel %vm829_vm6, %v824_v43, 0.0  ;;  %v3160_v49 = vpop.eup %3159  ;;  %v672_v57 = vmul.f32 %v3158_v47, %v3940_v25 }
 0x337   : > { %v922_v35 = vsub.f32 %v3921_v16, %v916_v23  ;;  %v919_v36 = vmul.f32 %v3988_v32, %v883_v24  ;;  %v4004_v16 = vadd.f32 %v811_v33, %v768_v27  ;;  %v3162_v52 = vpop.eup %3161  ;;  %v671_v56 = vmul.f32 %v3160_v49, %v3942_v26 }
 0x338   : > { %v3164_v55 = vpop.eup %3163  ;;  %v698_v60 = vmul.f32 %v3162_v52, %v3950_v30  ;;  %v679_v63 = vmul.f32 %v677_v58, %v672_v57 }
 0x339   : > { %v925_v39 = vsub.f32 %v3930_v20, %v919_v36  ;;  %v3999_v40 = vsel %vm817_vm4, %v880_v13, %v922_v35  ;;  %v827_v45 = vsel %vm817_vm4, %v4004_v16, 0.0  ;;  %v697_v59 = vmul.f32 %v3164_v55, %v3952_v31 }
 0x33a   : > { %v940_v15 = vsel %vm934_vm9, %v3999_v40, 0.0  ;;  %v842_v48 = vsel %vm829_vm6, %v827_v45, 0.0  ;;  %v678_v62 = vmul.f32 %v677_v58, %v671_v56  ;;  %v705_v6 = vmul.f32 %v703_v61, %v698_v60 }
 0x33b   : > { %v946_v41 = vsel %vm829_vm6, %v940_v15, 0.0  ;;  %v4009_v42 = vsel %vm817_vm4, %v883_v24, %v925_v39  ;;  %v704_v4 = vmul.f32 %v703_v61, %v697_v59  ;;  %v1002_v10 = vsel %vm935_vm10, %v3999_v40, 0.0 }
 0x33c   : > { %947 = vadd.xlane.f32.xlu1 %v946_v41  ;;  %v943_v20 = vsel %vm934_vm9, %v4009_v42, 0.0  ;;  %v707_v8 = vsub.f32 %v705_v6, %v679_v63  ;;  %v1005_v0 = vsel %vm935_vm10, %v4009_v42, 0.0  ;;  %v1008_v31 = vsel %vm829_vm6, %v1002_v10, 0.0 }
 0x33d   : > { %v955_v44 = vsel %vm829_vm6, %v943_v20, 0.0  ;;  %v706_v7 = vsub.f32 %v704_v4, %v678_v62  ;;  %v1019_v30 = vsel %vm829_vm6, %v1005_v0, 0.0  ;;  %v1013_v14 = vrot.slane %v1008_v31, 4 }
 0x33e   : > { %956 = vadd.xlane.f32.xlu0 %v955_v44  ;;  %v1024_v23 = vrot.slane %v1019_v30, 4 }
 0x33f   : > { %v708_v9 = vpack.c.bf16 %v707_v8, %v706_v7  ;;  %v1014_v28 = vadd.f32 %v1013_v14, %v1008_v31 }
 0x340   : > { %834 = vadd.xlane.f32.xlu1 %v833_v46  ;;  %v1025_v34 = vadd.f32 %v1024_v23, %v1019_v30 }
 0x341   : > { %3028 = vmatmul.mubr.bf16.vlgmr.msra.gmra.mrb[0].mxu1 %v708_v9  ;;  %v1015_v37 = vrot.slane %v1014_v28, 2 }
 0x342   : > { %843 = vadd.xlane.f32.xlu0 %v842_v48  ;;  %v1026_v41 = vrot.slane %v1025_v34, 2 }
 0x343   : > { %v1016_v43 = vadd.f32 %v1015_v37, %v1014_v28 }
 0x344   : > { %v1027_v45 = vadd.f32 %v1026_v41, %v1025_v34 }
 0x345   : > { %v1017_v47 = vrot.slane %v1016_v43, 1 }
 0x346   : > { %v1028_v50 = vrot.slane %v1027_v45, 1 }
 0x347   : > { %v1018_v52 = vadd.f32 %v1017_v47, %v1016_v43 }
 0x348   : > { %v1029_v55 = vadd.f32 %v1028_v50, %v1027_v45 }
 0x349   : > { %v4045_v59 = vsel %vm934_vm9, 0.0, %v1018_v52 }
 0x34a   : > { %v4052_v63 = vsel %vm934_vm9, 0.0, %v1029_v55 }
 0x3c9   : > { %v948_v13 = vpop.xlane.xlu1 %947 }
 0x3ca   : > { %v970_v2 = vsel %vm935_vm10, %v948_v13, 0.0 }
 0x3cb   : > { %v978_v19 = vrot.slane %v970_v2, 4  ;;  %v957_v21 = vpop.xlane.xlu0 %956 }
 0x3cc   : > { %v973_v22 = vsel %vm935_vm10, %v957_v21, 0.0  ;;  %vm1862_vm10 = vcmp.eq.s32.totalorder %v3905_v3, 9 }
 0x3cd   : > { %v979_v24 = vadd.f32 %v978_v19, %v970_v2  ;;  %v986_v27 = vrot.slane %v973_v22, 4  ;;  %v835_v46 = vpop.xlane.xlu1 %834 }
 0x3ce   : > { %v881_v49 = vmul.f32 %v3969_v12, %v835_v46 }
 0x3cf   : > { %v980_v29 = vrot.slane %v979_v24, 2  ;;  %v987_v33 = vadd.f32 %v986_v27, %v973_v22  ;;  %v844_v48 = vpop.xlane.xlu0 %843 }
 0x3d0   : > { %v884_v51 = vmul.f32 %v3974_v17, %v844_v48  ;;  %v917_v53 = vmul.f32 %v3978_v18, %v881_v49 }
 0x3d1   : > { %v981_v35 = vadd.f32 %v980_v29, %v979_v24  ;;  %v988_v36 = vrot.slane %v987_v33, 2 }
 0x3d2   : > { %v920_v57 = vmul.f32 %v3988_v32, %v884_v51  ;;  %v923_v62 = vsub.f32 %v3994_v38, %v917_v53 }
 0x3d3   : > { %v982_v11 = vrot.slane %v981_v35, 1  ;;  %v989_v39 = vadd.f32 %v988_v36, %v987_v33 }
 0x3d4   : > { %v926_v7 = vsub.f32 %v4004_v16, %v920_v57  ;;  %v4065_v38 = vsel %vm817_vm4, %v881_v49, %v923_v62 }
 0x3d5   : > { %v983_v15 = vadd.f32 %v982_v11, %v981_v35  ;;  %v990_v20 = vrot.slane %v989_v39, 1  ;;  %v941_v31 = vsel %vm934_vm9, %v4065_v38, 0.0 }
 0x3d6   : > { %v949_v2 = vsel %vm829_vm6, %v941_v31, 0.0 }
 0x3d7   : > { %3165 = vrcp.f32 %v983_v15  ;;  %v991_v44 = vadd.f32 %v990_v20, %v989_v39 }
 0x3d9   : > { %3167 = vrcp.f32 %v991_v44 }
 0x3e1   : > { %v4037_v54 = vpop.eup %3165 }
 0x3e2   : > { %v996_v56 = vmul.f32 %v4037_v54, %v948_v13 }
 0x3e3   : > { %v4041_v58 = vpop.eup %3167 }
 0x3e4   : > { %v1032_v60 = vmul.f32 %v4045_v59, %v996_v56  ;;  %v999_v61 = vmul.f32 %v4041_v58, %v957_v21 }
 0x3e6   : > { %v1038_v4 = vsub.f32 %v3999_v40, %v1032_v60  ;;  %v1035_v6 = vmul.f32 %v4052_v63, %v999_v61 }
 0x3e8   : > { %v1041_v8 = vsub.f32 %v4009_v42, %v1035_v6  ;;  %v4061_v9 = vsel %vm934_vm9, %v996_v56, %v1038_v4  ;;  %v4077_v42 = vsel %vm817_vm4, %v884_v51, %v926_v7 }
 0x3e9   : > { %v1056_v40 = vsel %vm1050_vm11, %v4061_v9, 0.0  ;;  %v944_v30 = vsel %vm934_vm9, %v4077_v42, 0.0  ;;  %v1118_v24 = vsel %vm1051_vm12, %v4061_v9, 0.0 }
 0x3ea   : > { %v1062_v10 = vsel %vm829_vm6, %v1056_v40, 0.0  ;;  %v4073_v16 = vsel %vm934_vm9, %v999_v61, %v1041_v8  ;;  %v958_v14 = vsel %vm829_vm6, %v944_v30, 0.0  ;;  %v1124_v28 = vsel %vm829_vm6, %v1118_v24, 0.0 }
 0x3eb   : > { %1063 = vadd.xlane.f32.xlu1 %v1062_v10  ;;  %v1059_v0 = vsel %vm1050_vm11, %v4073_v16, 0.0  ;;  %v1121_v27 = vsel %vm1051_vm12, %v4073_v16, 0.0  ;;  %v1129_v35 = vrot.slane %v1124_v28, 4 }
 0x3ec   : > { %v1071_v13 = vsel %vm829_vm6, %v1059_v0, 0.0  ;;  %v1135_v33 = vsel %vm829_vm6, %v1121_v27, 0.0 }
 0x3ed   : > { %1072 = vadd.xlane.f32.xlu0 %v1071_v13  ;;  %v1140_v39 = vrot.slane %v1135_v33, 4  ;;  %v1130_v20 = vadd.f32 %v1129_v35, %v1124_v28 }
 0x3ef   : > { %950 = vadd.xlane.f32.xlu1 %v949_v2  ;;  %v1141_v45 = vadd.f32 %v1140_v39, %v1135_v33  ;;  %v1131_v48 = vrot.slane %v1130_v20, 2 }
 0x3f1   : > { %959 = vadd.xlane.f32.xlu0 %v958_v14  ;;  %v1142_v52 = vrot.slane %v1141_v45, 2  ;;  %v1132_v55 = vadd.f32 %v1131_v48, %v1130_v20 }
 0x3f3   : > { %v1143_v57 = vadd.f32 %v1142_v52, %v1141_v45  ;;  %v1133_v61 = vrot.slane %v1132_v55, 1 }
 0x3f5   : > { %v1144_v6 = vrot.slane %v1143_v57, 1  ;;  %v1134_v8 = vadd.f32 %v1133_v61, %v1132_v55 }
 0x3f7   : > { %v1145_v0 = vadd.f32 %v1144_v6, %v1143_v57  ;;  %v4111_v2 = vsel %vm1050_vm11, 0.0, %v1134_v8 }
 0x3f9   : > { %v4118_v24 = vsel %vm1050_vm11, 0.0, %v1145_v0 }
 0x414   : > { %v4091_v19 = vpop.f32.mrb[0].mxu1 }
 0x415   : > { %v3029_v21 = vpop.f32.mrb[1].mxu1 }
 0x416   : > { %v4093_v22 = vpop.f32.mrb[2].mxu1 }
 0x417   : > { %v3030_v23 = vpop.f32.mrb[3].mxu1  ;;  %v828_v20 = vsel %vm817_vm4, %v4093_v22, 0.0 }
 0x418   : > { %v845_v45 = vsel %vm829_vm6, %v828_v20, 0.0 }
 0x478   : > { %v1064_v29 = vpop.xlane.xlu1 %1063 }
 0x479   : > { %v1086_v34 = vsel %vm1051_vm12, %v1064_v29, 0.0 }
 0x47a   : > { %v1094_v36 = vrot.slane %v1086_v34, 4  ;;  %v1073_v37 = vpop.xlane.xlu0 %1072 }
 0x47b   : > { %v1089_v11 = vsel %vm1051_vm12, %v1073_v37, 0.0  ;;  %vm1978_vm12 = vcmp.eq.s32.totalorder %v3905_v3, 10 }
 0x47c   : > { %v1095_v15 = vadd.f32 %v1094_v36, %v1086_v34  ;;  %v1102_v41 = vrot.slane %v1089_v11, 4  ;;  %v951_v60 = vpop.xlane.xlu1 %950 }
 0x47d   : > { %v997_v4 = vmul.f32 %v4037_v54, %v951_v60 }
 0x47e   : > { %v1096_v43 = vrot.slane %v1095_v15, 2  ;;  %v1103_v44 = vadd.f32 %v1102_v41, %v1089_v11  ;;  %v960_v62 = vpop.xlane.xlu0 %959 }
 0x47f   : > { %v1000_v7 = vmul.f32 %v4041_v58, %v960_v62  ;;  %v1033_v40 = vmul.f32 %v4045_v59, %v997_v4 }
 0x480   : > { %v1097_v46 = vadd.f32 %v1096_v43, %v1095_v15  ;;  %v1104_v47 = vrot.slane %v1103_v44, 2  ;;  %v825_v15 = vsel %vm817_vm4, %v4091_v19, 0.0 }
 0x481   : > { %v1036_v13 = vmul.f32 %v4052_v63, %v1000_v7  ;;  %v1039_v23 = vsub.f32 %v4065_v38, %v1033_v40 }
 0x482   : > { %v1098_v49 = vrot.slane %v1097_v46, 1  ;;  %v1105_v50 = vadd.f32 %v1104_v47, %v1103_v44  ;;  %v836_v44 = vsel %vm829_vm6, %v825_v15, 0.0 }
 0x483   : > { %v4131_v38 = vsel %vm934_vm9, %v997_v4, %v1039_v23 }
 0x484   : > { %v1099_v51 = vadd.f32 %v1098_v49, %v1097_v46  ;;  %v1106_v53 = vrot.slane %v1105_v50, 1 }
 0x486   : > { %3169 = vrcp.f32 %v1099_v51  ;;  %v1107_v56 = vadd.f32 %v1106_v53, %v1105_v50 }
 0x488   : > { %3171 = vrcp.f32 %v1107_v56 }
 0x490   : > { %v4103_v10 = vpop.eup %3169 }
 0x491   : > { %v1112_v31 = vmul.f32 %v4103_v10, %v1064_v29  ;;  %v1042_v29 = vsub.f32 %v4077_v42, %v1036_v13 }
 0x492   : > { %v4107_v30 = vpop.eup %3171 }
 0x493   : > { %v1148_v14 = vmul.f32 %v4111_v2, %v1112_v31  ;;  %v1115_v21 = vmul.f32 %v4107_v30, %v1073_v37  ;;  %v1057_v37 = vsel %vm1050_vm11, %v4131_v38, 0.0 }
 0x494   : > { %v1065_v41 = vsel %vm829_vm6, %v1057_v37, 0.0 }
 0x495   : > { %v1154_v27 = vsub.f32 %v4061_v9, %v1148_v14  ;;  %v1151_v28 = vmul.f32 %v4118_v24, %v1115_v21 }
 0x497   : > { %v1157_v33 = vsub.f32 %v4073_v16, %v1151_v28  ;;  %v4127_v34 = vsel %vm1050_vm11, %v1112_v31, %v1154_v27  ;;  %v4143_v16 = vsel %vm934_vm9, %v1000_v7, %v1042_v29 }
 0x498   : > { %v1172_v9 = vsel %vm1166_vm13, %v4127_v34, 0.0  ;;  %v1060_v39 = vsel %vm1050_vm11, %v4143_v16, 0.0  ;;  %v1234_v46 = vsel %vm1167_vm14, %v4127_v34, 0.0 }
 0x499   : > { %v1178_v35 = vsel %vm829_vm6, %v1172_v9, 0.0  ;;  %v4139_v42 = vsel %vm1050_vm11, %v1115_v21, %v1157_v33  ;;  %v1074_v43 = vsel %vm829_vm6, %v1060_v39, 0.0  ;;  %v1240_v48 = vsel %vm829_vm6, %v1234_v46, 0.0 }
 0x49a   : > { %1179 = vadd.xlane.f32.xlu1 %v1178_v35  ;;  %v1175_v36 = vsel %vm1166_vm13, %v4139_v42, 0.0  ;;  %v1237_v47 = vsel %vm1167_vm14, %v4139_v42, 0.0  ;;  %v1245_v52 = vrot.slane %v1240_v48, 4 }
 0x49b   : > { %v1187_v11 = vsel %vm829_vm6, %v1175_v36, 0.0  ;;  %v1251_v50 = vsel %vm829_vm6, %v1237_v47, 0.0 }
 0x49c   : > { %1188 = vadd.xlane.f32.xlu0 %v1187_v11  ;;  %v1256_v57 = vrot.slane %v1251_v50, 4  ;;  %v1246_v62 = vadd.f32 %v1245_v52, %v1240_v48 }
 0x49e   : > { %1066 = vadd.xlane.f32.xlu1 %v1065_v41  ;;  %v1257_v7 = vadd.f32 %v1256_v57, %v1251_v50  ;;  %v1247_v0 = vrot.slane %v1246_v62, 2 }
 0x4a0   : > { %1075 = vadd.xlane.f32.xlu0 %v1074_v43  ;;  %v1258_v21 = vrot.slane %v1257_v7, 2  ;;  %v1248_v27 = vadd.f32 %v1247_v0, %v1246_v62 }
 0x4a2   : > { %837 = vadd.xlane.f32.xlu1 %v836_v44  ;;  %v1259_v33 = vadd.f32 %v1258_v21, %v1257_v7  ;;  %v1249_v35 = vrot.slane %v1248_v27, 1 }
 0x4a4   : > { %846 = vadd.xlane.f32.xlu0 %v845_v45  ;;  %v1260_v37 = vrot.slane %v1259_v33, 1  ;;  %v1250_v15 = vadd.f32 %v1249_v35, %v1248_v27 }
 0x4a6   : > { %v1261_v45 = vadd.f32 %v1260_v37, %v1259_v33 }
 0x527   : > { %v1180_v49 = vpop.xlane.xlu1 %1179 }
 0x528   : > { %v1202_v51 = vsel %vm1167_vm14, %v1180_v49, 0.0 }
 0x529   : > { %v1210_v53 = vrot.slane %v1202_v51, 4  ;;  %v1189_v55 = vpop.xlane.xlu0 %1188 }
 0x52a   : > { %v1205_v56 = vsel %vm1167_vm14, %v1189_v55, 0.0  ;;  %vm2094_vm14 = vcmp.eq.s32.totalorder %v3905_v3, 11 }
 0x52b   : > { %v1211_v60 = vadd.f32 %v1210_v53, %v1202_v51  ;;  %v1218_v61 = vrot.slane %v1205_v56, 4  ;;  %v1067_v29 = vpop.xlane.xlu1 %1066  ;;  %v4183_v51 = vsel %vm1166_vm13, 0.0, %v1250_v15 }
 0x52c   : > { %v1113_v36 = vmul.f32 %v4103_v10, %v1067_v29 }
 0x52d   : > { %v1212_v4 = vrot.slane %v1211_v60, 2  ;;  %v1219_v6 = vadd.f32 %v1218_v61, %v1205_v56  ;;  %v1076_v9 = vpop.xlane.xlu0 %1075 }
 0x52e   : > { %v1116_v39 = vmul.f32 %v4107_v30, %v1076_v9  ;;  %v1149_v20 = vmul.f32 %v4111_v2, %v1113_v36 }
 0x52f   : > { %v1213_v8 = vadd.f32 %v1212_v4, %v1211_v60  ;;  %v1220_v40 = vrot.slane %v1219_v6, 2  ;;  %v838_v11 = vpop.xlane.xlu1 %837 }
 0x530   : > { %v882_v43 = vmul.f32 %v3969_v12, %v838_v11  ;;  %v1152_v47 = vmul.f32 %v4118_v24, %v1116_v39  ;;  %v1155_v12 = vsub.f32 %v4131_v38, %v1149_v20 }
 0x531   : > { %v1214_v31 = vrot.slane %v1213_v8, 1  ;;  %v1221_v13 = vadd.f32 %v1220_v40, %v1219_v6  ;;  %v847_v41 = vpop.xlane.xlu0 %846 }
 0x532   : > { %v885_v48 = vmul.f32 %v3974_v17, %v847_v41  ;;  %v918_v56 = vmul.f32 %v3978_v18, %v882_v43  ;;  %v1158_v60 = vsub.f32 %v4143_v16, %v1152_v47  ;;  %v1161_v62 = vsel %vm1050_vm11, %v1113_v36, %v1155_v12 }
 0x533   : > { %v1215_v14 = vadd.f32 %v1214_v31, %v1213_v8  ;;  %v1222_v23 = vrot.slane %v1221_v13, 1  ;;  %v1173_v6 = vsel %vm1166_vm13, %v1161_v62, 0.0 }
 0x534   : > { %v921_v61 = vmul.f32 %v3988_v32, %v885_v48  ;;  %v924_v38 = vsub.f32 %v4091_v19, %v918_v56  ;;  %v1164_v19 = vsel %vm1050_vm11, %v1116_v39, %v1158_v60  ;;  %v1181_v40 = vsel %vm829_vm6, %v1173_v6, 0.0 }
 0x535   : > { %3173 = vrcp.f32 %v1215_v14  ;;  %v1223_v28 = vadd.f32 %v1222_v23, %v1221_v13  ;;  %v1176_v8 = vsel %vm1166_vm13, %v1164_v19, 0.0 }
 0x536   : > { %v927_v4 = vsub.f32 %v4093_v22, %v921_v61  ;;  %v4225_v22 = vsel %vm817_vm4, %v882_v43, %v924_v38  ;;  %v1190_v13 = vsel %vm829_vm6, %v1176_v8, 0.0 }
 0x537   : > { %3175 = vrcp.f32 %v1223_v28  ;;  %v942_v31 = vsel %vm934_vm9, %v4225_v22, 0.0 }
 0x538   : > { %v4232_v0 = vsel %vm817_vm4, %v885_v48, %v927_v4  ;;  %v952_v21 = vsel %vm829_vm6, %v942_v31, 0.0  ;;  %vm1515_vm4 = vcmp.eq.s32.totalorder %v3881_v1, 6 }
 0x539   : > { %v945_v14 = vsel %vm934_vm9, %v4232_v0, 0.0 }
 0x53a   : > { %v961_v23 = vsel %vm829_vm6, %v945_v14, 0.0 }
 0x53f   : > { %v4174_v44 = vpop.eup %3173 }
 0x540   : > { %v1228_v46 = vmul.f32 %v4174_v44, %v1180_v49  ;;  %v4191_v49 = vsel %vm1166_vm13, 0.0, %v1261_v45 }
 0x541   : > { %v4179_v50 = vpop.eup %3175 }
 0x542   : > { %v1264_v52 = vmul.f32 %v4183_v51, %v1228_v46  ;;  %v1231_v53 = vmul.f32 %v4179_v50, %v1189_v55 }
 0x544   : > { %v1270_v17 = vsub.f32 %v4127_v34, %v1264_v52  ;;  %v1267_v57 = vmul.f32 %v4191_v49, %v1231_v53 }
 0x546   : > { %v1273_v55 = vsub.f32 %v4139_v42, %v1267_v57  ;;  %v4202_v18 = vsel %vm1166_vm13, %v1228_v46, %v1270_v17 }
 0x547   : > { %v1288_v34 = vsel %vm1282_vm15, %v4202_v18, 0.0  ;;  %v1350_v27 = vsel %vm1283_vm0, %v4202_v18, 0.0 }
 0x548   : > { %v1294_v16 = vsel %vm829_vm6, %v1288_v34, 0.0  ;;  %v4213_v32 = vsel %vm1166_vm13, %v1231_v53, %v1273_v55  ;;  %v1356_v29 = vsel %vm829_vm6, %v1350_v27, 0.0 }
 0x549   : > { %1295 = vadd.xlane.f32.xlu1 %v1294_v16  ;;  %v1291_v42 = vsel %vm1282_vm15, %v4213_v32, 0.0  ;;  %v1353_v28 = vsel %vm1283_vm0, %v4213_v32, 0.0  ;;  %v1361_v36 = vrot.slane %v1356_v29, 4 }
 0x54a   : > { %v1303_v7 = vsel %vm829_vm6, %v1291_v42, 0.0  ;;  %v1367_v9 = vsel %vm829_vm6, %v1353_v28, 0.0 }
 0x54b   : > { %1304 = vadd.xlane.f32.xlu0 %v1303_v7  ;;  %v1372_v15 = vrot.slane %v1367_v9, 4  ;;  %v1362_v46 = vadd.f32 %v1361_v36, %v1356_v29 }
 0x54d   : > { %1182 = vadd.xlane.f32.xlu1 %v1181_v40  ;;  %v1373_v56 = vadd.f32 %v1372_v15, %v1367_v9  ;;  %v1363_v55 = vrot.slane %v1362_v46, 2 }
 0x54f   : > { %1191 = vadd.xlane.f32.xlu0 %v1190_v13  ;;  %v1374_v6 = vrot.slane %v1373_v56, 2  ;;  %v1364_v31 = vadd.f32 %v1363_v55, %v1362_v46 }
 0x551   : > { %953 = vadd.xlane.f32.xlu1 %v952_v21  ;;  %v1375_v21 = vadd.f32 %v1374_v6, %v1373_v56  ;;  %v1365_v27 = vrot.slane %v1364_v31, 1 }
 0x553   : > { %962 = vadd.xlane.f32.xlu0 %v961_v23  ;;  %v1376_v9 = vrot.slane %v1375_v21, 1  ;;  %v1366_v36 = vadd.f32 %v1365_v27, %v1364_v31 }
 0x555   : > { %v1377_v15 = vadd.f32 %v1376_v9, %v1375_v21 }
 0x5d6   : > { %v1296_v33 = vpop.xlane.xlu1 %1295 }
 0x5d7   : > { %v1318_v35 = vsel %vm1283_vm0, %v1296_v33, 0.0 }
 0x5d8   : > { %v1326_v37 = vrot.slane %v1318_v35, 4  ;;  %v1305_v11 = vpop.xlane.xlu0 %1304 }
 0x5d9   : > { %v1321_v39 = vsel %vm1283_vm0, %v1305_v11, 0.0  ;;  %vm2210_vm0 = vcmp.eq.s32.totalorder %v3905_v3, 12 }
 0x5da   : > { %v1327_v41 = vadd.f32 %v1326_v37, %v1318_v35  ;;  %v1334_v20 = vrot.slane %v1321_v39, 4  ;;  %v1183_v43 = vpop.xlane.xlu1 %1182 }
 0x5db   : > { %v1229_v45 = vmul.f32 %v4174_v44, %v1183_v43 }
 0x5dc   : > { %v1328_v47 = vrot.slane %v1327_v41, 2  ;;  %v1335_v48 = vadd.f32 %v1334_v20, %v1321_v39  ;;  %v1192_v52 = vpop.xlane.xlu0 %1191 }
 0x5dd   : > { %v1265_v53 = vmul.f32 %v4183_v51, %v1229_v45  ;;  %v1232_v12 = vmul.f32 %v4179_v50, %v1192_v52 }
 0x5de   : > { %v1329_v17 = vadd.f32 %v1328_v47, %v1327_v41  ;;  %v1336_v57 = vrot.slane %v1335_v48, 2  ;;  %v954_v23 = vpop.xlane.xlu1 %953 }
 0x5df   : > { %v1271_v60 = vsub.f32 %v1161_v62, %v1265_v53  ;;  %v1268_v61 = vmul.f32 %v4191_v49, %v1232_v12  ;;  %v998_v29 = vmul.f32 %v4037_v54, %v954_v23 }
 0x5e0   : > { %v1330_v38 = vrot.slane %v1329_v17, 1  ;;  %v1337_v34 = vadd.f32 %v1336_v57, %v1335_v48  ;;  %v963_v28 = vpop.xlane.xlu0 %962 }
 0x5e1   : > { %v1274_v4 = vsub.f32 %v1164_v19, %v1268_v61  ;;  %v4254_v16 = vsel %vm1166_vm13, %v1229_v45, %v1271_v60  ;;  %v1001_v35 = vmul.f32 %v4041_v58, %v963_v28  ;;  %v1034_v37 = vmul.f32 %v4045_v59, %v998_v29 }
 0x5e2   : > { %v1331_v42 = vadd.f32 %v1330_v38, %v1329_v17  ;;  %v1338_v7 = vrot.slane %v1337_v34, 1  ;;  %v1289_v8 = vsel %vm1282_vm15, %v4254_v16, 0.0  ;;  %v4276_v45 = vsel %vm1282_vm15, 0.0, %v1366_v36 }
 0x5e3   : > { %v1297_v40 = vsel %vm829_vm6, %v1289_v8, 0.0  ;;  %v1280_v62 = vsel %vm1166_vm13, %v1232_v12, %v1274_v4  ;;  %v1037_v20 = vmul.f32 %v4052_v63, %v1001_v35  ;;  %v1040_v46 = vsub.f32 %v4225_v22, %v1034_v37 }
 0x5e4   : > { %3177 = vrcp.f32 %v1331_v42  ;;  %v1339_v13 = vadd.f32 %v1338_v7, %v1337_v34  ;;  %1298 = vadd.xlane.f32.xlu1 %v1297_v40  ;;  %v1292_v19 = vsel %vm1282_vm15, %v1280_v62, 0.0  ;;  %v4283_v59 = vsel %vm1282_vm15, 0.0, %v1377_v15 }
 0x5e5   : > { %v1306_v14 = vsel %vm829_vm6, %v1292_v19, 0.0  ;;  %v1043_v47 = vsub.f32 %v4232_v0, %v1037_v20  ;;  %v4296_v22 = vsel %vm934_vm9, %v998_v29, %v1040_v46 }
 0x5e6   : > { %3179 = vrcp.f32 %v1339_v13  ;;  %1307 = vadd.xlane.f32.xlu0 %v1306_v14  ;;  %v1058_v12 = vsel %vm1050_vm11, %v4296_v22, 0.0 }
 0x5e7   : > { %v1068_v57 = vsel %vm829_vm6, %v1058_v12, 0.0 }
 0x5ee   : > { %v4268_v39 = vpop.eup %3177 }
 0x5ef   : > { %v1344_v41 = vmul.f32 %v4268_v39, %v1296_v33 }
 0x5f0   : > { %v4272_v43 = vpop.eup %3179 }
 0x5f1   : > { %v1380_v54 = vmul.f32 %v4276_v45, %v1344_v41  ;;  %v1347_v58 = vmul.f32 %v4272_v43, %v1305_v11 }
 0x5f3   : > { %v1386_v33 = vsub.f32 %v4202_v18, %v1380_v54  ;;  %v1383_v63 = vmul.f32 %v4283_v59, %v1347_v58 }
 0x5f5   : > { %v1389_v48 = vsub.f32 %v4213_v32, %v1383_v63  ;;  %v4292_v52 = vsel %vm1282_vm15, %v1344_v41, %v1386_v33  ;;  %v4308_v32 = vsel %vm934_vm9, %v1001_v35, %v1043_v47  ;;  %vm1748_vm9 = vcmp.eq.s32.totalorder %v3967_v5, 8 }
 0x5f6   : > { %v1404_v18 = vsel %vm1398_vm1, %v4292_v52, 0.0  ;;  %v1061_v17 = vsel %vm1050_vm11, %v4308_v32, 0.0  ;;  %v1466_v19 = vsel %vm1399_vm2, %v4292_v52, 0.0 }
 0x5f7   : > { %v1410_v11 = vsel %vm829_vm6, %v1404_v18, 0.0  ;;  %v4304_v0 = vsel %vm1282_vm15, %v1347_v58, %v1389_v48  ;;  %v1077_v60 = vsel %vm829_vm6, %v1061_v17, 0.0  ;;  %v1472_v21 = vsel %vm829_vm6, %v1466_v19, 0.0 }
 0x5f8   : > { %1411 = vadd.xlane.f32.xlu1 %v1410_v11  ;;  %v1407_v53 = vsel %vm1398_vm1, %v4304_v0, 0.0  ;;  %v1469_v14 = vsel %vm1399_vm2, %v4304_v0, 0.0  ;;  %v1477_v29 = vrot.slane %v1472_v21, 4 }
 0x5f9   : > { %v1419_v56 = vsel %vm829_vm6, %v1407_v53, 0.0  ;;  %v1483_v27 = vsel %vm829_vm6, %v1469_v14, 0.0 }
 0x5fa   : > { %1420 = vadd.xlane.f32.xlu0 %v1419_v56  ;;  %v1488_v37 = vrot.slane %v1483_v27, 4  ;;  %v1478_v58 = vadd.f32 %v1477_v29, %v1472_v21 }
 0x5fc   : > { %1069 = vadd.xlane.f32.xlu1 %v1068_v57  ;;  %v1489_v18 = vadd.f32 %v1488_v37, %v1483_v27  ;;  %v1479_v17 = vrot.slane %v1478_v58, 2 }
 0x5fe   : > { %1078 = vadd.xlane.f32.xlu0 %v1077_v60 }
 0x671   : > { %v1299_v61 = vpop.xlane.xlu1 %1298 }
 0x672   : > { %v1345_v55 = vmul.f32 %v4268_v39, %v1299_v61 }
 0x673   : > { %v1308_v38 = vpop.xlane.xlu0 %1307 }
 0x674   : > { %v1381_v34 = vmul.f32 %v4276_v45, %v1345_v55  ;;  %v1348_v4 = vmul.f32 %v4272_v43, %v1308_v38 }
 0x676   : > { %v1387_v42 = vsub.f32 %v4254_v16, %v1381_v34  ;;  %v1384_v6 = vmul.f32 %v4283_v59, %v1348_v4  ;;  %v1480_v34 = vadd.f32 %v1479_v17, %v1478_v58 }
 0x678   : > { %v1390_v7 = vsub.f32 %v1280_v62, %v1384_v6  ;;  %v4329_v8 = vsel %vm1282_vm15, %v1345_v55, %v1387_v42 }
 0x679   : > { %v1405_v40 = vsel %vm1398_vm1, %v4329_v8, 0.0 }
 0x67a   : > { %v1413_v31 = vsel %vm829_vm6, %v1405_v40, 0.0  ;;  %v4337_v13 = vsel %vm1282_vm15, %v1348_v4, %v1390_v7  ;;  %v1481_v7 = vrot.slane %v1480_v34, 1 }
 0x67b   : > { %1414 = vadd.xlane.f32.xlu1 %v1413_v31  ;;  %v1408_v16 = vsel %vm1398_vm1, %v4337_v13, 0.0 }
 0x67c   : > { %v1422_v62 = vsel %vm829_vm6, %v1408_v16, 0.0  ;;  %v1482_v31 = vadd.f32 %v1481_v7, %v1480_v34 }
 0x67d   : > { %1423 = vadd.xlane.f32.xlu0 %v1422_v62 }
 0x67e   : > { %v4374_v21 = vsel %vm1398_vm1, 0.0, %v1482_v31 }
 0x685   : > { %v1412_v23 = vpop.xlane.xlu1 %1411 }
 0x686   : > { %v1434_v28 = vsel %vm1399_vm2, %v1412_v23, 0.0 }
 0x687   : > { %v1442_v9 = vrot.slane %v1434_v28, 4  ;;  %v1421_v35 = vpop.xlane.xlu0 %1420 }
 0x688   : > { %v1437_v36 = vsel %vm1399_vm2, %v1421_v35, 0.0  ;;  %vm2326_vm2 = vcmp.eq.s32.totalorder %v3905_v3, 13 }
 0x689   : > { %v1443_v15 = vadd.f32 %v1442_v9, %v1434_v28  ;;  %v1450_v41 = vrot.slane %v1437_v36, 4  ;;  %v1070_v20 = vpop.xlane.xlu1 %1069 }
 0x68a   : > { %v1114_v54 = vmul.f32 %v4103_v10, %v1070_v20 }
 0x68b   : > { %v1444_v46 = vrot.slane %v1443_v15, 2  ;;  %v1451_v33 = vadd.f32 %v1450_v41, %v1437_v36  ;;  %v1079_v63 = vpop.xlane.xlu0 %1078 }
 0x68c   : > { %v1150_v47 = vmul.f32 %v4111_v2, %v1114_v54  ;;  %v1117_v48 = vmul.f32 %v4107_v30, %v1079_v63  ;;  %v1490_v2 = vrot.slane %v1489_v18, 2 }
 0x68d   : > { %v1445_v11 = vadd.f32 %v1444_v46, %v1443_v15  ;;  %v1452_v53 = vrot.slane %v1451_v33, 2 }
 0x68e   : > { %v1156_v12 = vsub.f32 %v4296_v22, %v1150_v47  ;;  %v1153_v56 = vmul.f32 %v4118_v24, %v1117_v48  ;;  %v1491_v6 = vadd.f32 %v1490_v2, %v1489_v18 }
 0x68f   : > { %v1446_v57 = vrot.slane %v1445_v11, 1  ;;  %v1453_v60 = vadd.f32 %v1452_v53, %v1451_v33 }
 0x690   : > { %v1159_v10 = vsub.f32 %v4308_v32, %v1153_v56  ;;  %v4356_v61 = vsel %vm1050_vm11, %v1114_v54, %v1156_v12  ;;  %v1492_v40 = vrot.slane %v1491_v6, 1 }
 0x691   : > { %v1447_v55 = vadd.f32 %v1446_v57, %v1445_v11  ;;  %v1454_v38 = vrot.slane %v1453_v60, 1  ;;  %v1174_v30 = vsel %vm1166_vm13, %v4356_v61, 0.0 }
 0x692   : > { %v1184_v22 = vsel %vm829_vm6, %v1174_v30, 0.0  ;;  %v1165_v24 = vsel %vm1050_vm11, %v1117_v48, %v1159_v10  ;;  %v1493_v62 = vadd.f32 %v1492_v40, %v1491_v6  ;;  %vm1864_vm11 = vcmp.eq.s32.totalorder %v3967_v5, 9 }
 0x693   : > { %3181 = vrcp.f32 %v1447_v55  ;;  %v1455_v4 = vadd.f32 %v1454_v38, %v1453_v60  ;;  %1185 = vadd.xlane.f32.xlu1 %v1184_v22  ;;  %v1177_v32 = vsel %vm1166_vm13, %v1165_v24, 0.0 }
 0x694   : > { %v1193_v42 = vsel %vm829_vm6, %v1177_v32, 0.0  ;;  %v4380_v29 = vsel %vm1398_vm1, 0.0, %v1493_v62 }
 0x695   : > { %3183 = vrcp.f32 %v1455_v4  ;;  %1194 = vadd.xlane.f32.xlu0 %v1193_v42 }
 0x69d   : > { %v4367_v16 = vpop.eup %3181 }
 0x69e   : > { %v1460_v19 = vmul.f32 %v4367_v16, %v1412_v23 }
 0x69f   : > { %v4370_v14 = vpop.eup %3183 }
 0x6a0   : > { %v1496_v27 = vmul.f32 %v4374_v21, %v1460_v19  ;;  %v1463_v28 = vmul.f32 %v4370_v14, %v1421_v35 }
 0x6a2   : > { %v1502_v9 = vsub.f32 %v4292_v52, %v1496_v27  ;;  %v1499_v36 = vmul.f32 %v4380_v29, %v1463_v28 }
 0x6a4   : > { %v1505_v23 = vsub.f32 %v4304_v0, %v1499_v36  ;;  %v4388_v37 = vsel %vm1398_vm1, %v1460_v19, %v1502_v9 }
 0x6a5   : > { %v1520_v35 = vsel %vm1514_vm3, %v4388_v37, 0.0 }
 0x6a6   : > { %v1526_v15 = vsel %vm829_vm6, %v1520_v35, 0.0  ;;  %v4396_v41 = vsel %vm1398_vm1, %v1463_v28, %v1505_v23 }
 0x6a7   : > { %1527 = vadd.xlane.f32.xlu1 %v1526_v15  ;;  %v1523_v52 = vsel %vm1514_vm3, %v4396_v41, 0.0 }
 0x6a8   : > { %v1535_v0 = vsel %vm829_vm6, %v1523_v52, 0.0 }
 0x6a9   : > { %1536 = vadd.xlane.f32.xlu0 %v1535_v0 }
 0x708   : > { %v1415_v20 = vpop.xlane.xlu1 %1414 }
 0x709   : > { %v1461_v54 = vmul.f32 %v4367_v16, %v1415_v20 }
 0x70a   : > { %v1424_v58 = vpop.xlane.xlu0 %1423 }
 0x70b   : > { %v1497_v46 = vmul.f32 %v4374_v21, %v1461_v54  ;;  %v1464_v33 = vmul.f32 %v4370_v14, %v1424_v58 }
 0x70d   : > { %v1503_v63 = vsub.f32 %v4329_v8, %v1497_v46  ;;  %v1500_v47 = vmul.f32 %v4380_v29, %v1464_v33 }
 0x70f   : > { %v1506_v48 = vsub.f32 %v4337_v13, %v1500_v47  ;;  %v4410_v18 = vsel %vm1398_vm1, %v1461_v54, %v1503_v63 }
 0x710   : > { %v1521_v11 = vsel %vm1514_vm3, %v4410_v18, 0.0 }
 0x711   : > { %v1529_v53 = vsel %vm829_vm6, %v1521_v11, 0.0  ;;  %v4418_v12 = vsel %vm1398_vm1, %v1464_v33, %v1506_v48 }
 0x712   : > { %1530 = vadd.xlane.f32.xlu1 %v1529_v53  ;;  %v1524_v8 = vsel %vm1514_vm3, %v4418_v12, 0.0 }
 0x713   : > { %v1538_v13 = vsel %vm829_vm6, %v1524_v8, 0.0 }
 0x714   : > { %1539 = vadd.xlane.f32.xlu0 %v1538_v13 }
 0x720   : > { %v1186_v56 = vpop.xlane.xlu1 %1185 }
 0x721   : > { %v1230_v17 = vmul.f32 %v4174_v44, %v1186_v56 }
 0x722   : > { %v1195_v57 = vpop.xlane.xlu0 %1194 }
 0x723   : > { %v1266_v60 = vmul.f32 %v4183_v51, %v1230_v17  ;;  %v1233_v10 = vmul.f32 %v4179_v50, %v1195_v57 }
 0x725   : > { %v1272_v55 = vsub.f32 %v4356_v61, %v1266_v60  ;;  %v1269_v2 = vmul.f32 %v4191_v49, %v1233_v10  ;;  %v1582_v61 = vsel %vm1515_vm4, %v4388_v37, 0.0 }
 0x726   : > { %v1588_v34 = vsel %vm829_vm6, %v1582_v61, 0.0 }
 0x727   : > { %v1275_v38 = vsub.f32 %v1165_v24, %v1269_v2  ;;  %v4431_v30 = vsel %vm1166_vm13, %v1230_v17, %v1272_v55  ;;  %v1585_v24 = vsel %vm1515_vm4, %v4396_v41, 0.0  ;;  %v1593_v6 = vrot.slane %v1588_v34, 4 }
 0x728   : > { %v1290_v22 = vsel %vm1282_vm15, %v4431_v30, 0.0  ;;  %v1599_v32 = vsel %vm829_vm6, %v1585_v24, 0.0 }
 0x729   : > { %v1300_v44 = vsel %vm829_vm6, %v1290_v22, 0.0  ;;  %v4439_v51 = vsel %vm1166_vm13, %v1233_v10, %v1275_v38  ;;  %v1604_v62 = vrot.slane %v1599_v32, 4  ;;  %v1594_v28 = vadd.f32 %v1593_v6, %v1588_v34 }
 0x72a   : > { %1301 = vadd.xlane.f32.xlu1 %v1300_v44  ;;  %v1293_v50 = vsel %vm1282_vm15, %v4439_v51, 0.0  ;;  %vm1980_vm13 = vcmp.eq.s32.totalorder %v3967_v5, 10 }
 0x72b   : > { %v1309_v49 = vsel %vm829_vm6, %v1293_v50, 0.0  ;;  %v1605_v23 = vadd.f32 %v1604_v62, %v1599_v32  ;;  %v1595_v52 = vrot.slane %v1594_v28, 2 }
 0x72c   : > { %1310 = vadd.xlane.f32.xlu0 %v1309_v49 }
 0x72d   : > { %v1606_v58 = vrot.slane %v1605_v23, 2  ;;  %v1596_v33 = vadd.f32 %v1595_v52, %v1594_v28 }
 0x72f   : > { %v1607_v47 = vadd.f32 %v1606_v58, %v1605_v23  ;;  %v1597_v48 = vrot.slane %v1596_v33, 1 }
 0x731   : > { %v1608_v11 = vrot.slane %v1607_v47, 1  ;;  %v1598_v53 = vadd.f32 %v1597_v48, %v1596_v33 }
 0x733   : > { %v1609_v13 = vadd.f32 %v1608_v11, %v1607_v47  ;;  %v4457_v57 = vsel %vm1514_vm3, 0.0, %v1598_v53 }
 0x734   : > { %v1528_v4 = vpop.xlane.xlu1 %1527 }
 0x735   : > { %v1550_v42 = vsel %vm1515_vm4, %v1528_v4, 0.0  ;;  %v4463_v55 = vsel %vm1514_vm3, 0.0, %v1609_v13 }
 0x736   : > { %v1558_v7 = vrot.slane %v1550_v42, 4  ;;  %v1537_v40 = vpop.xlane.xlu0 %1536 }
 0x737   : > { %v1553_v31 = vsel %vm1515_vm4, %v1537_v40, 0.0  ;;  %vm2442_vm4 = vcmp.eq.s32.totalorder %v3905_v3, 14 }
 0x738   : > { %v1559_v19 = vadd.f32 %v1558_v7, %v1550_v42  ;;  %v1566_v27 = vrot.slane %v1553_v31, 4 }
 0x73a   : > { %v1560_v9 = vrot.slane %v1559_v19, 2  ;;  %v1567_v36 = vadd.f32 %v1566_v27, %v1553_v31 }
 0x73c   : > { %v1561_v35 = vadd.f32 %v1560_v9, %v1559_v19  ;;  %v1568_v15 = vrot.slane %v1567_v36, 2 }
 0x73e   : > { %v1562_v0 = vrot.slane %v1561_v35, 1  ;;  %v1569_v20 = vadd.f32 %v1568_v15, %v1567_v36 }
 0x740   : > { %v1563_v54 = vadd.f32 %v1562_v0, %v1561_v35  ;;  %v1570_v46 = vrot.slane %v1569_v20, 1 }
 0x742   : > { %3185 = vrcp.f32 %v1563_v54  ;;  %v1571_v63 = vadd.f32 %v1570_v46, %v1569_v20 }
 0x744   : > { %3187 = vrcp.f32 %v1571_v63 }
 0x74c   : > { %v4450_v8 = vpop.eup %3185 }
 0x74d   : > { %v1576_v56 = vmul.f32 %v4450_v8, %v1528_v4 }
 0x74e   : > { %v4453_v17 = vpop.eup %3187 }
 0x74f   : > { %v1612_v60 = vmul.f32 %v4457_v57, %v1576_v56  ;;  %v1579_v10 = vmul.f32 %v4453_v17, %v1537_v40 }
 0x751   : > { %v1618_v2 = vsub.f32 %v4388_v37, %v1612_v60  ;;  %v1615_v38 = vmul.f32 %v4463_v55, %v1579_v10 }
 0x753   : > { %v1621_v22 = vsub.f32 %v4396_v41, %v1615_v38  ;;  %v1624_v44 = vsel %vm1514_vm3, %v1576_v56, %v1618_v2 }
 0x754   : > { %v1636_v50 = vsel %vm1630_vm5, %v1624_v44, 0.0  ;;  %v1698_v48 = vsel %vm1631_vm7, %v1624_v44, 0.0 }
 0x755   : > { %v1642_v49 = vsel %vm829_vm6, %v1636_v50, 0.0  ;;  %v1627_v61 = vsel %vm1514_vm3, %v1579_v10, %v1621_v22  ;;  %v1704_v56 = vsel %vm829_vm6, %v1698_v48, 0.0 }
 0x756   : > { %1643 = vadd.xlane.f32.xlu1 %v1642_v49  ;;  %v1639_v37 = vsel %vm1630_vm5, %v1627_v61, 0.0  ;;  %v1701_v53 = vsel %vm1631_vm7, %v1627_v61, 0.0  ;;  %v1709_v2 = vrot.slane %v1704_v56, 4 }
 0x757   : > { %v1651_v24 = vsel %vm829_vm6, %v1639_v37, 0.0  ;;  %v1715_v10 = vsel %vm829_vm6, %v1701_v53, 0.0 }
 0x758   : > { %1652 = vadd.xlane.f32.xlu0 %v1651_v24  ;;  %v1720_v22 = vrot.slane %v1715_v10, 4  ;;  %v1710_v1 = vadd.f32 %v1709_v2, %v1704_v56 }
 0x75a   : > { %v1721_v37 = vadd.f32 %v1720_v22, %v1715_v10 }
 0x79f   : > { %v1531_v34 = vpop.xlane.xlu1 %1530 }
 0x7a0   : > { %v1577_v41 = vmul.f32 %v4450_v8, %v1531_v34  ;;  %v1711_v34 = vrot.slane %v1710_v1, 2 }
 0x7a1   : > { %v1540_v4 = vpop.xlane.xlu0 %1539 }
 0x7a2   : > { %v1613_v32 = vmul.f32 %v4457_v57, %v1577_v41  ;;  %v1580_v42 = vmul.f32 %v4453_v17, %v1540_v4  ;;  %v1722_v4 = vrot.slane %v1721_v37, 2  ;;  %v1712_v61 = vadd.f32 %v1711_v34, %v1710_v1 }
 0x7a4   : > { %v1619_v6 = vsub.f32 %v4410_v18, %v1613_v32  ;;  %v1616_v7 = vmul.f32 %v4463_v55, %v1580_v42  ;;  %v1723_v32 = vadd.f32 %v1722_v4, %v1721_v37 }
 0x7a6   : > { %v1622_v40 = vsub.f32 %v4418_v12, %v1616_v7  ;;  %v4487_v31 = vsel %vm1514_vm3, %v1577_v41, %v1619_v6  ;;  %v1724_v6 = vrot.slane %v1723_v32, 1 }
 0x7a7   : > { %v1637_v62 = vsel %vm1630_vm5, %v4487_v31, 0.0 }
 0x7a8   : > { %v1645_v19 = vsel %vm829_vm6, %v1637_v62, 0.0  ;;  %v4495_v27 = vsel %vm1514_vm3, %v1580_v42, %v1622_v40  ;;  %v1713_v42 = vrot.slane %v1712_v61, 1 }
 0x7a9   : > { %1646 = vadd.xlane.f32.xlu1 %v1645_v19  ;;  %v1640_v18 = vsel %vm1630_vm5, %v4495_v27, 0.0  ;;  %v1725_v19 = vadd.f32 %v1724_v6, %v1723_v32 }
 0x7aa   : > { %v1654_v12 = vsel %vm829_vm6, %v1640_v18, 0.0  ;;  %v1714_v7 = vadd.f32 %v1713_v42, %v1712_v61 }
 0x7ab   : > { %1655 = vadd.xlane.f32.xlu0 %v1654_v12 }
 0x7b7   : > { %v1302_v28 = vpop.xlane.xlu1 %1301 }
 0x7b8   : > { %v1346_v9 = vmul.f32 %v4268_v39, %v1302_v28  ;;  %v4533_v28 = vsel %vm1630_vm5, 0.0, %v1714_v7 }
 0x7b9   : > { %v1311_v36 = vpop.xlane.xlu0 %1310 }
 0x7ba   : > { %v1382_v23 = vmul.f32 %v4276_v45, %v1346_v9  ;;  %v1349_v35 = vmul.f32 %v4272_v43, %v1311_v36 }
 0x7bc   : > { %v1388_v15 = vsub.f32 %v4431_v30, %v1382_v23  ;;  %v1385_v52 = vmul.f32 %v4283_v59, %v1349_v35 }
 0x7be   : > { %v1391_v0 = vsub.f32 %v4439_v51, %v1385_v52  ;;  %v4509_v20 = vsel %vm1282_vm15, %v1346_v9, %v1388_v15 }
 0x7bf   : > { %v1406_v54 = vsel %vm1398_vm1, %v4509_v20, 0.0 }
 0x7c0   : > { %v1416_v39 = vsel %vm829_vm6, %v1406_v54, 0.0  ;;  %v4517_v45 = vsel %vm1282_vm15, %v1349_v35, %v1391_v0  ;;  %v4539_v35 = vsel %vm1630_vm5, 0.0, %v1725_v19  ;;  %vm2096_vm15 = vcmp.eq.s32.totalorder %v3967_v5, 11 }
 0x7c1   : > { %1417 = vadd.xlane.f32.xlu1 %v1416_v39  ;;  %v1409_v43 = vsel %vm1398_vm1, %v4517_v45, 0.0 }
 0x7c2   : > { %v1425_v59 = vsel %vm829_vm6, %v1409_v43, 0.0 }
 0x7c3   : > { %1426 = vadd.xlane.f32.xlu0 %v1425_v59 }
 0x7e3   : > { %v1644_v30 = vpop.xlane.xlu1 %1643 }
 0x7e4   : > { %v1666_v58 = vsel %vm1631_vm7, %v1644_v30, 0.0 }
 0x7e5   : > { %v1653_v51 = vpop.xlane.xlu0 %1652  ;;  %v1674_v33 = vrot.slane %v1666_v58, 4 }
 0x7e6   : > { %v1669_v46 = vsel %vm1631_vm7, %v1653_v51, 0.0  ;;  %vm2558_vm7 = vcmp.eq.s32.totalorder %v3905_v3, 15 }
 0x7e7   : > { %v1682_v63 = vrot.slane %v1669_v46, 4  ;;  %v1675_v47 = vadd.f32 %v1674_v33, %v1666_v58 }
 0x7e9   : > { %v1683_v11 = vadd.f32 %v1682_v63, %v1669_v46  ;;  %v1676_v13 = vrot.slane %v1675_v47, 2 }
 0x7eb   : > { %v1684_v60 = vrot.slane %v1683_v11, 2  ;;  %v1677_v38 = vadd.f32 %v1676_v13, %v1675_v47 }
 0x7ed   : > { %v1685_v50 = vadd.f32 %v1684_v60, %v1683_v11  ;;  %v1678_v49 = vrot.slane %v1677_v38, 1 }
 0x7ef   : > { %v1686_v24 = vrot.slane %v1685_v50, 1  ;;  %v1679_v41 = vadd.f32 %v1678_v49, %v1677_v38 }
 0x7f1   : > { %v1687_v44 = vadd.f32 %v1686_v24, %v1685_v50  ;;  %3189 = vrcp.f32 %v1679_v41 }
 0x7f3   : > { %3191 = vrcp.f32 %v1687_v44 }
 0x7fb   : > { %v4526_v40 = vpop.eup %3189 }
 0x7fd   : > { %v4529_v12 = vpop.eup %3191 }
 0x836   : > { %v1647_v62 = vpop.xlane.xlu1 %1646 }
 0x837   : > { %v1693_v18 = vmul.f32 %v4526_v40, %v1647_v62 }
 0x838   : > { %v1656_v9 = vpop.xlane.xlu0 %1655 }
 0x839   : > { %v1729_v36 = vmul.f32 %v4533_v28, %v1693_v18  ;;  %v1696_v23 = vmul.f32 %v4529_v12, %v1656_v9 }
 0x83b   : > { %v1735_v15 = vsub.f32 %v4487_v31, %v1729_v36  ;;  %v1732_v52 = vmul.f32 %v4539_v35, %v1696_v23 }
 0x83d   : > { %v1738_v0 = vsub.f32 %v4495_v27, %v1732_v52  ;;  %v4547_v54 = vsel %vm1630_vm5, %v1693_v18, %v1735_v15 }
 0x83e   : > { %v1753_v39 = vsel %vm1746_vm8, %v4547_v54, 0.0 }
 0x83f   : > { %v1761_v43 = vsel %vm829_vm6, %v1753_v39, 0.0  ;;  %v4555_v59 = vsel %vm1630_vm5, %v1696_v23, %v1738_v0 }
 0x840   : > { %1762 = vadd.xlane.f32.xlu1 %v1761_v43  ;;  %v1756_v31 = vsel %vm1746_vm8, %v4555_v59, 0.0 }
 0x841   : > { %v1770_v27 = vsel %vm829_vm6, %v1756_v31, 0.0 }
 0x842   : > { %1771 = vadd.xlane.f32.xlu0 %v1770_v27 }
 0x84e   : > { %v1418_v30 = vpop.xlane.xlu1 %1417 }
 0x84f   : > { %v1462_v51 = vmul.f32 %v4367_v16, %v1418_v30 }
 0x850   : > { %v1427_v58 = vpop.xlane.xlu0 %1426 }
 0x851   : > { %v1498_v46 = vmul.f32 %v4374_v21, %v1462_v51  ;;  %v1465_v33 = vmul.f32 %v4370_v14, %v1427_v58 }
 0x853   : > { %v1504_v63 = vsub.f32 %v4509_v20, %v1498_v46  ;;  %v1501_v47 = vmul.f32 %v4380_v29, %v1465_v33  ;;  %v1815_v20 = vsel %vm1748_vm9, %v4547_v54, 0.0 }
 0x854   : > { %v1821_v13 = vsel %vm829_vm6, %v1815_v20, 0.0 }
 0x855   : > { %v1507_v48 = vsub.f32 %v4517_v45, %v1501_v47  ;;  %v4569_v11 = vsel %vm1398_vm1, %v1462_v51, %v1504_v63  ;;  %v1818_v45 = vsel %vm1748_vm9, %v4555_v59, 0.0  ;;  %v1825_v2 = vrot.slane %v1821_v13, 4 }
 0x856   : > { %v1522_v53 = vsel %vm1514_vm3, %v4569_v11, 0.0  ;;  %v1832_v60 = vsel %vm829_vm6, %v1818_v45, 0.0 }
 0x857   : > { %v1532_v16 = vsel %vm829_vm6, %v1522_v53, 0.0  ;;  %v4577_v21 = vsel %vm1398_vm1, %v1465_v33, %v1507_v48  ;;  %v1836_v1 = vrot.slane %v1832_v60, 4  ;;  %v1826_v24 = vadd.f32 %v1825_v2, %v1821_v13 }
 0x858   : > { %1533 = vadd.xlane.f32.xlu1 %v1532_v16  ;;  %v1525_v14 = vsel %vm1514_vm3, %v4577_v21, 0.0  ;;  %vm2212_vm1 = vcmp.eq.s32.totalorder %v3967_v5, 12 }
 0x859   : > { %v1541_v29 = vsel %vm829_vm6, %v1525_v14, 0.0  ;;  %v1837_v44 = vadd.f32 %v1836_v1, %v1832_v60  ;;  %v1827_v32 = vrot.slane %v1826_v24, 2 }
 0x85a   : > { %1542 = vadd.xlane.f32.xlu0 %v1541_v29 }
 0x85b   : > { %v1838_v62 = vrot.slane %v1837_v44, 2  ;;  %v1828_v18 = vadd.f32 %v1827_v32, %v1826_v24 }
 0x85d   : > { %v1839_v36 = vadd.f32 %v1838_v62, %v1837_v44  ;;  %v1829_v23 = vrot.slane %v1828_v18, 1 }
 0x85f   : > { %v1840_v15 = vrot.slane %v1839_v36, 1  ;;  %v1830_v52 = vadd.f32 %v1829_v23, %v1828_v18 }
 0x861   : > { %v1841_v39 = vadd.f32 %v1840_v15, %v1839_v36  ;;  %v4596_v51 = vsel %vm1746_vm8, 0.0, %v1830_v52 }
 0x863   : > { %v4604_v48 = vsel %vm1746_vm8, 0.0, %v1841_v39 }
 0x8cd   : > { %v1763_v56 = vpop.xlane.xlu1 %1762 }
 0x8ce   : > { %v1783_v10 = vsel %vm1748_vm9, %v1763_v56, 0.0 }
 0x8cf   : > { %v1790_v38 = vrot.slane %v1783_v10, 4  ;;  %v1772_v22 = vpop.xlane.xlu0 %1771 }
 0x8d0   : > { %v1786_v50 = vsel %vm1748_vm9, %v1772_v22, 0.0 }
 0x8d1   : > { %v1791_v49 = vadd.f32 %v1790_v38, %v1783_v10  ;;  %v1798_v37 = vrot.slane %v1786_v50, 4 }
 0x8d3   : > { %v1792_v34 = vrot.slane %v1791_v49, 2  ;;  %v1799_v41 = vadd.f32 %v1798_v37, %v1786_v50 }
 0x8d5   : > { %v1793_v4 = vadd.f32 %v1792_v34, %v1791_v49  ;;  %v1800_v61 = vrot.slane %v1799_v41, 2 }
 0x8d7   : > { %v1794_v42 = vrot.slane %v1793_v4, 1  ;;  %v1801_v6 = vadd.f32 %v1800_v61, %v1799_v41 }
 0x8d9   : > { %v1795_v7 = vadd.f32 %v1794_v42, %v1793_v4  ;;  %v1802_v19 = vrot.slane %v1801_v6, 1 }
 0x8db   : > { %3193 = vrcp.f32 %v1795_v7  ;;  %v1803_v9 = vadd.f32 %v1802_v19, %v1801_v6 }
 0x8dd   : > { %3195 = vrcp.f32 %v1803_v9 }
 0x8e5   : > { %v4588_v0 = vpop.eup %3193  ;;  %v1534_v43 = vpop.xlane.xlu1 %1533 }
 0x8e6   : > { %v1809_v31 = vmul.f32 %v4588_v0, %v1763_v56  ;;  %v1578_v27 = vmul.f32 %v4450_v8, %v1534_v43 }
 0x8e7   : > { %v4592_v30 = vpop.eup %3195  ;;  %v1543_v58 = vpop.xlane.xlu0 %1542 }
 0x8e8   : > { %v1845_v46 = vmul.f32 %v4596_v51, %v1809_v31  ;;  %v1812_v33 = vmul.f32 %v4592_v30, %v1772_v22  ;;  %v1614_v63 = vmul.f32 %v4457_v57, %v1578_v27  ;;  %v1581_v47 = vmul.f32 %v4453_v17, %v1543_v58 }
 0x8ea   : > { %v1851_v8 = vsub.f32 %v4547_v54, %v1845_v46  ;;  %v1848_v53 = vmul.f32 %v4604_v48, %v1812_v33  ;;  %v1620_v16 = vsub.f32 %v4569_v11, %v1614_v63  ;;  %v1617_v14 = vmul.f32 %v4463_v55, %v1581_v47 }
 0x8ec   : > { %v1854_v29 = vsub.f32 %v4555_v59, %v1848_v53  ;;  %v1623_v57 = vsub.f32 %v4577_v21, %v1617_v14  ;;  %v4615_v17 = vsel %vm1746_vm8, %v1809_v31, %v1851_v8  ;;  %v1626_v20 = vsel %vm1514_vm3, %v1578_v27, %v1620_v16 }
 0x8ed   : > { %v1869_v54 = vsel %vm1862_vm10, %v4615_v17, 0.0  ;;  %v1638_v21 = vsel %vm1630_vm5, %v1626_v20, 0.0  ;;  %v1931_v2 = vsel %vm1864_vm11, %v4615_v17, 0.0 }
 0x8ee   : > { %v1877_v45 = vsel %vm829_vm6, %v1869_v54, 0.0  ;;  %v4625_v55 = vsel %vm1746_vm8, %v1812_v33, %v1854_v29  ;;  %v1629_v59 = vsel %vm1514_vm3, %v1581_v47, %v1623_v57  ;;  %v1648_v60 = vsel %vm829_vm6, %v1638_v21, 0.0 }
 0x8ef   : > { %1878 = vadd.xlane.f32.xlu1 %v1877_v45  ;;  %v1872_v11 = vsel %vm1862_vm10, %v4625_v55, 0.0  ;;  %v1641_v56 = vsel %vm1630_vm5, %v1629_v59, 0.0  ;;  %v1934_v38 = vsel %vm1864_vm11, %v4625_v55, 0.0  ;;  %v1937_v22 = vsel %vm829_vm6, %v1931_v2, 0.0 }
 0x8f0   : > { %v1886_v13 = vsel %vm829_vm6, %v1872_v11, 0.0  ;;  %v1657_v10 = vsel %vm829_vm6, %v1641_v56, 0.0  ;;  %v1948_v1 = vsel %vm829_vm6, %v1934_v38, 0.0  ;;  %v1941_v37 = vrot.slane %v1937_v22, 4 }
 0x8f1   : > { %1887 = vadd.xlane.f32.xlu0 %v1886_v13  ;;  %v1952_v4 = vrot.slane %v1948_v1, 4  ;;  %vm2328_vm3 = vcmp.eq.s32.totalorder %v3967_v5, 13 }
 0x8f2   : > { %v1942_v6 = vadd.f32 %v1941_v37, %v1937_v22 }
 0x8f3   : > { %1649 = vadd.xlane.f32.xlu1 %v1648_v60  ;;  %v1953_v23 = vadd.f32 %v1952_v4, %v1948_v1 }
 0x8f4   : > { %v1943_v43 = vrot.slane %v1942_v6, 2 }
 0x8f5   : > { %1658 = vadd.xlane.f32.xlu0 %v1657_v10  ;;  %v1954_v33 = vrot.slane %v1953_v23, 2 }
 0x8f6   : > { %v1944_v8 = vadd.f32 %v1943_v43, %v1942_v6 }
 0x8f7   : > { %v1955_v14 = vadd.f32 %v1954_v33, %v1953_v23 }
 0x8f8   : > { %v1945_v29 = vrot.slane %v1944_v8, 1 }
 0x8f9   : > { %v1956_v57 = vrot.slane %v1955_v14, 1 }
 0x8fb   : > { %v1957_v45 = vadd.f32 %v1956_v57, %v1955_v14 }
 0x8fd   : > { %v4671_v60 = vsel %vm1862_vm10, 0.0, %v1957_v45 }
 0x97c   : > { %v1879_v50 = vpop.xlane.xlu1 %1878 }
 0x97d   : > { %v1899_v49 = vsel %vm1864_vm11, %v1879_v50, 0.0 }
 0x97e   : > { %v1906_v24 = vrot.slane %v1899_v49, 4  ;;  %v1888_v34 = vpop.xlane.xlu0 %1887 }
 0x97f   : > { %v1902_v41 = vsel %vm1864_vm11, %v1888_v34, 0.0 }
 0x980   : > { %v1907_v44 = vadd.f32 %v1906_v24, %v1899_v49  ;;  %v1914_v61 = vrot.slane %v1902_v41, 4  ;;  %v1650_v32 = vpop.xlane.xlu1 %1649 }
 0x981   : > { %v1694_v42 = vmul.f32 %v4526_v40, %v1650_v32 }
 0x982   : > { %v1908_v7 = vrot.slane %v1907_v44, 2  ;;  %v1915_v62 = vadd.f32 %v1914_v61, %v1902_v41  ;;  %v1659_v19 = vpop.xlane.xlu0 %1658 }
 0x983   : > { %v1730_v18 = vmul.f32 %v4533_v28, %v1694_v42  ;;  %v1697_v9 = vmul.f32 %v4529_v12, %v1659_v19 }
 0x984   : > { %v1909_v36 = vadd.f32 %v1908_v7, %v1907_v44  ;;  %v1916_v15 = vrot.slane %v1915_v62, 2 }
 0x985   : > { %v1736_v52 = vsub.f32 %v1626_v20, %v1730_v18  ;;  %v1733_v39 = vmul.f32 %v4539_v35, %v1697_v9  ;;  %v1946_v20 = vadd.f32 %v1945_v29, %v1944_v8 }
 0x986   : > { %v1910_v31 = vrot.slane %v1909_v36, 1  ;;  %v1917_v27 = vadd.f32 %v1916_v15, %v1915_v62 }
 0x987   : > { %v1739_v58 = vsub.f32 %v1629_v59, %v1733_v39  ;;  %v1742_v40 = vsel %vm1630_vm5, %v1694_v42, %v1736_v52  ;;  %v4665_v21 = vsel %vm1862_vm10, 0.0, %v1946_v20 }
 0x988   : > { %v1911_v46 = vadd.f32 %v1910_v31, %v1909_v36  ;;  %v1918_v63 = vrot.slane %v1917_v27, 1  ;;  %v1754_v28 = vsel %vm1746_vm8, %v1742_v40, 0.0 }
 0x989   : > { %v1764_v12 = vsel %vm829_vm6, %v1754_v28, 0.0  ;;  %v1745_v47 = vsel %vm1630_vm5, %v1697_v9, %v1739_v58  ;;  %vm2444_vm5 = vcmp.eq.s32.totalorder %v3967_v5, 14 }
 0x98a   : > { %3197 = vrcp.f32 %v1911_v46  ;;  %v1919_v35 = vadd.f32 %v1918_v63, %v1917_v27  ;;  %1765 = vadd.xlane.f32.xlu1 %v1764_v12  ;;  %v1757_v53 = vsel %vm1746_vm8, %v1745_v47, 0.0 }
 0x98b   : > { %v1773_v16 = vsel %vm829_vm6, %v1757_v53, 0.0 }
 0x98c   : > { %3199 = vrcp.f32 %v1919_v35  ;;  %1774 = vadd.xlane.f32.xlu0 %v1773_v16 }
 0x994   : > { %v4658_v54 = vpop.eup %3197 }
 0x995   : > { %v1925_v59 = vmul.f32 %v4658_v54, %v1879_v50 }
 0x996   : > { %v4661_v11 = vpop.eup %3199 }
 0x997   : > { %v1961_v13 = vmul.f32 %v4665_v21, %v1925_v59  ;;  %v1928_v56 = vmul.f32 %v4661_v11, %v1888_v34 }
 0x999   : > { %v1967_v10 = vsub.f32 %v4615_v17, %v1961_v13  ;;  %v1964_v2 = vmul.f32 %v4671_v60, %v1928_v56 }
 0x99b   : > { %v1970_v38 = vsub.f32 %v4625_v55, %v1964_v2  ;;  %v4679_v22 = vsel %vm1862_vm10, %v1925_v59, %v1967_v10 }
 0x99c   : > { %v1985_v50 = vsel %vm1978_vm12, %v4679_v22, 0.0 }
 0x99d   : > { %v1993_v1 = vsel %vm829_vm6, %v1985_v50, 0.0  ;;  %v4687_v49 = vsel %vm1862_vm10, %v1928_v56, %v1970_v38 }
 0x99e   : > { %1994 = vadd.xlane.f32.xlu1 %v1993_v1  ;;  %v1988_v17 = vsel %vm1978_vm12, %v4687_v49, 0.0  ;;  %v2050_v62 = vsel %vm1980_vm13, %v4687_v49, 0.0 }
 0x99f   : > { %v2002_v55 = vsel %vm829_vm6, %v1988_v17, 0.0  ;;  %v2064_v9 = vsel %vm829_vm6, %v2050_v62, 0.0 }
 0x9a0   : > { %2003 = vadd.xlane.f32.xlu0 %v2002_v55  ;;  %v2068_v43 = vrot.slane %v2064_v9, 4 }
 0x9a2   : > { %v2069_v63 = vadd.f32 %v2068_v43, %v2064_v9 }
 0x9a4   : > { %v2070_v53 = vrot.slane %v2069_v63, 2 }
 0x9a6   : > { %v2071_v57 = vadd.f32 %v2070_v53, %v2069_v63 }
 0x9a8   : > { %v2072_v45 = vrot.slane %v2071_v57, 1 }
 0x9aa   : > { %v2073_v56 = vadd.f32 %v2072_v45, %v2071_v57 }
 0x9ac   : > { %v4731_v17 = vsel %vm1978_vm12, 0.0, %v2073_v56 }
 0xa17   : > { %v1766_v37 = vpop.xlane.xlu1 %1765 }
 0xa18   : > { %v1810_v24 = vmul.f32 %v4588_v0, %v1766_v37 }
 0xa19   : > { %v1775_v34 = vpop.xlane.xlu0 %1774 }
 0xa1a   : > { %v1846_v41 = vmul.f32 %v4596_v51, %v1810_v24  ;;  %v1813_v4 = vmul.f32 %v4592_v30, %v1775_v34 }
 0xa1c   : > { %v1852_v44 = vsub.f32 %v1742_v40, %v1846_v41  ;;  %v1849_v61 = vmul.f32 %v4604_v48, %v1813_v4  ;;  %v2047_v48 = vsel %vm1980_vm13, %v4679_v22, 0.0 }
 0xa1d   : > { %v2053_v19 = vsel %vm829_vm6, %v2047_v48, 0.0 }
 0xa1e   : > { %v1855_v32 = vsub.f32 %v1745_v47, %v1849_v61  ;;  %v4699_v42 = vsel %vm1746_vm8, %v1810_v24, %v1852_v44  ;;  %v2057_v23 = vrot.slane %v2053_v19, 4 }
 0xa1f   : > { %v1870_v6 = vsel %vm1862_vm10, %v4699_v42, 0.0 }
 0xa20   : > { %v1880_v7 = vsel %vm829_vm6, %v1870_v6, 0.0  ;;  %v4707_v0 = vsel %vm1746_vm8, %v1813_v4, %v1855_v32  ;;  %v2058_v58 = vadd.f32 %v2057_v23, %v2053_v19  ;;  %vm2560_vm8 = vcmp.eq.s32.totalorder %v3967_v5, 15 }
 0xa21   : > { %1881 = vadd.xlane.f32.xlu1 %v1880_v7  ;;  %v1873_v30 = vsel %vm1862_vm10, %v4707_v0, 0.0 }
 0xa22   : > { %v1889_v51 = vsel %vm829_vm6, %v1873_v30, 0.0  ;;  %v2059_v12 = vrot.slane %v2058_v58, 2 }
 0xa23   : > { %1890 = vadd.xlane.f32.xlu0 %v1889_v51 }
 0xa24   : > { %v2060_v14 = vadd.f32 %v2059_v12, %v2058_v58 }
 0xa26   : > { %v2061_v20 = vrot.slane %v2060_v14, 1 }
 0xa28   : > { %v2062_v59 = vadd.f32 %v2061_v20, %v2060_v14 }
 0xa2a   : > { %v4725_v38 = vsel %vm1978_vm12, 0.0, %v2062_v59 }
 0xa2b   : > { %v1995_v18 = vpop.xlane.xlu1 %1994 }
 0xa2c   : > { %v2015_v36 = vsel %vm1980_vm13, %v1995_v18, 0.0 }
 0xa2d   : > { %v2022_v15 = vrot.slane %v2015_v36, 4  ;;  %v2004_v52 = vpop.xlane.xlu0 %2003 }
 0xa2e   : > { %v2018_v39 = vsel %vm1980_vm13, %v2004_v52, 0.0 }
 0xa2f   : > { %v2023_v31 = vadd.f32 %v2022_v15, %v2015_v36  ;;  %v2030_v27 = vrot.slane %v2018_v39, 4 }
 0xa31   : > { %v2024_v40 = vrot.slane %v2023_v31, 2  ;;  %v2031_v46 = vadd.f32 %v2030_v27, %v2018_v39 }
 0xa33   : > { %v2025_v33 = vadd.f32 %v2024_v40, %v2023_v31  ;;  %v2032_v28 = vrot.slane %v2031_v46, 2 }
 0xa35   : > { %v2026_v47 = vrot.slane %v2025_v33, 1  ;;  %v2033_v8 = vadd.f32 %v2032_v28, %v2031_v46 }
 0xa37   : > { %v2027_v35 = vadd.f32 %v2026_v47, %v2025_v33  ;;  %v2034_v16 = vrot.slane %v2033_v8, 1 }
 0xa39   : > { %3201 = vrcp.f32 %v2027_v35  ;;  %v2035_v29 = vadd.f32 %v2034_v16, %v2033_v8 }
 0xa3b   : > { %3203 = vrcp.f32 %v2035_v29 }
 0xa43   : > { %v4718_v13 = vpop.eup %3201 }
 0xa44   : > { %v2041_v10 = vmul.f32 %v4718_v13, %v1995_v18 }
 0xa45   : > { %v4721_v2 = vpop.eup %3203 }
 0xa46   : > { %v2077_v50 = vmul.f32 %v4725_v38, %v2041_v10  ;;  %v2044_v1 = vmul.f32 %v4721_v2, %v2004_v52 }
 0xa48   : > { %v2083_v55 = vsub.f32 %v4679_v22, %v2077_v50  ;;  %v2080_v37 = vmul.f32 %v4731_v17, %v2044_v1 }
 0xa4a   : > { %v2086_v24 = vsub.f32 %v4687_v49, %v2080_v37  ;;  %v4739_v34 = vsel %vm1978_vm12, %v2041_v10, %v2083_v55 }
 0xa4b   : > { %v2101_v41 = vsel %vm2094_vm14, %v4739_v34, 0.0 }
 0xa4c   : > { %v2109_v4 = vsel %vm829_vm6, %v2101_v41, 0.0  ;;  %v4747_v44 = vsel %vm1978_vm12, %v2044_v1, %v2086_v24 }
 0xa4d   : > { %2110 = vadd.xlane.f32.xlu1 %v2109_v4  ;;  %v2104_v22 = vsel %vm2094_vm14, %v4747_v44, 0.0 }
 0xa4e   : > { %v2118_v49 = vsel %vm829_vm6, %v2104_v22, 0.0 }
 0xa4f   : > { %2119 = vadd.xlane.f32.xlu0 %v2118_v49 }
 0xaae   : > { %v1882_v61 = vpop.xlane.xlu1 %1881 }
 0xaaf   : > { %v1926_v32 = vmul.f32 %v4658_v54, %v1882_v61 }
 0xab0   : > { %v1891_v6 = vpop.xlane.xlu0 %1890 }
 0xab1   : > { %v1962_v7 = vmul.f32 %v4665_v21, %v1926_v32  ;;  %v1929_v30 = vmul.f32 %v4661_v11, %v1891_v6 }
 0xab3   : > { %v1968_v51 = vsub.f32 %v4699_v42, %v1962_v7  ;;  %v1965_v48 = vmul.f32 %v4671_v60, %v1929_v30  ;;  %v2163_v42 = vsel %vm2096_vm15, %v4739_v34, 0.0 }
 0xab4   : > { %v2169_v9 = vsel %vm829_vm6, %v2163_v42, 0.0 }
 0xab5   : > { %v1971_v62 = vsub.f32 %v4707_v0, %v1965_v48  ;;  %v4761_v19 = vsel %vm1862_vm10, %v1926_v32, %v1968_v51  ;;  %v2166_v0 = vsel %vm2096_vm15, %v4747_v44, 0.0  ;;  %v2173_v52 = vrot.slane %v2169_v9, 4 }
 0xab6   : > { %v1986_v18 = vsel %vm1978_vm12, %v4761_v19, 0.0  ;;  %v2180_v23 = vsel %vm829_vm6, %v2166_v0, 0.0 }
 0xab7   : > { %v1996_v54 = vsel %vm829_vm6, %v1986_v18, 0.0  ;;  %v4769_v21 = vsel %vm1862_vm10, %v1929_v30, %v1971_v62  ;;  %v2184_v27 = vrot.slane %v2180_v23, 4  ;;  %v2174_v46 = vadd.f32 %v2173_v52, %v2169_v9 }
 0xab8   : > { %1997 = vadd.xlane.f32.xlu1 %v1996_v54  ;;  %v1989_v11 = vsel %vm1978_vm12, %v4769_v21, 0.0 }
 0xab9   : > { %v2005_v60 = vsel %vm829_vm6, %v1989_v11, 0.0  ;;  %v2185_v12 = vadd.f32 %v2184_v27, %v2180_v23  ;;  %v2175_v8 = vrot.slane %v2174_v46, 2 }
 0xaba   : > { %2006 = vadd.xlane.f32.xlu0 %v2005_v60 }
 0xabb   : > { %v2186_v14 = vrot.slane %v2185_v12, 2  ;;  %v2176_v57 = vadd.f32 %v2175_v8, %v2174_v46 }
 0xabd   : > { %v2187_v45 = vadd.f32 %v2186_v14, %v2185_v12  ;;  %v2177_v59 = vrot.slane %v2176_v57, 1 }
 0xabf   : > { %v2188_v56 = vrot.slane %v2187_v45, 1  ;;  %v2178_v10 = vadd.f32 %v2177_v59, %v2176_v57 }
 0xac1   : > { %v2189_v1 = vadd.f32 %v2188_v56, %v2187_v45  ;;  %v4787_v24 = vsel %vm2094_vm14, 0.0, %v2178_v10 }
 0xac3   : > { %v4793_v22 = vsel %vm2094_vm14, 0.0, %v2189_v1 }
 0xada   : > { %v2111_v36 = vpop.xlane.xlu1 %2110 }
 0xadb   : > { %v2131_v15 = vsel %vm2096_vm15, %v2111_v36, 0.0 }
 0xadc   : > { %v2138_v39 = vrot.slane %v2131_v15, 4  ;;  %v2120_v43 = vpop.xlane.xlu0 %2119 }
 0xadd   : > { %v2134_v31 = vsel %vm2096_vm15, %v2120_v43, 0.0 }
 0xade   : > { %v2139_v58 = vadd.f32 %v2138_v39, %v2131_v15  ;;  %v2146_v40 = vrot.slane %v2134_v31, 4 }
 0xae0   : > { %v2140_v33 = vrot.slane %v2139_v58, 2  ;;  %v2147_v63 = vadd.f32 %v2146_v40, %v2134_v31 }
 0xae2   : > { %v2141_v28 = vadd.f32 %v2140_v33, %v2139_v58  ;;  %v2148_v47 = vrot.slane %v2147_v63, 2 }
 0xae4   : > { %v2142_v35 = vrot.slane %v2141_v28, 1  ;;  %v2149_v53 = vadd.f32 %v2148_v47, %v2147_v63 }
 0xae6   : > { %v2143_v16 = vadd.f32 %v2142_v35, %v2141_v28  ;;  %v2150_v29 = vrot.slane %v2149_v53, 1 }
 0xae8   : > { %3205 = vrcp.f32 %v2143_v16  ;;  %v2151_v20 = vadd.f32 %v2150_v29, %v2149_v53 }
 0xaea   : > { %3207 = vrcp.f32 %v2151_v20 }
 0xaf2   : > { %v4780_v50 = vpop.eup %3205 }
 0xaf3   : > { %v2157_v55 = vmul.f32 %v4780_v50, %v2111_v36 }
 0xaf4   : > { %v4783_v37 = vpop.eup %3207 }
 0xaf5   : > { %v2193_v41 = vmul.f32 %v4787_v24, %v2157_v55  ;;  %v2160_v4 = vmul.f32 %v4783_v37, %v2120_v43 }
 0xaf7   : > { %v2199_v49 = vsub.f32 %v4739_v34, %v2193_v41  ;;  %v2196_v61 = vmul.f32 %v4793_v22, %v2160_v4 }
 0xaf9   : > { %v2202_v32 = vsub.f32 %v4747_v44, %v2196_v61  ;;  %v4801_v6 = vsel %vm2094_vm14, %v2157_v55, %v2199_v49 }
 0xafa   : > { %v2217_v7 = vsel %vm2210_vm0, %v4801_v6, 0.0  ;;  %v2279_v58 = vsel %vm2212_vm1, %v4801_v6, 0.0 }
 0xafb   : > { %v2225_v30 = vsel %vm829_vm6, %v2217_v7, 0.0  ;;  %v4809_v51 = vsel %vm2094_vm14, %v2160_v4, %v2202_v32  ;;  %v2285_v63 = vsel %vm829_vm6, %v2279_v58, 0.0 }
 0xafc   : > { %2226 = vadd.xlane.f32.xlu1 %v2225_v30  ;;  %v2220_v34 = vsel %vm2210_vm0, %v4809_v51, 0.0  ;;  %v2282_v46 = vsel %vm2212_vm1, %v4809_v51, 0.0  ;;  %v2289_v47 = vrot.slane %v2285_v63, 4 }
 0xafd   : > { %v2234_v44 = vsel %vm829_vm6, %v2220_v34, 0.0  ;;  %v2296_v12 = vsel %vm829_vm6, %v2282_v46, 0.0 }
 0xafe   : > { %2235 = vadd.xlane.f32.xlu0 %v2234_v44  ;;  %v2300_v35 = vrot.slane %v2296_v12, 4  ;;  %v2290_v16 = vadd.f32 %v2289_v47, %v2285_v63 }
 0xb00   : > { %v2301_v29 = vadd.f32 %v2300_v35, %v2296_v12  ;;  %v2291_v20 = vrot.slane %v2290_v16, 2 }
 0xb02   : > { %v2302_v45 = vrot.slane %v2301_v29, 2  ;;  %v2292_v59 = vadd.f32 %v2291_v20, %v2290_v16 }
 0xb04   : > { %v2303_v56 = vadd.f32 %v2302_v45, %v2301_v29  ;;  %v2293_v10 = vrot.slane %v2292_v59, 1 }
 0xb06   : > { %v2304_v55 = vrot.slane %v2303_v56, 1  ;;  %v2294_v4 = vadd.f32 %v2293_v10, %v2292_v59 }
 0xb08   : > { %v2305_v61 = vadd.f32 %v2304_v55, %v2303_v56  ;;  %v2306_v7 = vsel %vm2210_vm0, 0.0, %v2294_v4 }
 0xb0a   : > { %v2307_v34 = vsel %vm2210_vm0, 0.0, %v2305_v61 }
 0xb45   : > { %v1998_v48 = vpop.xlane.xlu1 %1997 }
 0xb46   : > { %v2042_v62 = vmul.f32 %v4718_v13, %v1998_v48 }
 0xb47   : > { %v2007_v18 = vpop.xlane.xlu0 %2006 }
 0xb48   : > { %v2078_v54 = vmul.f32 %v4725_v38, %v2042_v62  ;;  %v2045_v11 = vmul.f32 %v4721_v2, %v2007_v18 }
 0xb4a   : > { %v2084_v60 = vsub.f32 %v4761_v19, %v2078_v54  ;;  %v2081_v42 = vmul.f32 %v4731_v17, %v2045_v11 }
 0xb4c   : > { %v2087_v0 = vsub.f32 %v4769_v21, %v2081_v42  ;;  %v4823_v9 = vsel %vm1978_vm12, %v2042_v62, %v2084_v60 }
 0xb4d   : > { %v2102_v36 = vsel %vm2094_vm14, %v4823_v9, 0.0 }
 0xb4e   : > { %v2112_v13 = vsel %vm829_vm6, %v2102_v36, 0.0  ;;  %v4831_v38 = vsel %vm1978_vm12, %v2045_v11, %v2087_v0 }
 0xb4f   : > { %2113 = vadd.xlane.f32.xlu1 %v2112_v13  ;;  %v2105_v2 = vsel %vm2094_vm14, %v4831_v38, 0.0 }
 0xb50   : > { %v2121_v17 = vsel %vm829_vm6, %v2105_v2, 0.0 }
 0xb51   : > { %2122 = vadd.xlane.f32.xlu0 %v2121_v17 }
 0xb89   : > { %v2227_v19 = vpop.xlane.xlu1 %2226 }
 0xb8a   : > { %v2247_v23 = vsel %vm2212_vm1, %v2227_v19, 0.0 }
 0xb8b   : > { %v2236_v21 = vpop.xlane.xlu0 %2235  ;;  %v2254_v52 = vrot.slane %v2247_v23, 4 }
 0xb8c   : > { %v2250_v15 = vsel %vm2212_vm1, %v2236_v21, 0.0 }
 0xb8d   : > { %v2262_v39 = vrot.slane %v2250_v15, 4  ;;  %v2255_v43 = vadd.f32 %v2254_v52, %v2247_v23 }
 0xb8f   : > { %v2263_v31 = vadd.f32 %v2262_v39, %v2250_v15  ;;  %v2256_v27 = vrot.slane %v2255_v43, 2 }
 0xb91   : > { %v2264_v40 = vrot.slane %v2263_v31, 2  ;;  %v2257_v33 = vadd.f32 %v2256_v27, %v2255_v43 }
 0xb93   : > { %v2265_v28 = vadd.f32 %v2264_v40, %v2263_v31  ;;  %v2258_v8 = vrot.slane %v2257_v33, 1 }
 0xb95   : > { %v2266_v53 = vrot.slane %v2265_v28, 1  ;;  %v2259_v14 = vadd.f32 %v2258_v8, %v2257_v33 }
 0xb97   : > { %v2267_v57 = vadd.f32 %v2266_v53, %v2265_v28  ;;  %3209 = vrcp.f32 %v2259_v14 }
 0xb99   : > { %3211 = vrcp.f32 %v2267_v57 }
 0xba1   : > { %v3210_v1 = vpop.eup %3209 }
 0xba2   : > { %v2273_v49 = vmul.f32 %v3210_v1, %v2227_v19 }
 0xba3   : > { %v3212_v41 = vpop.eup %3211 }
 0xba4   : > { %v2276_v32 = vmul.f32 %v3212_v41, %v2236_v21  ;;  %v2309_v30 = vmul.f32 %v2306_v7, %v2273_v49 }
 0xba6   : > { %v2312_v48 = vmul.f32 %v2307_v34, %v2276_v32  ;;  %v2315_v54 = vsub.f32 %v4801_v6, %v2309_v30 }
 0xba8   : > { %v2318_v42 = vsub.f32 %v4809_v51, %v2312_v48 }
 0xbdc   : > { %v2114_v44 = vpop.xlane.xlu1 %2113 }
 0xbdd   : > { %v2158_v62 = vmul.f32 %v4780_v50, %v2114_v44  ;;  %v4858_v50 = vsel %vm2210_vm0, %v2273_v49, %v2315_v54 }
 0xbde   : > { %v2123_v18 = vpop.xlane.xlu0 %2122  ;;  %v2395_v15 = vsel %vm2328_vm3, %v4858_v50, 0.0 }
 0xbdf   : > { %v2194_v11 = vmul.f32 %v4787_v24, %v2158_v62  ;;  %v2161_v60 = vmul.f32 %v4783_v37, %v2123_v18  ;;  %v2401_v58 = vsel %vm829_vm6, %v2395_v15, 0.0 }
 0xbe0   : > { %v2405_v12 = vrot.slane %v2401_v58, 4 }
 0xbe1   : > { %v2200_v0 = vsub.f32 %v4823_v9, %v2194_v11  ;;  %v2197_v36 = vmul.f32 %v4793_v22, %v2161_v60  ;;  %v4868_v22 = vsel %vm2210_vm0, %v2276_v32, %v2318_v42  ;;  %v2333_v9 = vsel %vm2326_vm2, %v4858_v50, 0.0 }
 0xbe2   : > { %v2336_v17 = vsel %vm2326_vm2, %v4868_v22, 0.0  ;;  %v2341_v19 = vsel %vm829_vm6, %v2333_v9, 0.0  ;;  %v2398_v43 = vsel %vm2328_vm3, %v4868_v22, 0.0  ;;  %v2406_v56 = vadd.f32 %v2405_v12, %v2401_v58 }
 0xbe3   : > { %v2203_v13 = vsub.f32 %v4831_v38, %v2197_v36  ;;  %v2206_v2 = vsel %vm2094_vm14, %v2158_v62, %v2200_v0  ;;  %v2350_v21 = vsel %vm829_vm6, %v2336_v17, 0.0  ;;  %v2412_v63 = vsel %vm829_vm6, %v2398_v43, 0.0 }
 0xbe4   : > { %v2218_v37 = vsel %vm2210_vm0, %v2206_v2, 0.0  ;;  %v2416_v14 = vrot.slane %v2412_v63, 4  ;;  %v2407_v32 = vrot.slane %v2406_v56, 2 }
 0xbe5   : > { %v2228_v24 = vsel %vm829_vm6, %v2218_v37, 0.0  ;;  %v2209_v6 = vsel %vm2094_vm14, %v2161_v60, %v2203_v13 }
 0xbe6   : > { %2229 = vadd.xlane.f32.xlu1 %v2228_v24  ;;  %v2221_v51 = vsel %vm2210_vm0, %v2209_v6, 0.0  ;;  %v2417_v49 = vadd.f32 %v2416_v14, %v2412_v63  ;;  %v2408_v62 = vadd.f32 %v2407_v32, %v2406_v56 }
 0xbe7   : > { %v2237_v38 = vsel %vm829_vm6, %v2221_v51, 0.0 }
 0xbe8   : > { %2238 = vadd.xlane.f32.xlu0 %v2237_v38  ;;  %v2418_v44 = vrot.slane %v2417_v49, 2  ;;  %v2409_v11 = vrot.slane %v2408_v62, 1 }
 0xbea   : > { %2342 = vadd.xlane.f32.xlu1 %v2341_v19  ;;  %v2419_v54 = vadd.f32 %v2418_v44, %v2417_v49  ;;  %v2410_v42 = vadd.f32 %v2409_v11, %v2408_v62 }
 0xbec   : > { %2351 = vadd.xlane.f32.xlu0 %v2350_v21  ;;  %v2420_v60 = vrot.slane %v2419_v54, 1  ;;  %v2422_v37 = vsel %vm2326_vm2, 0.0, %v2410_v42 }
 0xbee   : > { %v2421_v36 = vadd.f32 %v2420_v60, %v2419_v54 }
 0xbf0   : > { %v2423_v51 = vsel %vm2326_vm2, 0.0, %v2421_v36 }
 0xc73   : > { %v2230_v23 = vpop.xlane.xlu1 %2229 }
 0xc74   : > { %v2274_v52 = vmul.f32 %v3210_v1, %v2230_v23 }
 0xc75   : > { %v2239_v39 = vpop.xlane.xlu0 %2238 }
 0xc76   : > { %v2310_v31 = vmul.f32 %v2306_v7, %v2274_v52  ;;  %v2277_v27 = vmul.f32 %v3212_v41, %v2239_v39 }
 0xc77   : > { %v2343_v40 = vpop.xlane.xlu1 %2342 }
 0xc78   : > { %v2316_v46 = vsub.f32 %v2206_v2, %v2310_v31  ;;  %v2313_v33 = vmul.f32 %v2307_v34, %v2277_v27  ;;  %v2363_v28 = vsel %vm2328_vm3, %v2343_v40, 0.0 }
 0xc79   : > { %v2370_v47 = vrot.slane %v2363_v28, 4  ;;  %v2352_v8 = vpop.xlane.xlu0 %2351 }
 0xc7a   : > { %v2319_v35 = vsub.f32 %v2209_v6, %v2313_v33  ;;  %v2366_v53 = vsel %vm2328_vm3, %v2352_v8, 0.0  ;;  %v2322_v16 = vsel %vm2210_vm0, %v2274_v52, %v2316_v46 }
 0xc7b   : > { %v2371_v29 = vadd.f32 %v2370_v47, %v2363_v28  ;;  %v2378_v57 = vrot.slane %v2366_v53, 4  ;;  %v2334_v20 = vsel %vm2326_vm2, %v2322_v16, 0.0 }
 0xc7c   : > { %v2344_v45 = vsel %vm829_vm6, %v2334_v20, 0.0  ;;  %v2325_v59 = vsel %vm2210_vm0, %v2277_v27, %v2319_v35 }
 0xc7d   : > { %v2372_v10 = vrot.slane %v2371_v29, 2  ;;  %v2379_v1 = vadd.f32 %v2378_v57, %v2366_v53  ;;  %2345 = vadd.xlane.f32.xlu1 %v2344_v45  ;;  %v2337_v55 = vsel %vm2326_vm2, %v2325_v59, 0.0 }
 0xc7e   : > { %v2353_v41 = vsel %vm829_vm6, %v2337_v55, 0.0 }
 0xc7f   : > { %v2373_v4 = vadd.f32 %v2372_v10, %v2371_v29  ;;  %v2380_v61 = vrot.slane %v2379_v1, 2  ;;  %2354 = vadd.xlane.f32.xlu0 %v2353_v41 }
 0xc81   : > { %v2374_v7 = vrot.slane %v2373_v4, 1  ;;  %v2381_v30 = vadd.f32 %v2380_v61, %v2379_v1 }
 0xc83   : > { %v2375_v34 = vadd.f32 %v2374_v7, %v2373_v4  ;;  %v2382_v48 = vrot.slane %v2381_v30, 1 }
 0xc85   : > { %3213 = vrcp.f32 %v2375_v34  ;;  %v2383_v18 = vadd.f32 %v2382_v48, %v2381_v30 }
 0xc87   : > { %3215 = vrcp.f32 %v2383_v18 }
 0xc8f   : > { %v3214_v0 = vpop.eup %3213 }
 0xc90   : > { %v2389_v13 = vmul.f32 %v3214_v0, %v2343_v40 }
 0xc91   : > { %v3216_v2 = vpop.eup %3215 }
 0xc92   : > { %v2425_v24 = vmul.f32 %v2422_v37, %v2389_v13  ;;  %v2392_v6 = vmul.f32 %v3216_v2, %v2352_v8 }
 0xc94   : > { %v2431_v9 = vsub.f32 %v4858_v50, %v2425_v24  ;;  %v2428_v38 = vmul.f32 %v2423_v51, %v2392_v6 }
 0xc96   : > { %v2434_v17 = vsub.f32 %v4868_v22, %v2428_v38  ;;  %v4913_v19 = vsel %vm2326_vm2, %v2389_v13, %v2431_v9 }
 0xc97   : > { %v2449_v21 = vsel %vm2442_vm4, %v4913_v19, 0.0  ;;  %v2511_v35 = vsel %vm2444_vm5, %v4913_v19, 0.0 }
 0xc98   : > { %v2457_v23 = vsel %vm829_vm6, %v2449_v21, 0.0  ;;  %v4921_v15 = vsel %vm2326_vm2, %v2392_v6, %v2434_v17 }
 0xc99   : > { %2458 = vadd.xlane.f32.xlu1 %v2457_v23  ;;  %v2452_v50 = vsel %vm2442_vm4, %v4921_v15, 0.0  ;;  %v2514_v53 = vsel %vm2444_vm5, %v4921_v15, 0.0 }
 0xc9a   : > { %v2466_v22 = vsel %vm829_vm6, %v2452_v50, 0.0  ;;  %v2528_v29 = vsel %vm829_vm6, %v2514_v53, 0.0 }
 0xc9b   : > { %2467 = vadd.xlane.f32.xlu0 %v2466_v22  ;;  %v2532_v10 = vrot.slane %v2528_v29, 4 }
 0xc9d   : > { %v2533_v32 = vadd.f32 %v2532_v10, %v2528_v29 }
 0xc9f   : > { %v2534_v62 = vrot.slane %v2533_v32, 2 }
 0xca1   : > { %v2535_v60 = vadd.f32 %v2534_v62, %v2533_v32 }
 0xd0a   : > { %v2346_v52 = vpop.xlane.xlu1 %2345 }
 0xd0b   : > { %v2390_v39 = vmul.f32 %v3214_v0, %v2346_v52  ;;  %v2536_v0 = vrot.slane %v2535_v60, 1 }
 0xd0c   : > { %v2355_v43 = vpop.xlane.xlu0 %2354 }
 0xd0d   : > { %v2426_v31 = vmul.f32 %v2422_v37, %v2390_v39  ;;  %v2393_v27 = vmul.f32 %v3216_v2, %v2355_v43  ;;  %v2537_v2 = vadd.f32 %v2536_v0, %v2535_v60 }
 0xd0f   : > { %v2432_v58 = vsub.f32 %v2322_v16, %v2426_v31  ;;  %v2429_v40 = vmul.f32 %v2423_v51, %v2393_v27  ;;  %v2517_v16 = vsel %vm829_vm6, %v2511_v35, 0.0  ;;  %v2539_v38 = vsel %vm2442_vm4, 0.0, %v2537_v2 }
 0xd10   : > { %v2521_v20 = vrot.slane %v2517_v16, 4 }
 0xd11   : > { %v2435_v46 = vsub.f32 %v2325_v59, %v2429_v40  ;;  %v4929_v33 = vsel %vm2326_vm2, %v2390_v39, %v2432_v58 }
 0xd12   : > { %v2450_v63 = vsel %vm2442_vm4, %v4929_v33, 0.0  ;;  %v2522_v41 = vadd.f32 %v2521_v20, %v2517_v16 }
 0xd13   : > { %v2460_v28 = vsel %vm829_vm6, %v2450_v63, 0.0  ;;  %v4937_v12 = vsel %vm2326_vm2, %v2393_v27, %v2435_v46 }
 0xd14   : > { %2461 = vadd.xlane.f32.xlu1 %v2460_v28  ;;  %v2453_v47 = vsel %vm2442_vm4, %v4937_v12, 0.0  ;;  %v2523_v30 = vrot.slane %v2522_v41, 2 }
 0xd15   : > { %v2469_v8 = vsel %vm829_vm6, %v2453_v47, 0.0 }
 0xd16   : > { %2470 = vadd.xlane.f32.xlu0 %v2469_v8  ;;  %v2524_v54 = vadd.f32 %v2523_v30, %v2522_v41 }
 0xd18   : > { %v2525_v42 = vrot.slane %v2524_v54, 1 }
 0xd1a   : > { %v2526_v36 = vadd.f32 %v2525_v42, %v2524_v54 }
 0xd1c   : > { %v2538_v6 = vsel %vm2442_vm4, 0.0, %v2526_v36 }
 0xd26   : > { %v2459_v14 = vpop.xlane.xlu1 %2458 }
 0xd27   : > { %v2479_v57 = vsel %vm2444_vm5, %v2459_v14, 0.0 }
 0xd28   : > { %v2486_v45 = vrot.slane %v2479_v57, 4  ;;  %v2468_v59 = vpop.xlane.xlu0 %2467 }
 0xd29   : > { %v2482_v56 = vsel %vm2444_vm5, %v2468_v59, 0.0 }
 0xd2a   : > { %v2487_v1 = vadd.f32 %v2486_v45, %v2479_v57  ;;  %v2494_v55 = vrot.slane %v2482_v56, 4 }
 0xd2c   : > { %v2488_v4 = vrot.slane %v2487_v1, 2  ;;  %v2495_v49 = vadd.f32 %v2494_v55, %v2482_v56 }
 0xd2e   : > { %v2489_v61 = vadd.f32 %v2488_v4, %v2487_v1  ;;  %v2496_v7 = vrot.slane %v2495_v49, 2 }
 0xd30   : > { %v2490_v34 = vrot.slane %v2489_v61, 1  ;;  %v2497_v44 = vadd.f32 %v2496_v7, %v2495_v49 }
 0xd32   : > { %v2491_v48 = vadd.f32 %v2490_v34, %v2489_v61  ;;  %v2498_v18 = vrot.slane %v2497_v44, 1 }
 0xd34   : > { %3217 = vrcp.f32 %v2491_v48  ;;  %v2499_v11 = vadd.f32 %v2498_v18, %v2497_v44 }
 0xd36   : > { %3219 = vrcp.f32 %v2499_v11 }
 0xd3e   : > { %v3218_v13 = vpop.eup %3217 }
 0xd3f   : > { %v2505_v37 = vmul.f32 %v3218_v13, %v2459_v14 }
 0xd40   : > { %v3220_v24 = vpop.eup %3219 }
 0xd41   : > { %v2541_v51 = vmul.f32 %v2538_v6, %v2505_v37  ;;  %v2508_v9 = vmul.f32 %v3220_v24, %v2468_v59 }
 0xd43   : > { %v2547_v17 = vsub.f32 %v4913_v19, %v2541_v51  ;;  %v2544_v21 = vmul.f32 %v2539_v38, %v2508_v9 }
 0xd45   : > { %v2550_v23 = vsub.f32 %v4921_v15, %v2544_v21  ;;  %v2553_v50 = vsel %vm2442_vm4, %v2505_v37, %v2547_v17 }
 0xd46   : > { %v2565_v22 = vsel %vm2558_vm7, %v2553_v50, 0.0  ;;  %v2623_v56 = vsel %vm2560_vm8, %v2553_v50, 0.0 }
 0xd47   : > { %v2573_v52 = vsel %vm829_vm6, %v2565_v22, 0.0  ;;  %v2556_v39 = vsel %vm2442_vm4, %v2508_v9, %v2550_v23  ;;  %v2629_v41 = vsel %vm829_vm6, %v2623_v56, 0.0 }
 0xd48   : > { %2574 = vadd.xlane.f32.xlu1 %v2573_v52  ;;  %v2568_v19 = vsel %vm2558_vm7, %v2556_v39, 0.0  ;;  %v2626_v1 = vsel %vm2560_vm8, %v2556_v39, 0.0  ;;  %v2633_v61 = vrot.slane %v2629_v41, 4 }
 0xd49   : > { %v2582_v43 = vsel %vm829_vm6, %v2568_v19, 0.0  ;;  %v2640_v49 = vsel %vm829_vm6, %v2626_v1, 0.0 }
 0xd4a   : > { %2583 = vadd.xlane.f32.xlu0 %v2582_v43  ;;  %v2644_v7 = vrot.slane %v2640_v49, 4  ;;  %v2634_v5 = vadd.f32 %v2633_v61, %v2629_v41 }
 0xd4c   : > { %v2645_v44 = vadd.f32 %v2644_v7, %v2640_v49  ;;  %v2635_v62 = vrot.slane %v2634_v5, 2 }
 0xd4e   : > { %v2646_v54 = vrot.slane %v2645_v44, 2  ;;  %v2636_v60 = vadd.f32 %v2635_v62, %v2634_v5 }
 0xd50   : > { %v2647_v42 = vadd.f32 %v2646_v54, %v2645_v44  ;;  %v2637_v0 = vrot.slane %v2636_v60, 1 }
 0xd52   : > { %v2648_v36 = vrot.slane %v2647_v42, 1 }
 0xda1   : > { %v2462_v31 = vpop.xlane.xlu1 %2461 }
 0xda2   : > { %v2506_v15 = vmul.f32 %v3218_v13, %v2462_v31  ;;  %v2638_v13 = vadd.f32 %v2637_v0, %v2636_v60 }
 0xda3   : > { %v2471_v27 = vpop.xlane.xlu0 %2470 }
 0xda4   : > { %v2542_v58 = vmul.f32 %v2538_v6, %v2506_v15  ;;  %v2509_v40 = vmul.f32 %v3220_v24, %v2471_v27  ;;  %v2649_v24 = vadd.f32 %v2648_v36, %v2647_v42  ;;  %v2650_v9 = vsel %vm2558_vm7, 0.0, %v2638_v13 }
 0xda6   : > { %v2548_v46 = vsub.f32 %v4929_v33, %v2542_v58  ;;  %v2545_v63 = vmul.f32 %v2539_v38, %v2509_v40  ;;  %v2651_v23 = vsel %vm2558_vm7, 0.0, %v2649_v24 }
 0xda8   : > { %v2551_v28 = vsub.f32 %v4937_v12, %v2545_v63  ;;  %v2554_v47 = vsel %vm2442_vm4, %v2506_v15, %v2548_v46 }
 0xda9   : > { %v2566_v8 = vsel %vm2558_vm7, %v2554_v47, 0.0 }
 0xdaa   : > { %v2576_v35 = vsel %vm829_vm6, %v2566_v8, 0.0  ;;  %v2557_v53 = vsel %vm2442_vm4, %v2509_v40, %v2551_v28 }
 0xdab   : > { %2577 = vadd.xlane.f32.xlu1 %v2576_v35  ;;  %v2569_v16 = vsel %vm2558_vm7, %v2557_v53, 0.0 }
 0xdac   : > { %v2585_v33 = vsel %vm829_vm6, %v2569_v16, 0.0 }
 0xdad   : > { %2586 = vadd.xlane.f32.xlu0 %v2585_v33 }
 0xdd5   : > { %v2575_v14 = vpop.xlane.xlu1 %2574 }
 0xdd6   : > { %v2595_v29 = vsel %vm2560_vm8, %v2575_v14, 0.0 }
 0xdd7   : > { %v2584_v12 = vpop.xlane.xlu0 %2583  ;;  %v2602_v20 = vrot.slane %v2595_v29, 4 }
 0xdd8   : > { %v2598_v57 = vsel %vm2560_vm8, %v2584_v12, 0.0 }
 0xdd9   : > { %v2610_v45 = vrot.slane %v2598_v57, 4  ;;  %v2603_v59 = vadd.f32 %v2602_v20, %v2595_v29 }
 0xddb   : > { %v2611_v10 = vadd.f32 %v2610_v45, %v2598_v57  ;;  %v2604_v55 = vrot.slane %v2603_v59, 2 }
 0xddd   : > { %v2612_v4 = vrot.slane %v2611_v10, 2  ;;  %v2605_v32 = vadd.f32 %v2604_v55, %v2603_v59 }
 0xddf   : > { %v2613_v30 = vadd.f32 %v2612_v4, %v2611_v10  ;;  %v2606_v34 = vrot.slane %v2605_v32, 1 }
 0xde1   : > { %v2614_v48 = vrot.slane %v2613_v30, 1  ;;  %v2607_v18 = vadd.f32 %v2606_v34, %v2605_v32 }
 0xde3   : > { %v2615_v11 = vadd.f32 %v2614_v48, %v2613_v30  ;;  %3221 = vrcp.f32 %v2607_v18 }
 0xde5   : > { %3223 = vrcp.f32 %v2615_v11 }
 0xded   : > { %v3222_v2 = vpop.eup %3221 }
 0xdef   : > { %v3224_v51 = vpop.eup %3223 }
 0xe38   : > { %v2578_v37 = vpop.xlane.xlu1 %2577 }
 0xe39   : > { %v2620_v6 = vmul.f32 %v3222_v2, %v2578_v37 }
 0xe3a   : > { %v2587_v38 = vpop.xlane.xlu0 %2586 }
 0xe3b   : > { %v2652_v17 = vmul.f32 %v2650_v9, %v2620_v6  ;;  %v2621_v21 = vmul.f32 %v3224_v51, %v2587_v38 }
 0xe3d   : > { %v2654_v50 = vsub.f32 %v2554_v47, %v2652_v17  ;;  %v2653_v22 = vmul.f32 %v2651_v23, %v2621_v21 }
 0xe3f   : > { %v2655_v52 = vsub.f32 %v2557_v53, %v2653_v22  ;;  %v2656_v39 = vsel %vm2558_vm7, %v2620_v6, %v2654_v50 }
 0xe41   : > { %v2657_v19 = vsel %vm2558_vm7, %v2621_v21, %v2655_v52 }
 0xe42   : > { %v2658_v43 = vpack.c.bf16 %v2657_v19, %v2656_v39 }
 0xe44   : > { %3034 = vmatmul.mubr.msk.bf16.vlgmr.msra.gmra.mrb[4].mxu0 %vm829_vm6, %v2658_v43 }
 0xe45   : > { %3410 = shalt.err (!%p3407_p11)
}
 0xe46   : > { %s3411_s27 = scalar_lea.hbm %s4994_s16, 32  ;;  %s3415_s26 = scalar_lea.hbm %s5086_s11, 64 }
 0xe47   : > { %p3412_p8 = scmp.ne.s32.totalorder %s4994_s16, %s3411_s27  ;;  %p3416_p10 = scmp.lt.u32.totalorder %s4994_s16, %s5086_s11 }
 0xe48   : > { %p3417_p13 = scmp.lt.u32.totalorder %s3415_s26, %s3411_s27  ;;  %p3419_p9 = scmp.lt.u32.totalorder %s3411_s27, %s4994_s16 }
 0xe49   : > { %p3413_p3 = pnand %p3412_p8, %p3750_p1 }
 0xe4a   : > { %p3418_p5 = por %p3417_p13, %p3416_p10 }
 0xe4b   : > { %p3414_p7 = pneg %p3413_p3 }
 0xe4c   : > { %p3420_p2 = por %p3419_p9, %p3418_p5 }
 0xe4e   : > { %p3421_p4 = pnand %p3420_p2, %p3414_p7 }
 0xe50   : > { %3424 = shalt.err (!%p3421_p4)
}
 0xe51   : > { %s3527_s5 = smov 16   ;;  %s3528_s23 = smov 1  }
 0xe52   : > { %3058 = dma.vmem_to_hbm [thread:$0]  (%p3750_p1), %s4996_s25, 32, %s4994_s16, %s2754_s10, %s3527_s5, %s3527_s5, %s3528_s23  }
 0xe53   : > { %s512_s24 = scalar_lea.vmem [#allocation13], %s3853_s13  ;;  %s2998_s17 = sshll.u32 %s3613_s21, 7 }
 0xe54   : > { %s2767_s30 = sshll.u32 %s512_s24, 4  ;;  %s5124_s27 = sld [smem:[#allocation30_spill]]  ;;  %s5026_s30 = int_to_ptr.vmem [resolvable:$true] %s2767_s30 }
 0xe55   : > { %s2749_s13 = scalar_lea.sflag [#allocation4], %s3850_s7  ;;  %s3425_s21 = scalar_lea.vmem %s5026_s30, 128 }
 0xe56   : > { %p3426_p6 = scmp.ne.s32.totalorder %s5026_s30, %s3425_s21  ;;  %s3529_s16 = smov [#allocation13]  }
 0xe57   : > { %s3429_s10 = sshll.u32 %s3529_s16, 4  ;;  %s3430_s10 = int_to_ptr.vmem [resolvable:$false] %s3429_s10 }
 0xe58   : > { %p3427_p0 = pnand %p3426_p6, %p3750_p1  ;;  %s3431_s29 = scalar_lea.vmem %s3430_s10, 256 }
 0xe59   : > { %p3432_p11 = scmp.lt.s32.totalorder %s5026_s30, %s3430_s10  ;;  %p3433_p8 = scmp.lt.s32.totalorder %s3431_s29, %s3425_s21 }
 0xe5a   : > { %s5031_s25 = scalar_lea.hbm %s5124_s27, %s2998_s17  ;;  %p3428_p12 = pneg %p3427_p0 }
 0xe5b   : > { %p3434_p3 = por %p3433_p8, %p3432_p11 }
 0xe5d   : > { %p3435_p7 = pnand %p3434_p3, %p3428_p12 }
 0xf17   : > { %v2696_v3 = vpop.f32.mrb[4].mxu0 }
 0xf18   : > { %v3035_v31 = vpop.f32.mrb[5].mxu0  ;;  %v2703_v27 = vadd.f32 %v3942_v26, %v2696_v3 }
 0xf19   : > { %v2699_v15 = vpop.f32.mrb[6].mxu0 }
 0xf1a   : > { %v2704_v58 = vadd.f32 %v3940_v25, %v2699_v15  ;;  %v3036_v40 = vpop.f32.mrb[7].mxu0 }
 0xf1c   : > { %v3011_v46 = vpack.c.bf16 %v2704_v58, %v2703_v27 }
 0xf1e   : > { %3012 = vst [vmem:[%s512_s24] sm:$0xff] %v3011_v46  }
 0xf1f   : > { %3438 = shalt.err (!%p3435_p7)
}
 0xf20   : > { %s3439_s3 = scalar_lea.hbm %s5031_s25, 128  ;;  %s3443_s1 = scalar_lea.hbm %s5124_s27, 256 }
 0xf21   : > { %p3440_p10 = scmp.ne.s32.totalorder %s5031_s25, %s3439_s3  ;;  %p3444_p9 = scmp.lt.u32.totalorder %s5031_s25, %s5124_s27 }
 0xf22   : > { %p3445_p2 = scmp.lt.u32.totalorder %s3443_s1, %s3439_s3  ;;  %p3447_p6 = scmp.lt.u32.totalorder %s3439_s3, %s5031_s25 }
 0xf23   : > { %p3441_p13 = pnand %p3440_p10, %p3750_p1 }
 0xf24   : > { %p3446_p4 = por %p3445_p2, %p3444_p9 }
 0xf25   : > { %p3442_p5 = pneg %p3441_p13 }
 0xf26   : > { %p3448_p0 = por %p3447_p6, %p3446_p4 }
 0xf28   : > { %p3449_p12 = pnand %p3448_p0, %p3442_p5 }
 0xf2a   : > { %3452 = shalt.err (!%p3449_p12)
}
 0xf2b   : > { %s3530_s24 = smov 64   ;;  %s3531_s17 = smov 4  }
 0xf2c   : > { %3057 = dma.vmem_to_hbm [thread:$0]  (%p3750_p1), %s5026_s30, 128, %s5031_s25, %s2749_s13, %s3530_s24, %s3530_s24, %s3531_s17  }
 0xf2d PF: > { %s5125_s15 = sld [smem:[#allocation23_spill]]  ;;  %s5126_s4 = sld [smem:[#allocation24_spill]] }
 0xf2e   : > { %p5128_p8 = scmp.ge.s32.totalorder %s3511_s20, 2 }
 0xf33   : > { %s2798_s21 = sand.u32 1, %s5125_s15   ;;  %p5127_p11 = scmp.ne.s32.totalorder %s5126_s4, 0 }
 0xf34   : > { %s2799_s16 = scalar_lea.sflag [#allocation4], %s2798_s21 }
 0xf35   : > { %p3082_p3 = pnand %p5128_p8, %p5127_p11 }
 0xf37   : > { %3490 = dma.done.wait (!%p3082_p3), %s2799_s16, 128  }
 0xf38   : > { %3492 = vsyncadd (!%p3082_p3), %s2799_s16, 4294967168  ;;  %s2808_s10 = scalar_lea.sflag [#allocation15], %s2798_s21 }
 0xf39   : > { %3494 = dma.done.wait (!%p3082_p3), %s2808_s10, 32  }
 0xf3a   : > { %3496 = vsyncadd (!%p3082_p3), %s2808_s10, 4294967264  ;;  %p33_p1 = scmp.ge.s32.totalorder %s3740_s28, 4   ;;  %s5129_s17 = smov %s3503_s18 }
 0xf3b   : > { %s5130_s18 = smov %s3507_s19  ;;  %s5131_s19 = smov %s3756_s14 }
 0xf3c   : > { %s5132_s20 = smov %s3740_s28  ;;  %35 = sbr.rel (!%p33_p1) target bundleno = 18 (0x12), region = 154 }
 0xf43   :  { %2813 = vsyncpa [#allocation3], 1 }
 0xf44   :  { %2815 = vsyncpa [#allocation3 + $0x1], 1 }
 0xf45   :  { %2816 = vsyncpa [#allocation6], 1 }
 0xf46   :  { %2818 = vsyncpa [#allocation6 + $0x1], 1 }
 0xf47   :  { %2819 = vsyncpa [#allocation9], 1 }
 0xf48   :  { %2820 = vsyncpa [#allocation12], 1 }
 0xf49   :  { %2821 = vsyncpa [#allocation4], 1 }
 0xf4a   :  { %2823 = vsyncpa [#allocation4 + $0x1], 1 }
 0xf4b   :  { %2824 = vsyncpa [#allocation15], 1 }
 0xf4c   :  { %2826 = vsyncpa [#allocation15 + $0x1], 1 }

</bundles_post_ra>
